<compile_context>
chip_gen: v7x
topology: tpu7x:2x2x1
jax: 0.10.0
libtpu: 0.0.40
codegen_flags: <defaults>
</compile_context>

<pallas_src>
import functools
import math

import jax
import jax.numpy as jnp
from jax.experimental import pallas as pl
from jax.experimental.pallas import tpu as pltpu

_LN_EPS = 1e-12                 # HF ViT layer_norm_eps
_BN_EPS = 1e-5                  # torch.nn.BatchNorm1d default


def _round_up(x, m):
    return (x + m - 1) // m * m


def _tpu_vmem_capacity():
    try:
        return int(pltpu.get_tpu_info().vmem_capacity_bytes)
    except Exception:
        return 64 * 1024 * 1024     # conservative (v7x-sized) fallback


_VMEM_CAP = _tpu_vmem_capacity()
if _VMEM_CAP >= 100 * 1024 * 1024:   # v5e / v6e: 128 MiB physical VMEM
    _VMEM_LIMIT = 96 * 1024 * 1024
    _ROW_TILE = 512
else:                                # v7x: 64 MiB physical VMEM
    _VMEM_LIMIT = 48 * 1024 * 1024
    _ROW_TILE = 256


def _row_block(m, target=None):
    # Full block if it fits (always legal: equals full dim), else a multiple-of-8 tile.
    t = _ROW_TILE if target is None else target
    return m if m <= t else t


def _cparams(grid_rank):
    return pltpu.CompilerParams(
        dimension_semantics=("parallel",) * grid_rank,
        vmem_limit_bytes=_VMEM_LIMIT,
    )


# ----------------------------------------------------------------------------
# elementwise helpers (run inside kernels, f32)
# ----------------------------------------------------------------------------

def _gelu(x):
    # tanh-form GELU: one EUP transcendental per element instead of a ~12-op VALU erf
    # polynomial; <~1e-3 abs deviation from exact erf GELU, fine for inference.
    c = math.sqrt(2.0 / math.pi)
    return 0.5 * x * (1.0 + jnp.tanh(c * (x + 0.044715 * x * x * x)))


def _layernorm(x, g, b, eps):
    mean = jnp.mean(x, axis=-1, keepdims=True)
    xc = x - mean
    var = jnp.mean(xc * xc, axis=-1, keepdims=True)
    return xc * jax.lax.rsqrt(var + eps) * g + b


# ----------------------------------------------------------------------------
# Pallas kernels
# ----------------------------------------------------------------------------

def _matmul_bias_kernel(x_ref, w_ref, b_ref, o_ref):
    y = jnp.dot(x_ref[...].astype(jnp.bfloat16), w_ref[...],
                preferred_element_type=jnp.float32) + b_ref[...]
    o_ref[...] = y.astype(o_ref.dtype)


def _attn_layer_kernel(x_ref, g_ref, b_ref, wqkv_ref, bqkv_ref, wo_ref, bo_ref,
                       o_ref, qkv_scr, ctx_scr, *, heads, dh, scale, eps):
    # One batch element per grid step.
    # LN1 + fused QKV projection (single full-depth MXU matmul), parked in VMEM scratch.
    x = x_ref[0].astype(jnp.float32)                                  # (S, D) f32
    xn = _layernorm(x, g_ref[...], b_ref[...], eps)
    qkv_scr[...] = (jnp.dot(xn.astype(jnp.bfloat16), wqkv_ref[...],
                            preferred_element_type=jnp.float32)
                    + bqkv_ref[...]).astype(jnp.bfloat16)             # (S, 3D) bf16

    D = heads * dh
    # Static unroll over heads; every per-head value is scratch-backed (no carried
    # accumulator), so live ranges end each iteration.
    # TODO(synk): for dh=64 backbones, permute W_qkv columns at init (or emit a
    # (3, heads, S, dh) QKV layout) so head slices are 128-lane aligned.
    for h in range(heads):
        q = qkv_scr[:, h * dh:(h + 1) * dh]                           # (S, dh) bf16
        k = qkv_scr[:, D + h * dh: D + (h + 1) * dh]
        v = qkv_scr[:, 2 * D + h * dh: 2 * D + (h + 1) * dh]
        s = jax.lax.dot_general(q, k, (((1,), (1,)), ((), ())),
                                preferred_element_type=jnp.float32) * scale
        m = jnp.max(s, axis=-1, keepdims=True)
        p = jnp.exp(s - m)
        p = p * pl.reciprocal(jnp.sum(p, axis=-1, keepdims=True), approx=True)
        ctx_scr[:, h * dh:(h + 1) * dh] = jnp.dot(
            p.astype(jnp.bfloat16), v,
            preferred_element_type=jnp.float32).astype(jnp.bfloat16)

    # Head merge + output projection as ONE full-depth (S,D)@(D,D) matmul, + residual.
    out = (jnp.dot(ctx_scr[...], wo_ref[...], preferred_element_type=jnp.float32)
           + bo_ref[...] + x)
    o_ref[0] = out.astype(o_ref.dtype)


def _ln_mlp_res_kernel(x_ref, g_ref, b_ref, w1_ref, b1_ref, w2_ref, b2_ref, o_ref, *, eps):
    x = x_ref[...].astype(jnp.float32)                                # (bm, D) f32
    xn = _layernorm(x, g_ref[...], b_ref[...], eps)
    h1 = jnp.dot(xn.astype(jnp.bfloat16), w1_ref[...],
                 preferred_element_type=jnp.float32) + b1_ref[...]
    h1 = _gelu(h1)
    h2 = jnp.dot(h1.astype(jnp.bfloat16), w2_ref[...],
                 preferred_element_type=jnp.float32) + b2_ref[...]
    o_ref[...] = (x + h2).astype(o_ref.dtype)                         # residual


def _classifier_kernel(cls_ref, attr_ref, g_ref, b_ref,
                       w1c_ref, w1a_ref, b1_ref, s1_ref, t1_ref,
                       w2_ref, b2_ref, s2_ref, t2_ref,
                       w3_ref, b3_ref, s3_ref, t3_ref,
                       w4_ref, b4_ref, o_ref, *, ln_eps):
    # Final ViT LayerNorm applied to the CLS row only (LN is per-token => equivalent).
    xn = _layernorm(cls_ref[...].astype(jnp.float32), g_ref[...], b_ref[...], ln_eps)
    a = attr_ref[...].astype(jnp.float32)
    # Linear1 on [cls | attributes]: concat avoided by splitting W1 into two matmuls.
    y = (jnp.dot(xn.astype(jnp.bfloat16), w1c_ref[...], preferred_element_type=jnp.float32)
         + jnp.dot(a.astype(jnp.bfloat16), w1a_ref[...], preferred_element_type=jnp.float32)
         + b1_ref[...])
    y = _gelu(y * s1_ref[...] + t1_ref[...])          # BN(eval, folded) -> GELU; Dropout = id
    y = jnp.dot(y.astype(jnp.bfloat16), w2_ref[...],
                preferred_element_type=jnp.float32) + b2_ref[...]
    y = _gelu(y * s2_ref[...] + t2_ref[...])
    y = jnp.dot(y.astype(jnp.bfloat16), w3_ref[...],
                preferred_element_type=jnp.float32) + b3_ref[...]
    y = _gelu(y * s3_ref[...] + t3_ref[...])
    # Final Linear, columns padded to a lane-dense multiple of 128 (sliced outside).
    o_ref[...] = jnp.dot(y.astype(jnp.bfloat16), w4_ref[...],
                         preferred_element_type=jnp.float32) + b4_ref[...]


# ----------------------------------------------------------------------------
# Pallas wrappers
# ----------------------------------------------------------------------------

def _row(i):
    return (i, 0)


def _rep(i):
    return (0, 0)


def pallas_matmul_bias(x, w, b, out_dtype=jnp.float32):
    M, K = x.shape
    N = w.shape[1]
    bm = _row_block(M)
    return pl.pallas_call(
        _matmul_bias_kernel,
        out_shape=jax.ShapeDtypeStruct((M, N), out_dtype),
        grid=(pl.cdiv(M, bm),),
        in_specs=[pl.BlockSpec((bm, K), _row),
                  pl.BlockSpec((K, N), _rep),
                  pl.BlockSpec((1, N), _rep)],
        out_specs=pl.BlockSpec((bm, N), _row),
        compiler_params=_cparams(1),
    )(x, w, b.reshape(1, N))


def pallas_attn_layer(h, ln_g, ln_b, w_qkv, b_qkv, wo, bo, heads):
    """LN1 + fused QKV + attention + output projection + residual, one call, grid over B."""
    B, S, D = h.shape
    dh = D // heads
    assert heads * dh == D
    ce = pl.CostEstimate(
        flops=int(2 * B * S * D * 3 * D + 4 * B * heads * S * S * dh + 2 * B * S * D * D),
        transcendentals=int(B * heads * S * S),
        bytes_accessed=int(2 * (B * S * D) * 2 + (3 * D * D + D * D) * 2 + 8 * D * 4),
    )
    # TODO(synk): pipeline_mode=pl.Buffered(1) on the replicated weight specs (v7x VMEM
    # saver) and a second parallel grid axis (Q tiles / head groups) for v7x dual-TC.
    return pl.pallas_call(
        functools.partial(_attn_layer_kernel, heads=heads, dh=dh,
                          scale=1.0 / math.sqrt(dh), eps=_LN_EPS),
        out_shape=jax.ShapeDtypeStruct((B, S, D), jnp.bfloat16),
        grid=(B,),
        in_specs=[pl.BlockSpec((1, S, D), lambda b: (b, 0, 0)),
                  pl.BlockSpec((1, D), _rep),
                  pl.BlockSpec((1, D), _rep),
                  pl.BlockSpec((D, 3 * D), _rep),
                  pl.BlockSpec((1, 3 * D), _rep),
                  pl.BlockSpec((D, D), _rep),
                  pl.BlockSpec((1, D), _rep)],
        out_specs=pl.BlockSpec((1, S, D), lambda b: (b, 0, 0)),
        scratch_shapes=[pltpu.VMEM((S, 3 * D), jnp.bfloat16),
                        pltpu.VMEM((S, D), jnp.bfloat16)],
        compiler_params=_cparams(1),
        cost_estimate=ce,
    )(h, ln_g.reshape(1, D), ln_b.reshape(1, D),
      w_qkv, b_qkv.reshape(1, 3 * D), wo, bo.reshape(1, D))


def pallas_ln_mlp_residual(x, g, b, w1, b1, w2, b2, eps=_LN_EPS):
    M, D = x.shape
    Hm = w1.shape[1]
    bm = _row_block(M)
    ce = pl.CostEstimate(
        flops=int(4 * M * D * Hm),
        transcendentals=int(M * Hm),
        bytes_accessed=int(2 * (M * D) * 2 + 2 * (D * Hm) * 2 + (Hm + 3 * D) * 4),
    )
    return pl.pallas_call(
        functools.partial(_ln_mlp_res_kernel, eps=eps),
        out_shape=jax.ShapeDtypeStruct((M, D), jnp.bfloat16),
        grid=(pl.cdiv(M, bm),),
        in_specs=[pl.BlockSpec((bm, D), _row),
                  pl.BlockSpec((1, D), _rep),
                  pl.BlockSpec((1, D), _rep),
                  pl.BlockSpec((D, Hm), _rep),
                  pl.BlockSpec((1, Hm), _rep),
                  pl.BlockSpec((Hm, D), _rep),
                  pl.BlockSpec((1, D), _rep)],
        out_specs=pl.BlockSpec((bm, D), _row),
        compiler_params=_cparams(1),
        cost_estimate=ce,
    )(x, g.reshape(1, D), b.reshape(1, D), w1, b1.reshape(1, Hm), w2, b2.reshape(1, D))


def pallas_classifier(cls_tok, attrs, ln_g, ln_b, clf, ln_eps=_LN_EPS):
    B, D = cls_tok.shape
    A = attrs.shape[1]
    # head widths derived from the weights (no hardcoding)
    H1 = clf['w1_cls'].shape[1]
    H2 = clf['w2'].shape[1]
    H3 = clf['w3'].shape[1]
    NCp = clf['w4'].shape[1]
    bm = _row_block(B)
    in_specs = [
        pl.BlockSpec((bm, D), _row),                 # cls token
        pl.BlockSpec((bm, A), _row),                 # attributes
        pl.BlockSpec((1, D), _rep), pl.BlockSpec((1, D), _rep),          # final ViT LN g/b
        pl.BlockSpec((D, H1), _rep), pl.BlockSpec((A, H1), _rep),
        pl.BlockSpec((1, H1), _rep), pl.BlockSpec((1, H1), _rep), pl.BlockSpec((1, H1), _rep),
        pl.BlockSpec((H1, H2), _rep), pl.BlockSpec((1, H2), _rep),
        pl.BlockSpec((1, H2), _rep), pl.BlockSpec((1, H2), _rep),
        pl.BlockSpec((H2, H3), _rep), pl.BlockSpec((1, H3), _rep),
        pl.BlockSpec((1, H3), _rep), pl.BlockSpec((1, H3), _rep),
        pl.BlockSpec((H3, NCp), _rep), pl.BlockSpec((1, NCp), _rep),
    ]
    args = (cls_tok, attrs, ln_g.reshape(1, D), ln_b.reshape(1, D),
            clf['w1_cls'], clf['w1_attr'], clf['b1'].reshape(1, H1),
            clf['s1'].reshape(1, H1), clf['t1'].reshape(1, H1),
            clf['w2'], clf['b2'].reshape(1, H2),
            clf['s2'].reshape(1, H2), clf['t2'].reshape(1, H2),
            clf['w3'], clf['b3'].reshape(1, H3),
            clf['s3'].reshape(1, H3), clf['t3'].reshape(1, H3),
            clf['w4'], clf['b4'].reshape(1, NCp))
    return pl.pallas_call(
        functools.partial(_classifier_kernel, ln_eps=ln_eps),
        out_shape=jax.ShapeDtypeStruct((B, NCp), jnp.float32),
        grid=(pl.cdiv(B, bm),),
        in_specs=in_specs,
        out_specs=pl.BlockSpec((bm, NCp), _row),
        compiler_params=_cparams(1),
    )(*args)


# ----------------------------------------------------------------------------
# model forward (thin JAX glue around the fused Pallas kernels)
# ----------------------------------------------------------------------------

def vit_encode(params, pixel_values, cfg):
    """Runs the ViT encoder; returns hidden states BEFORE the final LayerNorm
    (the final LN is fused into the classifier kernel, applied to the CLS row)."""
    B, C, H, W = pixel_values.shape
    P = cfg['patch']
    D = cfg['hidden']
    heads = cfg['heads']
    n_patches = (H // P) * (W // P)
    S = n_patches + 1

    # Conv2d(kernel=stride=patch) == patch extraction + one Pallas matmul.
    x = pixel_values.reshape(B, C, H // P, P, W // P, P)
    x = x.transpose(0, 2, 4, 1, 3, 5).reshape(B * n_patches, C * P * P)
    tokens = pallas_matmul_bias(x, params['patch_w'], params['patch_b']).reshape(B, n_patches, D)

    cls = jnp.broadcast_to(params['cls'], (B, 1, D))
    # bf16 residual stream between kernels (halves HBM traffic); dropout = identity.
    h = (jnp.concatenate([cls, tokens], axis=1) + params['pos']).astype(jnp.bfloat16)
    M = B * S

    for lyr in params['layers']:
        # (A) LN1 + fused QKV + attention + single full-depth output proj + residual.
        h = pallas_attn_layer(h, lyr['ln1_g'], lyr['ln1_b'],
                              lyr['w_qkv'], lyr['b_qkv'], lyr['wo'], lyr['bo'], heads=heads)
        # (B) LN2 + MLP + residual.
        h = pallas_ln_mlp_residual(h.reshape(M, D), lyr['ln2_g'], lyr['ln2_b'],
                                   lyr['w1'], lyr['b1'], lyr['w2'], lyr['b2']).reshape(B, S, D)
    return h


def bird_classifier_forward(params, x, attributes, cfg):
    h = vit_encode(params['vit'], x, cfg)          # (B, S, D) bf16, pre-final-LN
    cls_tok = h[:, 0, :]                           # (B, D)
    logits_pad = pallas_classifier(cls_tok, attributes,
                                   params['vit']['ln_g'], params['vit']['ln_b'],
                                   params['clf'])
    return logits_pad[:, :cfg['num_classes']]


# ----------------------------------------------------------------------------
# deterministic parameter construction (synthetic; not a checkpoint load)
# ----------------------------------------------------------------------------
# TODO(synk): pretrained ViT weight loading (ViTModel.from_pretrained) has no in-script
# equivalent; weights are deterministic synthetic values instead.

def init_params(key, cfg):
    D = cfg['hidden']
    C = cfg['channels']
    P = cfg['patch']
    A = cfg['attribute_dim']
    NC = cfg['num_classes']
    n_patches = (cfg['img'] // P) ** 2
    S = n_patches + 1

    keys = iter(jax.random.split(key, 256))

    def dense(din, dout):
        # weights stored bf16 (MXU operands), biases f32
        w = (0.02 * jax.random.normal(next(keys), (din, dout), jnp.float32)).astype(jnp.bfloat16)
        b = 0.01 * jax.random.normal(next(keys), (dout,), jnp.float32)
        return w, b

    vit = {}
    vit['patch_w'], vit['patch_b'] = dense(C * P * P, D)
    vit['cls'] = 0.02 * jax.random.normal(next(keys), (1, 1, D), jnp.float32)
    vit['pos'] = 0.02 * jax.random.normal(next(keys), (1, S, D), jnp.float32)
    vit['ln_g'] = jnp.ones((D,), jnp.float32)
    vit['ln_b'] = jnp.zeros((D,), jnp.float32)
    vit['layers'] = []
    for _ in range(cfg['layers']):
        lyr = {
            'ln1_g': jnp.ones((D,), jnp.float32), 'ln1_b': jnp.zeros((D,), jnp.float32),
            'ln2_g': jnp.ones((D,), jnp.float32), 'ln2_b': jnp.zeros((D,), jnp.float32),
        }
        wq, bq = dense(D, D)
        wk, bk = dense(D, D)
        wv, bv = dense(D, D)
        # fused QKV (equivalent to concatenating the separate q/k/v projections)
        lyr['w_qkv'] = jnp.concatenate([wq, wk, wv], axis=1)
        lyr['b_qkv'] = jnp.concatenate([bq, bk, bv], axis=0)
        lyr['wo'], lyr['bo'] = dense(D, D)
        lyr['w1'], lyr['b1'] = dense(D, cfg['mlp'])
        lyr['w2'], lyr['b2'] = dense(cfg['mlp'], D)
        vit['layers'].append(lyr)

    # classifier head: Linear(1024)+BN+GELU, Linear(512)+BN+GELU, Linear(256)+BN+GELU,
    # Linear(NC). BatchNorm1d (eval) folded to scale/shift using default running stats.
    def bn_fold(n):
        g = jnp.ones((n,), jnp.float32)
        b = jnp.zeros((n,), jnp.float32)
        mean = jnp.zeros((n,), jnp.float32)
        var = jnp.ones((n,), jnp.float32)
        scale = g / jnp.sqrt(var + _BN_EPS)
        return scale, b - mean * scale

    clf = {}
    w1, b1 = dense(D + A, 1024)
    clf['w1_cls'] = w1[:D]      # split so the [cls | attributes] concat happens as two matmuls
    clf['w1_attr'] = w1[D:]
    clf['b1'] = b1
    clf['s1'], clf['t1'] = bn_fold(1024)
    clf['w2'], clf['b2'] = dense(1024, 512)
    clf['s2'], clf['t2'] = bn_fold(512)
    clf['w3'], clf['b3'] = dense(512, 256)
    clf['s3'], clf['t3'] = bn_fold(256)
    w4, b4 = dense(256, NC)
    ncp = max(128, _round_up(NC, 128))  # lane-dense padded output, sliced outside the kernel
    clf['w4'] = jnp.zeros((256, ncp), jnp.bfloat16).at[:, :NC].set(w4)
    clf['b4'] = jnp.zeros((ncp,), jnp.float32).at[:NC].set(b4)

    return {'vit': vit, 'clf': clf}


# ----------------------------------------------------------------------------

if __name__ == "__main__":
    cfg = dict(img=16, patch=8, channels=3, hidden=32, heads=4, layers=2, mlp=64,
               attribute_dim=16, num_classes=8)

    key = jax.random.PRNGKey(0)
    pkey, xkey, akey = jax.random.split(key, 3)

    params = init_params(pkey, cfg)

    B = 2
    x = jax.random.normal(xkey, (B, cfg['channels'], cfg['img'], cfg['img']), jnp.float32)
    attributes = jax.random.normal(akey, (B, cfg['attribute_dim']), jnp.float32)

    fwd = jax.jit(functools.partial(bird_classifier_forward, cfg=cfg))
    logits = fwd(params, x, attributes)
    jax.block_until_ready(logits)

    assert logits.shape == (B, cfg['num_classes'])
    assert bool(jnp.all(jnp.isfinite(logits)))
    print("KERNEL_OK")
</pallas_src>

<mosaic_0001>
module attributes {stable_mosaic.version = 11 : i64} {
  func.func @_attn_layer_kernel(%arg0: i32, %arg1: memref<1x5x32xbf16, #tpu.memory_space<vmem>>, %arg2: memref<1x32xf32, #tpu.memory_space<vmem>>, %arg3: memref<1x32xf32, #tpu.memory_space<vmem>>, %arg4: memref<32x96xbf16, #tpu.memory_space<vmem>>, %arg5: memref<1x96xf32, #tpu.memory_space<vmem>>, %arg6: memref<32x32xbf16, #tpu.memory_space<vmem>>, %arg7: memref<1x32xf32, #tpu.memory_space<vmem>>, %arg8: memref<1x5x32xbf16, #tpu.memory_space<vmem>>, %arg9: memref<5x96xbf16, #tpu.memory_space<vmem>>, %arg10: memref<5x32xbf16, #tpu.memory_space<vmem>>) attributes {dimension_semantics = [#tpu.dimension_semantics<parallel>], iteration_bounds = array<i64: 2>, scalar_prefetch = 0 : i64, scratch_operands = 2 : i64, tpu.core_type = #tpu.core_type<tc>, window_params = [{transform_indices = @transform_0, window_bounds = array<i64: 1, 5, 32>}, {pipeline_mode = #tpu.pipeline_mode<synchronous>, transform_indices = @transform_1, window_bounds = array<i64: 1, 32>}, {pipeline_mode = #tpu.pipeline_mode<synchronous>, transform_indices = @transform_2, window_bounds = array<i64: 1, 32>}, {pipeline_mode = #tpu.pipeline_mode<synchronous>, transform_indices = @transform_3, window_bounds = array<i64: 32, 96>}, {pipeline_mode = #tpu.pipeline_mode<synchronous>, transform_indices = @transform_4, window_bounds = array<i64: 1, 96>}, {pipeline_mode = #tpu.pipeline_mode<synchronous>, transform_indices = @transform_5, window_bounds = array<i64: 32, 32>}, {pipeline_mode = #tpu.pipeline_mode<synchronous>, transform_indices = @transform_6, window_bounds = array<i64: 1, 32>}, {transform_indices = @transform_7, window_bounds = array<i64: 1, 5, 32>}]} {
    %c0 = arith.constant 0 : index
    %c0_0 = arith.constant 0 : index
    %c0_1 = arith.constant 0 : index
    %0 = vector.load %arg1[%c0, %c0_0, %c0_1] : memref<1x5x32xbf16, #tpu.memory_space<vmem>>, vector<1x5x32xbf16>
    %1 = vector.shape_cast %0 : vector<1x5x32xbf16> to vector<5x32xbf16>
    %2 = arith.extf %1 : vector<5x32xbf16> to vector<5x32xf32>
    %c0_2 = arith.constant 0 : index
    %c0_3 = arith.constant 0 : index
    %3 = vector.load %arg2[%c0_2, %c0_3] : memref<1x32xf32, #tpu.memory_space<vmem>>, vector<1x32xf32>
    %c0_4 = arith.constant 0 : index
    %c0_5 = arith.constant 0 : index
    %4 = vector.load %arg3[%c0_4, %c0_5] : memref<1x32xf32, #tpu.memory_space<vmem>>, vector<1x32xf32>
    %cst = arith.constant dense<0.000000e+00> : vector<5xf32>
    %5 = vector.multi_reduction <add>, %2, %cst [1] : vector<5x32xf32> to vector<5xf32>
    %6 = vector.shape_cast %5 : vector<5xf32> to vector<5x1xf32>
    %cst_6 = arith.constant 3.200000e+01 : f32
    %7 = vector.broadcast %cst_6 : f32 to vector<5x1xf32>
    %8 = arith.divf %6, %7 : vector<5x1xf32>
    %9 = vector.broadcast %8 : vector<5x1xf32> to vector<5x32xf32>
    %10 = arith.subf %2, %9 : vector<5x32xf32>
    %11 = arith.mulf %10, %10 : vector<5x32xf32>
    %cst_7 = arith.constant dense<0.000000e+00> : vector<5xf32>
    %12 = vector.multi_reduction <add>, %11, %cst_7 [1] : vector<5x32xf32> to vector<5xf32>
    %13 = vector.shape_cast %12 : vector<5xf32> to vector<5x1xf32>
    %cst_8 = arith.constant 3.200000e+01 : f32
    %14 = vector.broadcast %cst_8 : f32 to vector<5x1xf32>
    %15 = arith.divf %13, %14 : vector<5x1xf32>
    %cst_9 = arith.constant 9.99999996E-13 : f32
    %16 = vector.broadcast %cst_9 : f32 to vector<5x1xf32>
    %17 = arith.addf %15, %16 : vector<5x1xf32>
    %18 = math.rsqrt %17 : vector<5x1xf32>
    %19 = vector.broadcast %18 : vector<5x1xf32> to vector<5x32xf32>
    %20 = arith.mulf %10, %19 : vector<5x32xf32>
    %21 = vector.broadcast %3 : vector<1x32xf32> to vector<5x32xf32>
    %22 = arith.mulf %20, %21 : vector<5x32xf32>
    %23 = vector.broadcast %4 : vector<1x32xf32> to vector<5x32xf32>
    %24 = arith.addf %22, %23 : vector<5x32xf32>
    %25 = arith.truncf %24 : vector<5x32xf32> to vector<5x32xbf16>
    %c0_10 = arith.constant 0 : index
    %c0_11 = arith.constant 0 : index
    %26 = vector.load %arg4[%c0_10, %c0_11] : memref<32x96xbf16, #tpu.memory_space<vmem>>, vector<32x96xbf16>
    %cst_12 = arith.constant dense<0.000000e+00> : vector<5x96xf32>
    %27 = tpu.matmul %25, %26, %cst_12 {dimension_numbers = #tpu.dot_dimension_numbers<[1], [0], [0], [1], [0, 0, 1, 1], [], []>} : vector<5x32xbf16>, vector<32x96xbf16>, vector<5x96xf32> -> vector<5x96xf32>
    %c0_13 = arith.constant 0 : index
    %c0_14 = arith.constant 0 : index
    %28 = vector.load %arg5[%c0_13, %c0_14] : memref<1x96xf32, #tpu.memory_space<vmem>>, vector<1x96xf32>
    %29 = vector.broadcast %28 : vector<1x96xf32> to vector<5x96xf32>
    %30 = arith.addf %27, %29 : vector<5x96xf32>
    %31 = arith.truncf %30 : vector<5x96xf32> to vector<5x96xbf16>
    %c0_15 = arith.constant 0 : index
    %c0_16 = arith.constant 0 : index
    %32 = vector.load %arg9[%c0_15, %c0_16] : memref<5x96xbf16, #tpu.memory_space<vmem>>, vector<5x96xbf16>
    tpu.vector_store %arg9[%c0_15, %c0_16], %31 {strides = array<i32>} : memref<5x96xbf16, #tpu.memory_space<vmem>>, vector<5x96xbf16>,
    %c0_17 = arith.constant 0 : index
    %c0_18 = arith.constant 0 : index
    %33 = vector.load %arg9[%c0_17, %c0_18] : memref<5x96xbf16, #tpu.memory_space<vmem>>, vector<5x8xbf16>
    %c0_19 = arith.constant 0 : index
    %c32 = arith.constant 32 : index
    %34 = vector.load %arg9[%c0_19, %c32] : memref<5x96xbf16, #tpu.memory_space<vmem>>, vector<5x8xbf16>
    %c0_20 = arith.constant 0 : index
    %c64 = arith.constant 64 : index
    %35 = vector.load %arg9[%c0_20, %c64] : memref<5x96xbf16, #tpu.memory_space<vmem>>, vector<5x8xbf16>
    %cst_21 = arith.constant dense<0.000000e+00> : vector<5x5xf32>
    %36 = tpu.matmul %33, %34, %cst_21 {dimension_numbers = #tpu.dot_dimension_numbers<[1], [1], [0], [0], [0, 0, 1, 0], [], []>} : vector<5x8xbf16>, vector<5x8xbf16>, vector<5x5xf32> -> vector<5x5xf32>
    %cst_22 = arith.constant 0.353553385 : f32
    %37 = vector.broadcast %cst_22 : f32 to vector<5x5xf32>
    %38 = arith.mulf %36, %37 : vector<5x5xf32>
    %cst_23 = arith.constant dense<0xFF800000> : vector<5xf32>
    %39 = vector.multi_reduction <maximumf>, %38, %cst_23 [1] : vector<5x5xf32> to vector<5xf32>
    %40 = vector.shape_cast %39 : vector<5xf32> to vector<5x1xf32>
    %41 = vector.broadcast %40 : vector<5x1xf32> to vector<5x5xf32>
    %42 = arith.subf %38, %41 : vector<5x5xf32>
    %43 = math.exp %42 : vector<5x5xf32>
    %cst_24 = arith.constant dense<0.000000e+00> : vector<5xf32>
    %44 = vector.multi_reduction <add>, %43, %cst_24 [1] : vector<5x5xf32> to vector<5xf32>
    %45 = vector.shape_cast %44 : vector<5xf32> to vector<5x1xf32>
    %46 = tpu.reciprocal %45 {approx = true} : vector<5x1xf32> -> vector<5x1xf32>
    %47 = vector.broadcast %46 : vector<5x1xf32> to vector<5x5xf32>
    %48 = arith.mulf %43, %47 : vector<5x5xf32>
    %49 = arith.truncf %48 : vector<5x5xf32> to vector<5x5xbf16>
    %cst_25 = arith.constant dense<0.000000e+00> : vector<5x8xf32>
    %50 = tpu.matmul %49, %35, %cst_25 {dimension_numbers = #tpu.dot_dimension_numbers<[1], [0], [0], [1], [0, 0, 1, 1], [], []>} : vector<5x5xbf16>, vector<5x8xbf16>, vector<5x8xf32> -> vector<5x8xf32>
    %51 = arith.truncf %50 : vector<5x8xf32> to vector<5x8xbf16>
    %c0_26 = arith.constant 0 : index
    %c0_27 = arith.constant 0 : index
    %52 = vector.load %arg10[%c0_26, %c0_27] : memref<5x32xbf16, #tpu.memory_space<vmem>>, vector<5x8xbf16>
    tpu.vector_store %arg10[%c0_26, %c0_27], %51 {strides = array<i32>} : memref<5x32xbf16, #tpu.memory_space<vmem>>, vector<5x8xbf16>,
    %c0_28 = arith.constant 0 : index
    %c8 = arith.constant 8 : index
    %53 = vector.load %arg9[%c0_28, %c8] : memref<5x96xbf16, #tpu.memory_space<vmem>>, vector<5x8xbf16>
    %c0_29 = arith.constant 0 : index
    %c40 = arith.constant 40 : index
    %54 = vector.load %arg9[%c0_29, %c40] : memref<5x96xbf16, #tpu.memory_space<vmem>>, vector<5x8xbf16>
    %c0_30 = arith.constant 0 : index
    %c72 = arith.constant 72 : index
    %55 = vector.load %arg9[%c0_30, %c72] : memref<5x96xbf16, #tpu.memory_space<vmem>>, vector<5x8xbf16>
    %cst_31 = arith.constant dense<0.000000e+00> : vector<5x5xf32>
    %56 = tpu.matmul %53, %54, %cst_31 {dimension_numbers = #tpu.dot_dimension_numbers<[1], [1], [0], [0], [0, 0, 1, 0], [], []>} : vector<5x8xbf16>, vector<5x8xbf16>, vector<5x5xf32> -> vector<5x5xf32>
    %cst_32 = arith.constant 0.353553385 : f32
    %57 = vector.broadcast %cst_32 : f32 to vector<5x5xf32>
    %58 = arith.mulf %56, %57 : vector<5x5xf32>
    %cst_33 = arith.constant dense<0xFF800000> : vector<5xf32>
    %59 = vector.multi_reduction <maximumf>, %58, %cst_33 [1] : vector<5x5xf32> to vector<5xf32>
    %60 = vector.shape_cast %59 : vector<5xf32> to vector<5x1xf32>
    %61 = vector.broadcast %60 : vector<5x1xf32> to vector<5x5xf32>
    %62 = arith.subf %58, %61 : vector<5x5xf32>
    %63 = math.exp %62 : vector<5x5xf32>
    %cst_34 = arith.constant dense<0.000000e+00> : vector<5xf32>
    %64 = vector.multi_reduction <add>, %63, %cst_34 [1] : vector<5x5xf32> to vector<5xf32>
    %65 = vector.shape_cast %64 : vector<5xf32> to vector<5x1xf32>
    %66 = tpu.reciprocal %65 {approx = true} : vector<5x1xf32> -> vector<5x1xf32>
    %67 = vector.broadcast %66 : vector<5x1xf32> to vector<5x5xf32>
    %68 = arith.mulf %63, %67 : vector<5x5xf32>
    %69 = arith.truncf %68 : vector<5x5xf32> to vector<5x5xbf16>
    %cst_35 = arith.constant dense<0.000000e+00> : vector<5x8xf32>
    %70 = tpu.matmul %69, %55, %cst_35 {dimension_numbers = #tpu.dot_dimension_numbers<[1], [0], [0], [1], [0, 0, 1, 1], [], []>} : vector<5x5xbf16>, vector<5x8xbf16>, vector<5x8xf32> -> vector<5x8xf32>
    %71 = arith.truncf %70 : vector<5x8xf32> to vector<5x8xbf16>
    %c0_36 = arith.constant 0 : index
    %c8_37 = arith.constant 8 : index
    %72 = vector.load %arg10[%c0_36, %c8_37] : memref<5x32xbf16, #tpu.memory_space<vmem>>, vector<5x8xbf16>
    tpu.vector_store %arg10[%c0_36, %c8_37], %71 {strides = array<i32>} : memref<5x32xbf16, #tpu.memory_space<vmem>>, vector<5x8xbf16>,
    %c0_38 = arith.constant 0 : index
    %c16 = arith.constant 16 : index
    %73 = vector.load %arg9[%c0_38, %c16] : memref<5x96xbf16, #tpu.memory_space<vmem>>, vector<5x8xbf16>
    %c0_39 = arith.constant 0 : index
    %c48 = arith.constant 48 : index
    %74 = vector.load %arg9[%c0_39, %c48] : memref<5x96xbf16, #tpu.memory_space<vmem>>, vector<5x8xbf16>
    %c0_40 = arith.constant 0 : index
    %c80 = arith.constant 80 : index
    %75 = vector.load %arg9[%c0_40, %c80] : memref<5x96xbf16, #tpu.memory_space<vmem>>, vector<5x8xbf16>
    %cst_41 = arith.constant dense<0.000000e+00> : vector<5x5xf32>
    %76 = tpu.matmul %73, %74, %cst_41 {dimension_numbers = #tpu.dot_dimension_numbers<[1], [1], [0], [0], [0, 0, 1, 0], [], []>} : vector<5x8xbf16>, vector<5x8xbf16>, vector<5x5xf32> -> vector<5x5xf32>
    %cst_42 = arith.constant 0.353553385 : f32
    %77 = vector.broadcast %cst_42 : f32 to vector<5x5xf32>
    %78 = arith.mulf %76, %77 : vector<5x5xf32>
    %cst_43 = arith.constant dense<0xFF800000> : vector<5xf32>
    %79 = vector.multi_reduction <maximumf>, %78, %cst_43 [1] : vector<5x5xf32> to vector<5xf32>
    %80 = vector.shape_cast %79 : vector<5xf32> to vector<5x1xf32>
    %81 = vector.broadcast %80 : vector<5x1xf32> to vector<5x5xf32>
    %82 = arith.subf %78, %81 : vector<5x5xf32>
    %83 = math.exp %82 : vector<5x5xf32>
    %cst_44 = arith.constant dense<0.000000e+00> : vector<5xf32>
    %84 = vector.multi_reduction <add>, %83, %cst_44 [1] : vector<5x5xf32> to vector<5xf32>
    %85 = vector.shape_cast %84 : vector<5xf32> to vector<5x1xf32>
    %86 = tpu.reciprocal %85 {approx = true} : vector<5x1xf32> -> vector<5x1xf32>
    %87 = vector.broadcast %86 : vector<5x1xf32> to vector<5x5xf32>
    %88 = arith.mulf %83, %87 : vector<5x5xf32>
    %89 = arith.truncf %88 : vector<5x5xf32> to vector<5x5xbf16>
    %cst_45 = arith.constant dense<0.000000e+00> : vector<5x8xf32>
    %90 = tpu.matmul %89, %75, %cst_45 {dimension_numbers = #tpu.dot_dimension_numbers<[1], [0], [0], [1], [0, 0, 1, 1], [], []>} : vector<5x5xbf16>, vector<5x8xbf16>, vector<5x8xf32> -> vector<5x8xf32>
    %91 = arith.truncf %90 : vector<5x8xf32> to vector<5x8xbf16>
    %c0_46 = arith.constant 0 : index
    %c16_47 = arith.constant 16 : index
    %92 = vector.load %arg10[%c0_46, %c16_47] : memref<5x32xbf16, #tpu.memory_space<vmem>>, vector<5x8xbf16>
    tpu.vector_store %arg10[%c0_46, %c16_47], %91 {strides = array<i32>} : memref<5x32xbf16, #tpu.memory_space<vmem>>, vector<5x8xbf16>,
    %c0_48 = arith.constant 0 : index
    %c24 = arith.constant 24 : index
    %93 = vector.load %arg9[%c0_48, %c24] : memref<5x96xbf16, #tpu.memory_space<vmem>>, vector<5x8xbf16>
    %c0_49 = arith.constant 0 : index
    %c56 = arith.constant 56 : index
    %94 = vector.load %arg9[%c0_49, %c56] : memref<5x96xbf16, #tpu.memory_space<vmem>>, vector<5x8xbf16>
    %c0_50 = arith.constant 0 : index
    %c88 = arith.constant 88 : index
    %95 = vector.load %arg9[%c0_50, %c88] : memref<5x96xbf16, #tpu.memory_space<vmem>>, vector<5x8xbf16>
    %cst_51 = arith.constant dense<0.000000e+00> : vector<5x5xf32>
    %96 = tpu.matmul %93, %94, %cst_51 {dimension_numbers = #tpu.dot_dimension_numbers<[1], [1], [0], [0], [0, 0, 1, 0], [], []>} : vector<5x8xbf16>, vector<5x8xbf16>, vector<5x5xf32> -> vector<5x5xf32>
    %cst_52 = arith.constant 0.353553385 : f32
    %97 = vector.broadcast %cst_52 : f32 to vector<5x5xf32>
    %98 = arith.mulf %96, %97 : vector<5x5xf32>
    %cst_53 = arith.constant dense<0xFF800000> : vector<5xf32>
    %99 = vector.multi_reduction <maximumf>, %98, %cst_53 [1] : vector<5x5xf32> to vector<5xf32>
    %100 = vector.shape_cast %99 : vector<5xf32> to vector<5x1xf32>
    %101 = vector.broadcast %100 : vector<5x1xf32> to vector<5x5xf32>
    %102 = arith.subf %98, %101 : vector<5x5xf32>
    %103 = math.exp %102 : vector<5x5xf32>
    %cst_54 = arith.constant dense<0.000000e+00> : vector<5xf32>
    %104 = vector.multi_reduction <add>, %103, %cst_54 [1] : vector<5x5xf32> to vector<5xf32>
    %105 = vector.shape_cast %104 : vector<5xf32> to vector<5x1xf32>
    %106 = tpu.reciprocal %105 {approx = true} : vector<5x1xf32> -> vector<5x1xf32>
    %107 = vector.broadcast %106 : vector<5x1xf32> to vector<5x5xf32>
    %108 = arith.mulf %103, %107 : vector<5x5xf32>
    %109 = arith.truncf %108 : vector<5x5xf32> to vector<5x5xbf16>
    %cst_55 = arith.constant dense<0.000000e+00> : vector<5x8xf32>
    %110 = tpu.matmul %109, %95, %cst_55 {dimension_numbers = #tpu.dot_dimension_numbers<[1], [0], [0], [1], [0, 0, 1, 1], [], []>} : vector<5x5xbf16>, vector<5x8xbf16>, vector<5x8xf32> -> vector<5x8xf32>
    %111 = arith.truncf %110 : vector<5x8xf32> to vector<5x8xbf16>
    %c0_56 = arith.constant 0 : index
    %c24_57 = arith.constant 24 : index
    %112 = vector.load %arg10[%c0_56, %c24_57] : memref<5x32xbf16, #tpu.memory_space<vmem>>, vector<5x8xbf16>
    tpu.vector_store %arg10[%c0_56, %c24_57], %111 {strides = array<i32>} : memref<5x32xbf16, #tpu.memory_space<vmem>>, vector<5x8xbf16>,
    %c0_58 = arith.constant 0 : index
    %c0_59 = arith.constant 0 : index
    %113 = vector.load %arg10[%c0_58, %c0_59] : memref<5x32xbf16, #tpu.memory_space<vmem>>, vector<5x32xbf16>
    %c0_60 = arith.constant 0 : index
    %c0_61 = arith.constant 0 : index
    %114 = vector.load %arg6[%c0_60, %c0_61] : memref<32x32xbf16, #tpu.memory_space<vmem>>, vector<32x32xbf16>
    %cst_62 = arith.constant dense<0.000000e+00> : vector<5x32xf32>
    %115 = tpu.matmul %113, %114, %cst_62 {dimension_numbers = #tpu.dot_dimension_numbers<[1], [0], [0], [1], [0, 0, 1, 1], [], []>} : vector<5x32xbf16>, vector<32x32xbf16>, vector<5x32xf32> -> vector<5x32xf32>
    %c0_63 = arith.constant 0 : index
    %c0_64 = arith.constant 0 : index
    %116 = vector.load %arg7[%c0_63, %c0_64] : memref<1x32xf32, #tpu.memory_space<vmem>>, vector<1x32xf32>
    %117 = vector.broadcast %116 : vector<1x32xf32> to vector<5x32xf32>
    %118 = arith.addf %115, %117 : vector<5x32xf32>
    %119 = arith.addf %118, %2 : vector<5x32xf32>
    %120 = arith.truncf %119 : vector<5x32xf32> to vector<5x32xbf16>
    %c0_65 = arith.constant 0 : index
    %c0_66 = arith.constant 0 : index
    %c0_67 = arith.constant 0 : index
    %121 = vector.load %arg8[%c0_65, %c0_66, %c0_67] : memref<1x5x32xbf16, #tpu.memory_space<vmem>>, vector<1x5x32xbf16>
    %122 = vector.shape_cast %121 : vector<1x5x32xbf16> to vector<5x32xbf16>
    %123 = vector.shape_cast %120 : vector<5x32xbf16> to vector<1x5x32xbf16>
    tpu.vector_store %arg8[%c0_65, %c0_66, %c0_67], %123 {strides = array<i32>} : memref<1x5x32xbf16, #tpu.memory_space<vmem>>, vector<1x5x32xbf16>,
    return
  }
  func.func @transform_0(%arg0: i32) -> (i32, i32, i32) {
    %c0_i32 = arith.constant 0 : i32
    %c0_i32_0 = arith.constant 0 : i32
    %c0_i32_1 = arith.constant 0 : i32
    return %arg0, %c0_i32, %c0_i32_0 : i32, i32, i32
  }
  func.func @transform_1(%arg0: i32) -> (i32, i32) {
    %c0_i32 = arith.constant 0 : i32
    %c0_i32_0 = arith.constant 0 : i32
    %c0_i32_1 = arith.constant 0 : i32
    return %c0_i32, %c0_i32_0 : i32, i32
  }
  func.func @transform_2(%arg0: i32) -> (i32, i32) {
    %c0_i32 = arith.constant 0 : i32
    %c0_i32_0 = arith.constant 0 : i32
    %c0_i32_1 = arith.constant 0 : i32
    return %c0_i32, %c0_i32_0 : i32, i32
  }
  func.func @transform_3(%arg0: i32) -> (i32, i32) {
    %c0_i32 = arith.constant 0 : i32
    %c0_i32_0 = arith.constant 0 : i32
    %c0_i32_1 = arith.constant 0 : i32
    return %c0_i32, %c0_i32_0 : i32, i32
  }
  func.func @transform_4(%arg0: i32) -> (i32, i32) {
    %c0_i32 = arith.constant 0 : i32
    %c0_i32_0 = arith.constant 0 : i32
    %c0_i32_1 = arith.constant 0 : i32
    return %c0_i32, %c0_i32_0 : i32, i32
  }
  func.func @transform_5(%arg0: i32) -> (i32, i32) {
    %c0_i32 = arith.constant 0 : i32
    %c0_i32_0 = arith.constant 0 : i32
    %c0_i32_1 = arith.constant 0 : i32
    return %c0_i32, %c0_i32_0 : i32, i32
  }
  func.func @transform_6(%arg0: i32) -> (i32, i32) {
    %c0_i32 = arith.constant 0 : i32
    %c0_i32_0 = arith.constant 0 : i32
    %c0_i32_1 = arith.constant 0 : i32
    return %c0_i32, %c0_i32_0 : i32, i32
  }
  func.func @transform_7(%arg0: i32) -> (i32, i32, i32) {
    %c0_i32 = arith.constant 0 : i32
    %c0_i32_0 = arith.constant 0 : i32
    %c0_i32_1 = arith.constant 0 : i32
    return %arg0, %c0_i32, %c0_i32_0 : i32, i32, i32
  }
}

module attributes {stable_mosaic.version = 11 : i64} {
  func.func @_matmul_bias_kernel(%arg0: i32, %arg1: memref<8x192xf32, #tpu.memory_space<vmem>>, %arg2: memref<192x32xbf16, #tpu.memory_space<vmem>>, %arg3: memref<1x32xf32, #tpu.memory_space<vmem>>, %arg4: memref<8x32xf32, #tpu.memory_space<vmem>>) attributes {dimension_semantics = [#tpu.dimension_semantics<parallel>], iteration_bounds = array<i64: 1>, scalar_prefetch = 0 : i64, scratch_operands = 0 : i64, tpu.core_type = #tpu.core_type<tc>, window_params = [{transform_indices = @transform_0, window_bounds = array<i64: 8, 192>}, {pipeline_mode = #tpu.pipeline_mode<synchronous>, transform_indices = @transform_1, window_bounds = array<i64: 192, 32>}, {pipeline_mode = #tpu.pipeline_mode<synchronous>, transform_indices = @transform_2, window_bounds = array<i64: 1, 32>}, {transform_indices = @transform_3, window_bounds = array<i64: 8, 32>}]} {
    %c0 = arith.constant 0 : index
    %c0_0 = arith.constant 0 : index
    %0 = vector.load %arg1[%c0, %c0_0] : memref<8x192xf32, #tpu.memory_space<vmem>>, vector<8x192xf32>
    %1 = arith.truncf %0 : vector<8x192xf32> to vector<8x192xbf16>
    %c0_1 = arith.constant 0 : index
    %c0_2 = arith.constant 0 : index
    %2 = vector.load %arg2[%c0_1, %c0_2] : memref<192x32xbf16, #tpu.memory_space<vmem>>, vector<192x32xbf16>
    %cst = arith.constant dense<0.000000e+00> : vector<8x32xf32>
    %3 = tpu.matmul %1, %2, %cst {dimension_numbers = #tpu.dot_dimension_numbers<[1], [0], [0], [1], [0, 0, 1, 1], [], []>} : vector<8x192xbf16>, vector<192x32xbf16>, vector<8x32xf32> -> vector<8x32xf32>
    %c0_3 = arith.constant 0 : index
    %c0_4 = arith.constant 0 : index
    %4 = vector.load %arg3[%c0_3, %c0_4] : memref<1x32xf32, #tpu.memory_space<vmem>>, vector<1x32xf32>
    %5 = vector.broadcast %4 : vector<1x32xf32> to vector<8x32xf32>
    %6 = arith.addf %3, %5 : vector<8x32xf32>
    %c0_5 = arith.constant 0 : index
    %c0_6 = arith.constant 0 : index
    %7 = vector.load %arg4[%c0_5, %c0_6] : memref<8x32xf32, #tpu.memory_space<vmem>>, vector<8x32xf32>
    tpu.vector_store %arg4[%c0_5, %c0_6], %6 {strides = array<i32>} : memref<8x32xf32, #tpu.memory_space<vmem>>, vector<8x32xf32>,
    return
  }
  func.func @transform_0(%arg0: i32) -> (i32, i32) {
    %c0_i32 = arith.constant 0 : i32
    %c0_i32_0 = arith.constant 0 : i32
    return %arg0, %c0_i32 : i32, i32
  }
  func.func @transform_1(%arg0: i32) -> (i32, i32) {
    %c0_i32 = arith.constant 0 : i32
    %c0_i32_0 = arith.constant 0 : i32
    %c0_i32_1 = arith.constant 0 : i32
    return %c0_i32, %c0_i32_0 : i32, i32
  }
  func.func @transform_2(%arg0: i32) -> (i32, i32) {
    %c0_i32 = arith.constant 0 : i32
    %c0_i32_0 = arith.constant 0 : i32
    %c0_i32_1 = arith.constant 0 : i32
    return %c0_i32, %c0_i32_0 : i32, i32
  }
  func.func @transform_3(%arg0: i32) -> (i32, i32) {
    %c0_i32 = arith.constant 0 : i32
    %c0_i32_0 = arith.constant 0 : i32
    return %arg0, %c0_i32 : i32, i32
  }
}

module attributes {stable_mosaic.version = 11 : i64} {
  func.func @_ln_mlp_res_kernel(%arg0: i32, %arg1: memref<10x32xbf16, #tpu.memory_space<vmem>>, %arg2: memref<1x32xf32, #tpu.memory_space<vmem>>, %arg3: memref<1x32xf32, #tpu.memory_space<vmem>>, %arg4: memref<32x64xbf16, #tpu.memory_space<vmem>>, %arg5: memref<1x64xf32, #tpu.memory_space<vmem>>, %arg6: memref<64x32xbf16, #tpu.memory_space<vmem>>, %arg7: memref<1x32xf32, #tpu.memory_space<vmem>>, %arg8: memref<10x32xbf16, #tpu.memory_space<vmem>>) attributes {dimension_semantics = [#tpu.dimension_semantics<parallel>], iteration_bounds = array<i64: 1>, scalar_prefetch = 0 : i64, scratch_operands = 0 : i64, tpu.core_type = #tpu.core_type<tc>, window_params = [{transform_indices = @transform_0, window_bounds = array<i64: 10, 32>}, {pipeline_mode = #tpu.pipeline_mode<synchronous>, transform_indices = @transform_1, window_bounds = array<i64: 1, 32>}, {pipeline_mode = #tpu.pipeline_mode<synchronous>, transform_indices = @transform_2, window_bounds = array<i64: 1, 32>}, {pipeline_mode = #tpu.pipeline_mode<synchronous>, transform_indices = @transform_3, window_bounds = array<i64: 32, 64>}, {pipeline_mode = #tpu.pipeline_mode<synchronous>, transform_indices = @transform_4, window_bounds = array<i64: 1, 64>}, {pipeline_mode = #tpu.pipeline_mode<synchronous>, transform_indices = @transform_5, window_bounds = array<i64: 64, 32>}, {pipeline_mode = #tpu.pipeline_mode<synchronous>, transform_indices = @transform_6, window_bounds = array<i64: 1, 32>}, {transform_indices = @transform_7, window_bounds = array<i64: 10, 32>}]} {
    %c0 = arith.constant 0 : index
    %c0_0 = arith.constant 0 : index
    %0 = vector.load %arg1[%c0, %c0_0] : memref<10x32xbf16, #tpu.memory_space<vmem>>, vector<10x32xbf16>
    %1 = arith.extf %0 : vector<10x32xbf16> to vector<10x32xf32>
    %c0_1 = arith.constant 0 : index
    %c0_2 = arith.constant 0 : index
    %2 = vector.load %arg2[%c0_1, %c0_2] : memref<1x32xf32, #tpu.memory_space<vmem>>, vector<1x32xf32>
    %c0_3 = arith.constant 0 : index
    %c0_4 = arith.constant 0 : index
    %3 = vector.load %arg3[%c0_3, %c0_4] : memref<1x32xf32, #tpu.memory_space<vmem>>, vector<1x32xf32>
    %cst = arith.constant dense<0.000000e+00> : vector<10xf32>
    %4 = vector.multi_reduction <add>, %1, %cst [1] : vector<10x32xf32> to vector<10xf32>
    %5 = vector.shape_cast %4 : vector<10xf32> to vector<10x1xf32>
    %cst_5 = arith.constant 3.200000e+01 : f32
    %6 = vector.broadcast %cst_5 : f32 to vector<10x1xf32>
    %7 = arith.divf %5, %6 : vector<10x1xf32>
    %8 = vector.broadcast %7 : vector<10x1xf32> to vector<10x32xf32>
    %9 = arith.subf %1, %8 : vector<10x32xf32>
    %10 = arith.mulf %9, %9 : vector<10x32xf32>
    %cst_6 = arith.constant dense<0.000000e+00> : vector<10xf32>
    %11 = vector.multi_reduction <add>, %10, %cst_6 [1] : vector<10x32xf32> to vector<10xf32>
    %12 = vector.shape_cast %11 : vector<10xf32> to vector<10x1xf32>
    %cst_7 = arith.constant 3.200000e+01 : f32
    %13 = vector.broadcast %cst_7 : f32 to vector<10x1xf32>
    %14 = arith.divf %12, %13 : vector<10x1xf32>
    %cst_8 = arith.constant 9.99999996E-13 : f32
    %15 = vector.broadcast %cst_8 : f32 to vector<10x1xf32>
    %16 = arith.addf %14, %15 : vector<10x1xf32>
    %17 = math.rsqrt %16 : vector<10x1xf32>
    %18 = vector.broadcast %17 : vector<10x1xf32> to vector<10x32xf32>
    %19 = arith.mulf %9, %18 : vector<10x32xf32>
    %20 = vector.broadcast %2 : vector<1x32xf32> to vector<10x32xf32>
    %21 = arith.mulf %19, %20 : vector<10x32xf32>
    %22 = vector.broadcast %3 : vector<1x32xf32> to vector<10x32xf32>
    %23 = arith.addf %21, %22 : vector<10x32xf32>
    %24 = arith.truncf %23 : vector<10x32xf32> to vector<10x32xbf16>
    %c0_9 = arith.constant 0 : index
    %c0_10 = arith.constant 0 : index
    %25 = vector.load %arg4[%c0_9, %c0_10] : memref<32x64xbf16, #tpu.memory_space<vmem>>, vector<32x64xbf16>
    %cst_11 = arith.constant dense<0.000000e+00> : vector<10x64xf32>
    %26 = tpu.matmul %24, %25, %cst_11 {dimension_numbers = #tpu.dot_dimension_numbers<[1], [0], [0], [1], [0, 0, 1, 1], [], []>} : vector<10x32xbf16>, vector<32x64xbf16>, vector<10x64xf32> -> vector<10x64xf32>
    %c0_12 = arith.constant 0 : index
    %c0_13 = arith.constant 0 : index
    %27 = vector.load %arg5[%c0_12, %c0_13] : memref<1x64xf32, #tpu.memory_space<vmem>>, vector<1x64xf32>
    %28 = vector.broadcast %27 : vector<1x64xf32> to vector<10x64xf32>
    %29 = arith.addf %26, %28 : vector<10x64xf32>
    %cst_14 = arith.constant 5.000000e-01 : f32
    %30 = vector.broadcast %cst_14 : f32 to vector<10x64xf32>
    %31 = arith.mulf %30, %29 : vector<10x64xf32>
    %cst_15 = arith.constant 4.471500e-02 : f32
    %32 = vector.broadcast %cst_15 : f32 to vector<10x64xf32>
    %33 = arith.mulf %32, %29 : vector<10x64xf32>
    %34 = arith.mulf %33, %29 : vector<10x64xf32>
    %35 = arith.mulf %34, %29 : vector<10x64xf32>
    %36 = arith.addf %29, %35 : vector<10x64xf32>
    %cst_16 = arith.constant 0.797884583 : f32
    %37 = vector.broadcast %cst_16 : f32 to vector<10x64xf32>
    %38 = arith.mulf %37, %36 : vector<10x64xf32>
    %39 = math.tanh %38 : vector<10x64xf32>
    %cst_17 = arith.constant 1.000000e+00 : f32
    %40 = vector.broadcast %cst_17 : f32 to vector<10x64xf32>
    %41 = arith.addf %40, %39 : vector<10x64xf32>
    %42 = arith.mulf %31, %41 : vector<10x64xf32>
    %43 = arith.truncf %42 : vector<10x64xf32> to vector<10x64xbf16>
    %c0_18 = arith.constant 0 : index
    %c0_19 = arith.constant 0 : index
    %44 = vector.load %arg6[%c0_18, %c0_19] : memref<64x32xbf16, #tpu.memory_space<vmem>>, vector<64x32xbf16>
    %cst_20 = arith.constant dense<0.000000e+00> : vector<10x32xf32>
    %45 = tpu.matmul %43, %44, %cst_20 {dimension_numbers = #tpu.dot_dimension_numbers<[1], [0], [0], [1], [0, 0, 1, 1], [], []>} : vector<10x64xbf16>, vector<64x32xbf16>, vector<10x32xf32> -> vector<10x32xf32>
    %c0_21 = arith.constant 0 : index
    %c0_22 = arith.constant 0 : index
    %46 = vector.load %arg7[%c0_21, %c0_22] : memref<1x32xf32, #tpu.memory_space<vmem>>, vector<1x32xf32>
    %47 = vector.broadcast %46 : vector<1x32xf32> to vector<10x32xf32>
    %48 = arith.addf %45, %47 : vector<10x32xf32>
    %49 = arith.addf %1, %48 : vector<10x32xf32>
    %50 = arith.truncf %49 : vector<10x32xf32> to vector<10x32xbf16>
    %c0_23 = arith.constant 0 : index
    %c0_24 = arith.constant 0 : index
    %51 = vector.load %arg8[%c0_23, %c0_24] : memref<10x32xbf16, #tpu.memory_space<vmem>>, vector<10x32xbf16>
    tpu.vector_store %arg8[%c0_23, %c0_24], %50 {strides = array<i32>} : memref<10x32xbf16, #tpu.memory_space<vmem>>, vector<10x32xbf16>,
    return
  }
  func.func @transform_0(%arg0: i32) -> (i32, i32) {
    %c0_i32 = arith.constant 0 : i32
    %c0_i32_0 = arith.constant 0 : i32
    return %arg0, %c0_i32 : i32, i32
  }
  func.func @transform_1(%arg0: i32) -> (i32, i32) {
    %c0_i32 = arith.constant 0 : i32
    %c0_i32_0 = arith.constant 0 : i32
    %c0_i32_1 = arith.constant 0 : i32
    return %c0_i32, %c0_i32_0 : i32, i32
  }
  func.func @transform_2(%arg0: i32) -> (i32, i32) {
    %c0_i32 = arith.constant 0 : i32
    %c0_i32_0 = arith.constant 0 : i32
    %c0_i32_1 = arith.constant 0 : i32
    return %c0_i32, %c0_i32_0 : i32, i32
  }
  func.func @transform_3(%arg0: i32) -> (i32, i32) {
    %c0_i32 = arith.constant 0 : i32
    %c0_i32_0 = arith.constant 0 : i32
    %c0_i32_1 = arith.constant 0 : i32
    return %c0_i32, %c0_i32_0 : i32, i32
  }
  func.func @transform_4(%arg0: i32) -> (i32, i32) {
    %c0_i32 = arith.constant 0 : i32
    %c0_i32_0 = arith.constant 0 : i32
    %c0_i32_1 = arith.constant 0 : i32
    return %c0_i32, %c0_i32_0 : i32, i32
  }
  func.func @transform_5(%arg0: i32) -> (i32, i32) {
    %c0_i32 = arith.constant 0 : i32
    %c0_i32_0 = arith.constant 0 : i32
    %c0_i32_1 = arith.constant 0 : i32
    return %c0_i32, %c0_i32_0 : i32, i32
  }
  func.func @transform_6(%arg0: i32) -> (i32, i32) {
    %c0_i32 = arith.constant 0 : i32
    %c0_i32_0 = arith.constant 0 : i32
    %c0_i32_1 = arith.constant 0 : i32
    return %c0_i32, %c0_i32_0 : i32, i32
  }
  func.func @transform_7(%arg0: i32) -> (i32, i32) {
    %c0_i32 = arith.constant 0 : i32
    %c0_i32_0 = arith.constant 0 : i32
    return %arg0, %c0_i32 : i32, i32
  }
}

module attributes {stable_mosaic.version = 11 : i64} {
  func.func @_classifier_kernel(%arg0: i32, %arg1: memref<2x32xbf16, #tpu.memory_space<vmem>>, %arg2: memref<2x16xf32, #tpu.memory_space<vmem>>, %arg3: memref<1x32xf32, #tpu.memory_space<vmem>>, %arg4: memref<1x32xf32, #tpu.memory_space<vmem>>, %arg5: memref<32x1024xbf16, #tpu.memory_space<vmem>>, %arg6: memref<16x1024xbf16, #tpu.memory_space<vmem>>, %arg7: memref<1x1024xf32, #tpu.memory_space<vmem>>, %arg8: memref<1x1024xf32, #tpu.memory_space<vmem>>, %arg9: memref<1x1024xf32, #tpu.memory_space<vmem>>, %arg10: memref<1024x512xbf16, #tpu.memory_space<vmem>>, %arg11: memref<1x512xf32, #tpu.memory_space<vmem>>, %arg12: memref<1x512xf32, #tpu.memory_space<vmem>>, %arg13: memref<1x512xf32, #tpu.memory_space<vmem>>, %arg14: memref<512x256xbf16, #tpu.memory_space<vmem>>, %arg15: memref<1x256xf32, #tpu.memory_space<vmem>>, %arg16: memref<1x256xf32, #tpu.memory_space<vmem>>, %arg17: memref<1x256xf32, #tpu.memory_space<vmem>>, %arg18: memref<256x128xbf16, #tpu.memory_space<vmem>>, %arg19: memref<1x128xf32, #tpu.memory_space<vmem>>, %arg20: memref<2x128xf32, #tpu.memory_space<vmem>>) attributes {dimension_semantics = [#tpu.dimension_semantics<parallel>], iteration_bounds = array<i64: 1>, scalar_prefetch = 0 : i64, scratch_operands = 0 : i64, tpu.core_type = #tpu.core_type<tc>, window_params = [{transform_indices = @transform_0, window_bounds = array<i64: 2, 32>}, {transform_indices = @transform_1, window_bounds = array<i64: 2, 16>}, {pipeline_mode = #tpu.pipeline_mode<synchronous>, transform_indices = @transform_2, window_bounds = array<i64: 1, 32>}, {pipeline_mode = #tpu.pipeline_mode<synchronous>, transform_indices = @transform_3, window_bounds = array<i64: 1, 32>}, {pipeline_mode = #tpu.pipeline_mode<synchronous>, transform_indices = @transform_4, window_bounds = array<i64: 32, 1024>}, {pipeline_mode = #tpu.pipeline_mode<synchronous>, transform_indices = @transform_5, window_bounds = array<i64: 16, 1024>}, {pipeline_mode = #tpu.pipeline_mode<synchronous>, transform_indices = @transform_6, window_bounds = array<i64: 1, 1024>}, {pipeline_mode = #tpu.pipeline_mode<synchronous>, transform_indices = @transform_7, window_bounds = array<i64: 1, 1024>}, {pipeline_mode = #tpu.pipeline_mode<synchronous>, transform_indices = @transform_8, window_bounds = array<i64: 1, 1024>}, {pipeline_mode = #tpu.pipeline_mode<synchronous>, transform_indices = @transform_9, window_bounds = array<i64: 1024, 512>}, {pipeline_mode = #tpu.pipeline_mode<synchronous>, transform_indices = @transform_10, window_bounds = array<i64: 1, 512>}, {pipeline_mode = #tpu.pipeline_mode<synchronous>, transform_indices = @transform_11, window_bounds = array<i64: 1, 512>}, {pipeline_mode = #tpu.pipeline_mode<synchronous>, transform_indices = @transform_12, window_bounds = array<i64: 1, 512>}, {pipeline_mode = #tpu.pipeline_mode<synchronous>, transform_indices = @transform_13, window_bounds = array<i64: 512, 256>}, {pipeline_mode = #tpu.pipeline_mode<synchronous>, transform_indices = @transform_14, window_bounds = array<i64: 1, 256>}, {pipeline_mode = #tpu.pipeline_mode<synchronous>, transform_indices = @transform_15, window_bounds = array<i64: 1, 256>}, {pipeline_mode = #tpu.pipeline_mode<synchronous>, transform_indices = @transform_16, window_bounds = array<i64: 1, 256>}, {pipeline_mode = #tpu.pipeline_mode<synchronous>, transform_indices = @transform_17, window_bounds = array<i64: 256, 128>}, {pipeline_mode = #tpu.pipeline_mode<synchronous>, transform_indices = @transform_18, window_bounds = array<i64: 1, 128>}, {transform_indices = @transform_19, window_bounds = array<i64: 2, 128>}]} {
    %c0 = arith.constant 0 : index
    %c0_0 = arith.constant 0 : index
    %0 = vector.load %arg1[%c0, %c0_0] : memref<2x32xbf16, #tpu.memory_space<vmem>>, vector<2x32xbf16>
    %1 = arith.extf %0 : vector<2x32xbf16> to vector<2x32xf32>
    %c0_1 = arith.constant 0 : index
    %c0_2 = arith.constant 0 : index
    %2 = vector.load %arg3[%c0_1, %c0_2] : memref<1x32xf32, #tpu.memory_space<vmem>>, vector<1x32xf32>
    %c0_3 = arith.constant 0 : index
    %c0_4 = arith.constant 0 : index
    %3 = vector.load %arg4[%c0_3, %c0_4] : memref<1x32xf32, #tpu.memory_space<vmem>>, vector<1x32xf32>
    %cst = arith.constant dense<0.000000e+00> : vector<2xf32>
    %4 = vector.multi_reduction <add>, %1, %cst [1] : vector<2x32xf32> to vector<2xf32>
    %5 = vector.shape_cast %4 : vector<2xf32> to vector<2x1xf32>
    %cst_5 = arith.constant 3.200000e+01 : f32
    %6 = vector.broadcast %cst_5 : f32 to vector<2x1xf32>
    %7 = arith.divf %5, %6 : vector<2x1xf32>
    %8 = vector.broadcast %7 : vector<2x1xf32> to vector<2x32xf32>
    %9 = arith.subf %1, %8 : vector<2x32xf32>
    %10 = arith.mulf %9, %9 : vector<2x32xf32>
    %cst_6 = arith.constant dense<0.000000e+00> : vector<2xf32>
    %11 = vector.multi_reduction <add>, %10, %cst_6 [1] : vector<2x32xf32> to vector<2xf32>
    %12 = vector.shape_cast %11 : vector<2xf32> to vector<2x1xf32>
    %cst_7 = arith.constant 3.200000e+01 : f32
    %13 = vector.broadcast %cst_7 : f32 to vector<2x1xf32>
    %14 = arith.divf %12, %13 : vector<2x1xf32>
    %cst_8 = arith.constant 9.99999996E-13 : f32
    %15 = vector.broadcast %cst_8 : f32 to vector<2x1xf32>
    %16 = arith.addf %14, %15 : vector<2x1xf32>
    %17 = math.rsqrt %16 : vector<2x1xf32>
    %18 = vector.broadcast %17 : vector<2x1xf32> to vector<2x32xf32>
    %19 = arith.mulf %9, %18 : vector<2x32xf32>
    %20 = vector.broadcast %2 : vector<1x32xf32> to vector<2x32xf32>
    %21 = arith.mulf %19, %20 : vector<2x32xf32>
    %22 = vector.broadcast %3 : vector<1x32xf32> to vector<2x32xf32>
    %23 = arith.addf %21, %22 : vector<2x32xf32>
    %c0_9 = arith.constant 0 : index
    %c0_10 = arith.constant 0 : index
    %24 = vector.load %arg2[%c0_9, %c0_10] : memref<2x16xf32, #tpu.memory_space<vmem>>, vector<2x16xf32>
    %25 = arith.truncf %23 : vector<2x32xf32> to vector<2x32xbf16>
    %c0_11 = arith.constant 0 : index
    %c0_12 = arith.constant 0 : index
    %26 = vector.load %arg5[%c0_11, %c0_12] : memref<32x1024xbf16, #tpu.memory_space<vmem>>, vector<32x1024xbf16>
    %cst_13 = arith.constant dense<0.000000e+00> : vector<2x1024xf32>
    %27 = tpu.matmul %25, %26, %cst_13 {dimension_numbers = #tpu.dot_dimension_numbers<[1], [0], [0], [1], [0, 0, 1, 1], [], []>} : vector<2x32xbf16>, vector<32x1024xbf16>, vector<2x1024xf32> -> vector<2x1024xf32>
    %28 = arith.truncf %24 : vector<2x16xf32> to vector<2x16xbf16>
    %c0_14 = arith.constant 0 : index
    %c0_15 = arith.constant 0 : index
    %29 = vector.load %arg6[%c0_14, %c0_15] : memref<16x1024xbf16, #tpu.memory_space<vmem>>, vector<16x1024xbf16>
    %cst_16 = arith.constant dense<0.000000e+00> : vector<2x1024xf32>
    %30 = tpu.matmul %28, %29, %cst_16 {dimension_numbers = #tpu.dot_dimension_numbers<[1], [0], [0], [1], [0, 0, 1, 1], [], []>} : vector<2x16xbf16>, vector<16x1024xbf16>, vector<2x1024xf32> -> vector<2x1024xf32>
    %31 = arith.addf %27, %30 : vector<2x1024xf32>
    %c0_17 = arith.constant 0 : index
    %c0_18 = arith.constant 0 : index
    %32 = vector.load %arg7[%c0_17, %c0_18] : memref<1x1024xf32, #tpu.memory_space<vmem>>, vector<1x1024xf32>
    %33 = vector.broadcast %32 : vector<1x1024xf32> to vector<2x1024xf32>
    %34 = arith.addf %31, %33 : vector<2x1024xf32>
    %c0_19 = arith.constant 0 : index
    %c0_20 = arith.constant 0 : index
    %35 = vector.load %arg8[%c0_19, %c0_20] : memref<1x1024xf32, #tpu.memory_space<vmem>>, vector<1x1024xf32>
    %36 = vector.broadcast %35 : vector<1x1024xf32> to vector<2x1024xf32>
    %37 = arith.mulf %34, %36 : vector<2x1024xf32>
    %c0_21 = arith.constant 0 : index
    %c0_22 = arith.constant 0 : index
    %38 = vector.load %arg9[%c0_21, %c0_22] : memref<1x1024xf32, #tpu.memory_space<vmem>>, vector<1x1024xf32>
    %39 = vector.broadcast %38 : vector<1x1024xf32> to vector<2x1024xf32>
    %40 = arith.addf %37, %39 : vector<2x1024xf32>
    %cst_23 = arith.constant 5.000000e-01 : f32
    %41 = vector.broadcast %cst_23 : f32 to vector<2x1024xf32>
    %42 = arith.mulf %41, %40 : vector<2x1024xf32>
    %cst_24 = arith.constant 4.471500e-02 : f32
    %43 = vector.broadcast %cst_24 : f32 to vector<2x1024xf32>
    %44 = arith.mulf %43, %40 : vector<2x1024xf32>
    %45 = arith.mulf %44, %40 : vector<2x1024xf32>
    %46 = arith.mulf %45, %40 : vector<2x1024xf32>
    %47 = arith.addf %40, %46 : vector<2x1024xf32>
    %cst_25 = arith.constant 0.797884583 : f32
    %48 = vector.broadcast %cst_25 : f32 to vector<2x1024xf32>
    %49 = arith.mulf %48, %47 : vector<2x1024xf32>
    %50 = math.tanh %49 : vector<2x1024xf32>
    %cst_26 = arith.constant 1.000000e+00 : f32
    %51 = vector.broadcast %cst_26 : f32 to vector<2x1024xf32>
    %52 = arith.addf %51, %50 : vector<2x1024xf32>
    %53 = arith.mulf %42, %52 : vector<2x1024xf32>
    %54 = arith.truncf %53 : vector<2x1024xf32> to vector<2x1024xbf16>
    %c0_27 = arith.constant 0 : index
    %c0_28 = arith.constant 0 : index
    %55 = vector.load %arg10[%c0_27, %c0_28] : memref<1024x512xbf16, #tpu.memory_space<vmem>>, vector<1024x512xbf16>
    %cst_29 = arith.constant dense<0.000000e+00> : vector<2x512xf32>
    %56 = tpu.matmul %54, %55, %cst_29 {dimension_numbers = #tpu.dot_dimension_numbers<[1], [0], [0], [1], [0, 0, 1, 1], [], []>} : vector<2x1024xbf16>, vector<1024x512xbf16>, vector<2x512xf32> -> vector<2x512xf32>
    %c0_30 = arith.constant 0 : index
    %c0_31 = arith.constant 0 : index
    %57 = vector.load %arg11[%c0_30, %c0_31] : memref<1x512xf32, #tpu.memory_space<vmem>>, vector<1x512xf32>
    %58 = vector.broadcast %57 : vector<1x512xf32> to vector<2x512xf32>
    %59 = arith.addf %56, %58 : vector<2x512xf32>
    %c0_32 = arith.constant 0 : index
    %c0_33 = arith.constant 0 : index
    %60 = vector.load %arg12[%c0_32, %c0_33] : memref<1x512xf32, #tpu.memory_space<vmem>>, vector<1x512xf32>
    %61 = vector.broadcast %60 : vector<1x512xf32> to vector<2x512xf32>
    %62 = arith.mulf %59, %61 : vector<2x512xf32>
    %c0_34 = arith.constant 0 : index
    %c0_35 = arith.constant 0 : index
    %63 = vector.load %arg13[%c0_34, %c0_35] : memref<1x512xf32, #tpu.memory_space<vmem>>, vector<1x512xf32>
    %64 = vector.broadcast %63 : vector<1x512xf32> to vector<2x512xf32>
    %65 = arith.addf %62, %64 : vector<2x512xf32>
    %cst_36 = arith.constant 5.000000e-01 : f32
    %66 = vector.broadcast %cst_36 : f32 to vector<2x512xf32>
    %67 = arith.mulf %66, %65 : vector<2x512xf32>
    %cst_37 = arith.constant 4.471500e-02 : f32
    %68 = vector.broadcast %cst_37 : f32 to vector<2x512xf32>
    %69 = arith.mulf %68, %65 : vector<2x512xf32>
    %70 = arith.mulf %69, %65 : vector<2x512xf32>
    %71 = arith.mulf %70, %65 : vector<2x512xf32>
    %72 = arith.addf %65, %71 : vector<2x512xf32>
    %cst_38 = arith.constant 0.797884583 : f32
    %73 = vector.broadcast %cst_38 : f32 to vector<2x512xf32>
    %74 = arith.mulf %73, %72 : vector<2x512xf32>
    %75 = math.tanh %74 : vector<2x512xf32>
    %cst_39 = arith.constant 1.000000e+00 : f32
    %76 = vector.broadcast %cst_39 : f32 to vector<2x512xf32>
    %77 = arith.addf %76, %75 : vector<2x512xf32>
    %78 = arith.mulf %67, %77 : vector<2x512xf32>
    %79 = arith.truncf %78 : vector<2x512xf32> to vector<2x512xbf16>
    %c0_40 = arith.constant 0 : index
    %c0_41 = arith.constant 0 : index
    %80 = vector.load %arg14[%c0_40, %c0_41] : memref<512x256xbf16, #tpu.memory_space<vmem>>, vector<512x256xbf16>
    %cst_42 = arith.constant dense<0.000000e+00> : vector<2x256xf32>
    %81 = tpu.matmul %79, %80, %cst_42 {dimension_numbers = #tpu.dot_dimension_numbers<[1], [0], [0], [1], [0, 0, 1, 1], [], []>} : vector<2x512xbf16>, vector<512x256xbf16>, vector<2x256xf32> -> vector<2x256xf32>
    %c0_43 = arith.constant 0 : index
    %c0_44 = arith.constant 0 : index
    %82 = vector.load %arg15[%c0_43, %c0_44] : memref<1x256xf32, #tpu.memory_space<vmem>>, vector<1x256xf32>
    %83 = vector.broadcast %82 : vector<1x256xf32> to vector<2x256xf32>
    %84 = arith.addf %81, %83 : vector<2x256xf32>
    %c0_45 = arith.constant 0 : index
    %c0_46 = arith.constant 0 : index
    %85 = vector.load %arg16[%c0_45, %c0_46] : memref<1x256xf32, #tpu.memory_space<vmem>>, vector<1x256xf32>
    %86 = vector.broadcast %85 : vector<1x256xf32> to vector<2x256xf32>
    %87 = arith.mulf %84, %86 : vector<2x256xf32>
    %c0_47 = arith.constant 0 : index
    %c0_48 = arith.constant 0 : index
    %88 = vector.load %arg17[%c0_47, %c0_48] : memref<1x256xf32, #tpu.memory_space<vmem>>, vector<1x256xf32>
    %89 = vector.broadcast %88 : vector<1x256xf32> to vector<2x256xf32>
    %90 = arith.addf %87, %89 : vector<2x256xf32>
    %cst_49 = arith.constant 5.000000e-01 : f32
    %91 = vector.broadcast %cst_49 : f32 to vector<2x256xf32>
    %92 = arith.mulf %91, %90 : vector<2x256xf32>
    %cst_50 = arith.constant 4.471500e-02 : f32
    %93 = vector.broadcast %cst_50 : f32 to vector<2x256xf32>
    %94 = arith.mulf %93, %90 : vector<2x256xf32>
    %95 = arith.mulf %94, %90 : vector<2x256xf32>
    %96 = arith.mulf %95, %90 : vector<2x256xf32>
    %97 = arith.addf %90, %96 : vector<2x256xf32>
    %cst_51 = arith.constant 0.797884583 : f32
    %98 = vector.broadcast %cst_51 : f32 to vector<2x256xf32>
    %99 = arith.mulf %98, %97 : vector<2x256xf32>
    %100 = math.tanh %99 : vector<2x256xf32>
    %cst_52 = arith.constant 1.000000e+00 : f32
    %101 = vector.broadcast %cst_52 : f32 to vector<2x256xf32>
    %102 = arith.addf %101, %100 : vector<2x256xf32>
    %103 = arith.mulf %92, %102 : vector<2x256xf32>
    %104 = arith.truncf %103 : vector<2x256xf32> to vector<2x256xbf16>
    %c0_53 = arith.constant 0 : index
    %c0_54 = arith.constant 0 : index
    %105 = vector.load %arg18[%c0_53, %c0_54] : memref<256x128xbf16, #tpu.memory_space<vmem>>, vector<256x128xbf16>
    %cst_55 = arith.constant dense<0.000000e+00> : vector<2x128xf32>
    %106 = tpu.matmul %104, %105, %cst_55 {dimension_numbers = #tpu.dot_dimension_numbers<[1], [0], [0], [1], [0, 0, 1, 1], [], []>} : vector<2x256xbf16>, vector<256x128xbf16>, vector<2x128xf32> -> vector<2x128xf32>
    %c0_56 = arith.constant 0 : index
    %c0_57 = arith.constant 0 : index
    %107 = vector.load %arg19[%c0_56, %c0_57] : memref<1x128xf32, #tpu.memory_space<vmem>>, vector<1x128xf32>
    %108 = vector.broadcast %107 : vector<1x128xf32> to vector<2x128xf32>
    %109 = arith.addf %106, %108 : vector<2x128xf32>
    %c0_58 = arith.constant 0 : index
    %c0_59 = arith.constant 0 : index
    %110 = vector.load %arg20[%c0_58, %c0_59] : memref<2x128xf32, #tpu.memory_space<vmem>>, vector<2x128xf32>
    tpu.vector_store %arg20[%c0_58, %c0_59], %109 {strides = array<i32>} : memref<2x128xf32, #tpu.memory_space<vmem>>, vector<2x128xf32>,
    return
  }
  func.func @transform_0(%arg0: i32) -> (i32, i32) {
    %c0_i32 = arith.constant 0 : i32
    %c0_i32_0 = arith.constant 0 : i32
    return %arg0, %c0_i32 : i32, i32
  }
  func.func @transform_1(%arg0: i32) -> (i32, i32) {
    %c0_i32 = arith.constant 0 : i32
    %c0_i32_0 = arith.constant 0 : i32
    return %arg0, %c0_i32 : i32, i32
  }
  func.func @transform_2(%arg0: i32) -> (i32, i32) {
    %c0_i32 = arith.constant 0 : i32
    %c0_i32_0 = arith.constant 0 : i32
    %c0_i32_1 = arith.constant 0 : i32
    return %c0_i32, %c0_i32_0 : i32, i32
  }
  func.func @transform_3(%arg0: i32) -> (i32, i32) {
    %c0_i32 = arith.constant 0 : i32
    %c0_i32_0 = arith.constant 0 : i32
    %c0_i32_1 = arith.constant 0 : i32
    return %c0_i32, %c0_i32_0 : i32, i32
  }
  func.func @transform_4(%arg0: i32) -> (i32, i32) {
    %c0_i32 = arith.constant 0 : i32
    %c0_i32_0 = arith.constant 0 : i32
    %c0_i32_1 = arith.constant 0 : i32
    return %c0_i32, %c0_i32_0 : i32, i32
  }
  func.func @transform_5(%arg0: i32) -> (i32, i32) {
    %c0_i32 = arith.constant 0 : i32
    %c0_i32_0 = arith.constant 0 : i32
    %c0_i32_1 = arith.constant 0 : i32
    return %c0_i32, %c0_i32_0 : i32, i32
  }
  func.func @transform_6(%arg0: i32) -> (i32, i32) {
    %c0_i32 = arith.constant 0 : i32
    %c0_i32_0 = arith.constant 0 : i32
    %c0_i32_1 = arith.constant 0 : i32
    return %c0_i32, %c0_i32_0 : i32, i32
  }
  func.func @transform_7(%arg0: i32) -> (i32, i32) {
    %c0_i32 = arith.constant 0 : i32
    %c0_i32_0 = arith.constant 0 : i32
    %c0_i32_1 = arith.constant 0 : i32
    return %c0_i32, %c0_i32_0 : i32, i32
  }
  func.func @transform_8(%arg0: i32) -> (i32, i32) {
    %c0_i32 = arith.constant 0 : i32
    %c0_i32_0 = arith.constant 0 : i32
    %c0_i32_1 = arith.constant 0 : i32
    return %c0_i32, %c0_i32_0 : i32, i32
  }
  func.func @transform_9(%arg0: i32) -> (i32, i32) {
    %c0_i32 = arith.constant 0 : i32
    %c0_i32_0 = arith.constant 0 : i32
    %c0_i32_1 = arith.constant 0 : i32
    return %c0_i32, %c0_i32_0 : i32, i32
  }
  func.func @transform_10(%arg0: i32) -> (i32, i32) {
    %c0_i32 = arith.constant 0 : i32
    %c0_i32_0 = arith.constant 0 : i32
    %c0_i32_1 = arith.constant 0 : i32
    return %c0_i32, %c0_i32_0 : i32, i32
  }
  func.func @transform_11(%arg0: i32) -> (i32, i32) {
    %c0_i32 = arith.constant 0 : i32
    %c0_i32_0 = arith.constant 0 : i32
    %c0_i32_1 = arith.constant 0 : i32
    return %c0_i32, %c0_i32_0 : i32, i32
  }
  func.func @transform_12(%arg0: i32) -> (i32, i32) {
    %c0_i32 = arith.constant 0 : i32
    %c0_i32_0 = arith.constant 0 : i32
    %c0_i32_1 = arith.constant 0 : i32
    return %c0_i32, %c0_i32_0 : i32, i32
  }
  func.func @transform_13(%arg0: i32) -> (i32, i32) {
    %c0_i32 = arith.constant 0 : i32
    %c0_i32_0 = arith.constant 0 : i32
    %c0_i32_1 = arith.constant 0 : i32
    return %c0_i32, %c0_i32_0 : i32, i32
  }
  func.func @transform_14(%arg0: i32) -> (i32, i32) {
    %c0_i32 = arith.constant 0 : i32
    %c0_i32_0 = arith.constant 0 : i32
    %c0_i32_1 = arith.constant 0 : i32
    return %c0_i32, %c0_i32_0 : i32, i32
  }
  func.func @transform_15(%arg0: i32) -> (i32, i32) {
    %c0_i32 = arith.constant 0 : i32
    %c0_i32_0 = arith.constant 0 : i32
    %c0_i32_1 = arith.constant 0 : i32
    return %c0_i32, %c0_i32_0 : i32, i32
  }
  func.func @transform_16(%arg0: i32) -> (i32, i32) {
    %c0_i32 = arith.constant 0 : i32
    %c0_i32_0 = arith.constant 0 : i32
    %c0_i32_1 = arith.constant 0 : i32
    return %c0_i32, %c0_i32_0 : i32, i32
  }
  func.func @transform_17(%arg0: i32) -> (i32, i32) {
    %c0_i32 = arith.constant 0 : i32
    %c0_i32_0 = arith.constant 0 : i32
    %c0_i32_1 = arith.constant 0 : i32
    return %c0_i32, %c0_i32_0 : i32, i32
  }
  func.func @transform_18(%arg0: i32) -> (i32, i32) {
    %c0_i32 = arith.constant 0 : i32
    %c0_i32_0 = arith.constant 0 : i32
    %c0_i32_1 = arith.constant 0 : i32
    return %c0_i32, %c0_i32_0 : i32, i32
  }
  func.func @transform_19(%arg0: i32) -> (i32, i32) {
    %c0_i32 = arith.constant 0 : i32
    %c0_i32_0 = arith.constant 0 : i32
    return %arg0, %c0_i32 : i32, i32
  }
}

</mosaic_0001>

<bundles_post_ra>
// kernel: bird_classifier_forward.6
= control target key start
LH: loop header
LB: loop body
LE: loop exit
PB: predicated region body
PF: predicated region fallthrough
CT: control target
= control target key end

     0   :  { %v199_v0 = vmov 0   ;;  %vm122_vm0 = vcmask 523264   ;;  %vm166_vm1 = vcmask 261120   ;;  %s268_s1 = inlined_call_operand.vmem [shape: bf16[192,32], index: 1, kind: input, shape index: {}]   ;;  %s269_s0 = inlined_call_operand.vmem [shape: f32[8,192], index: 0, kind: input, shape index: {}]   ;;  %s270_s2 = inlined_call_operand.vmem [shape: f32[1,32], index: 2, kind: input, shape index: {}]   ;;  %s271_s3 = inlined_call_operand.vmem [shape: f32[8,32], index: 3, kind: output, shape index: {}]  }
   0x1   :  { %126 = vmatprep.subr.bf16.mxu0 %v199_v0  ;;  %v187_v1 = vld [vmem:[%s268_s1] sm:$0xff]   ;;  %v188_v2 = vld [vmem:[%s268_s1 + $0x8] sm:$0xff]   ;;  %v189_v3 = vld [vmem:[%s268_s1 + $0x10] sm:$0xff]  }
   0x2   :  { %127 = vmatpush1.bf16.msra.mxu0 %v187_v1  ;;  %v190_v4 = vld [vmem:[%s268_s1 + $0x18] sm:$0xff]   ;;  %v16_v5 = vld [vmem:[%s269_s0 + $0x8] sm:$0xff]  ;;  %v191_v7 = vld [vmem:[%s268_s1 + $0x20] sm:$0xff]  }
   0x3   :  { %128 = vmatprep.subr.bf16.mxu0 %v199_v0  ;;  %v18_v6 = vpack.c.bf16 %v16_v5, %v16_v5  ;;  %v192_v8 = vld [vmem:[%s268_s1 + $0x28] sm:$0xff]   ;;  %v193_v9 = vld [vmem:[%s268_s1 + $0x30] sm:$0xff]   ;;  %v194_v10 = vld [vmem:[%s268_s1 + $0x38] sm:$0xff]  }
   0x4   :  { %v195_v11 = vld [vmem:[%s268_s1 + $0x40] sm:$0xff]   ;;  %v196_v12 = vld [vmem:[%s268_s1 + $0x48] sm:$0xff]   ;;  %v197_v13 = vld [vmem:[%s268_s1 + $0x50] sm:$0xff]  }
   0x5   :  { %185 = vmatprep.mubr.msk.bf16.mxu0 %vm122_vm0, %v18_v6  ;;  %v198_v14 = vld [vmem:[%s268_s1 + $0x58] sm:$0xff]   ;;  %v15_v15 = vld [vmem:[%s269_s0] sm:$0xff] }
   0x6   :  { %129 = vmatpush1.bf16.msra.mxu0 %v188_v2  ;;  %v17_v16 = vpack.c.bf16 %v15_v15, %v15_v15  ;;  %v172_v17 = vld [vmem:[%s270_s2] ss:$0 sm:$0xff] }
   0x7   :  { %130 = vmatprep.subr.bf16.mxu0 %v199_v0 }
   0xa   :  { %131 = vmatpush1.bf16.msra.mxu0 %v189_v3 }
   0xb   :  { %132 = vmatprep.subr.bf16.mxu0 %v199_v0 }
   0xe   :  { %133 = vmatpush1.bf16.msra.mxu0 %v190_v4 }
   0xf   :  { %134 = vmatprep.subr.bf16.mxu0 %v199_v0 }
  0x12   :  { %135 = vmatpush1.bf16.msra.mxu0 %v191_v7 }
  0x13   :  { %136 = vmatprep.subr.bf16.mxu0 %v199_v0 }
  0x16   :  { %137 = vmatpush1.bf16.msra.mxu0 %v192_v8 }
  0x17   :  { %138 = vmatprep.subr.bf16.mxu0 %v199_v0 }
  0x1a   :  { %139 = vmatpush1.bf16.msra.mxu0 %v193_v9 }
  0x1b   :  { %140 = vmatprep.subr.bf16.mxu0 %v199_v0 }
  0x1e   :  { %141 = vmatpush1.bf16.msra.mxu0 %v194_v10 }
  0x1f   :  { %142 = vmatprep.subr.bf16.mxu0 %v199_v0 }
  0x22   :  { %143 = vmatpush1.bf16.msra.mxu0 %v195_v11 }
  0x23   :  { %144 = vmatprep.subr.bf16.mxu0 %v199_v0 }
  0x26   :  { %145 = vmatpush1.bf16.msra.mxu0 %v196_v12 }
  0x27   :  { %146 = vmatprep.subr.bf16.mxu0 %v199_v0 }
  0x2a   :  { %147 = vmatpush1.bf16.msra.mxu0 %v197_v13 }
  0x2b   :  { %148 = vmatprep.subr.bf16.mxu0 %v199_v0 }
  0x2e   :  { %149 = vmatpush1.bf16.msra.mxu0 %v198_v14 }
  0x31   :  { %159 = vmatmul.mubr.bf16.vlgmr.msra.gmra.mrb[0].mxu0 %v17_v16 }
 0x104   :  { %v160_v18 = vpop.f32.mrb[0].mxu0 }
 0x105   :  { %v161_v19 = vadd.f32 %v172_v17, %v160_v18  ;;  %v162_v20 = vpop.f32.mrb[1].mxu0 }
 0x106   :  { %v163_v21 = vpop.f32.mrb[2].mxu0 }
 0x107   :  { %167 = vst.msk [vmem:[%s271_s3] sm:$0xff] %vm166_vm1, %v161_v19  ;;  %v164_v22 = vpop.f32.mrb[3].mxu0 }

// kernel: bird_classifier_forward.8
= control target key start
LH: loop header
LB: loop body
LE: loop exit
PB: predicated region body
PF: predicated region fallthrough
CT: control target
= control target key end

     0   :  { %vm33_vm0 = vcmask 261120   ;;  %vm37_vm1 = vcmask 254976   ;;  %v327_v17 = vmov 0.0   ;;  %vm328_vm2 = vmmov 0   ;;  %s424_s0 = inlined_call_operand.vmem [shape: bf16[10,32], index: 0, kind: input, shape index: {}]   ;;  %s425_s3 = inlined_call_operand.vmem [shape: bf16[32,64], index: 3, kind: input, shape index: {}]   ;;  %s426_s1 = inlined_call_operand.vmem [shape: f32[1,32], index: 1, kind: input, shape index: {}]   ;;  %s427_s2 = inlined_call_operand.vmem [shape: f32[1,32], index: 2, kind: input, shape index: {}]   ;;  %s428_s5 = inlined_call_operand.vmem [shape: bf16[64,32], index: 5, kind: input, shape index: {}]   ;;  %s429_s4 = inlined_call_operand.vmem [shape: f32[1,64], index: 4, kind: input, shape index: {}]   ;;  %s430_s6 = inlined_call_operand.vmem [shape: f32[1,32], index: 6, kind: input, shape index: {}]   ;;  %s431_s7 = inlined_call_operand.vmem [shape: bf16[10,32], index: 7, kind: output, shape index: {}]  }
   0x1   :  { %v27_v0 = vld [vmem:[%s424_s0] sm:$0xf]  ;;  %v28_v1 = vld [vmem:[%s424_s0 + $0x4] sm:$0x1]  ;;  %291 = vmatprep.subr.bf16.mxu0 %v327_v17  ;;  %299 = vmatprep.subr.bf16.mxu1 %v327_v17  ;;  %v314_v18 = vld [vmem:[%s425_s3 + $0x8] sm:$0xff]   ;;  %vm204_vm3 = vcmask 523264  }
   0x2   :  { %v375_v2 = vunpack.c.l.bf16 %v27_v0  ;;  %v377_v3 = vunpack.c.l.bf16 %v28_v1  ;;  %v313_v16 = vld [vmem:[%s425_s3] sm:$0xff]   ;;  %295 = vmatprep.mubr.msk.bf16.mxu0 %vm328_vm2, %v327_v17  ;;  %307 = vmatprep.mubr.msk.bf16.mxu1 %vm328_vm2, %v327_v17  ;;  %v316_v37 = vld [vmem:[%s428_s5 + $0x8] sm:$0xff]   ;;  %v317_v38 = vld [vmem:[%s428_s5 + $0x10] sm:$0xff]   ;;  %vm259_vm4 = vcmask 257024   ;;  %vm261_vm5 = vcmask 253952  }
   0x3   :  { %292 = vmatpush3.bf16.msra.mxu0 %v313_v16  ;;  %v267_v27 = vld [vmem:[%s426_s1] ss:$0 sm:$0xff]  ;;  %v318_v39 = vld [vmem:[%s428_s5 + $0x18] sm:$0xff]  }
   0x4   :  { %v34_v4 = vsel %vm33_vm0, %v375_v2, 0.0  ;;  %v38_v5 = vsel %vm37_vm1, %v377_v3, 0.0  ;;  %293 = vmatprep.subr.bf16.mxu0 %v327_v17  ;;  %v268_v31 = vld [vmem:[%s427_s2] ss:$0 sm:$0xff] }
   0x5   :  { %35 = vadd.xlane.f32.xlu0 %v34_v4  ;;  %v315_v36 = vld [vmem:[%s428_s5] sm:$0xff]  }
   0x6   :  { %300 = vmatpush3.bf16.msra.mxu1 %v315_v36  ;;  %v269_v40 = vld [vmem:[%s429_s4] ss:$0 sm:$0xff] }
   0x7   :  { %294 = vmatpush3.bf16.msra.mxu0 %v314_v18  ;;  %301 = vmatprep.subr.bf16.mxu1 %v327_v17  ;;  %v273_v4 = vld [vmem:[%s430_s6] ss:$0 sm:$0xff] }
   0x9   :  { %39 = vadd.xlane.f32.xlu0 %v38_v5 }
   0xa   :  { %302 = vmatpush3.bf16.msra.mxu1 %v316_v37 }
   0xb   :  { %303 = vmatprep.subr.bf16.mxu1 %v327_v17 }
   0xe   :  { %304 = vmatpush3.bf16.msra.mxu1 %v317_v38 }
   0xf   :  { %305 = vmatprep.subr.bf16.mxu1 %v327_v17 }
  0x12   :  { %306 = vmatpush3.bf16.msra.mxu1 %v318_v39 }
  0x92   :  { %v36_v6 = vpop.xlane.xlu0 %35 }
  0x93   :  { %v42_v7 = vmul.f32 0.03125, %v36_v6 }
  0x95   :  { %v44_v8 = vsub.f32 %v375_v2, %v42_v7 }
  0x96   :  { %v40_v9 = vpop.xlane.xlu0 %39 }
  0x97   :  { %v43_v10 = vmul.f32 0.03125, %v40_v9  ;;  %v46_v11 = vmul.f32 %v44_v8, %v44_v8 }
  0x99   :  { %v45_v12 = vsub.f32 %v377_v3, %v43_v10  ;;  %v48_v13 = vsel %vm33_vm0, %v46_v11, 0.0 }
  0x9a   :  { %49 = vadd.xlane.f32.xlu1 %v48_v13 }
  0x9b   :  { %v47_v14 = vmul.f32 %v45_v12, %v45_v12 }
  0x9d   :  { %v51_v15 = vsel %vm37_vm1, %v47_v14, 0.0 }
  0x9e   :  { %52 = vadd.xlane.f32.xlu1 %v51_v15 }
 0x127   :  { %v50_v19 = vpop.xlane.xlu1 %49 }
 0x128   :  { %v54_v20 = vmul.f32 0.03125, %v50_v19 }
 0x12a   :  { %v56_v21 = vadd.f32 1e-12, %v54_v20 }
 0x12b   :  { %v53_v22 = vpop.xlane.xlu1 %52 }
 0x12c   :  { %319 = vrsqrt.f32 %v56_v21  ;;  %v55_v23 = vmul.f32 0.03125, %v53_v22 }
 0x12e   :  { %v57_v24 = vadd.f32 1e-12, %v55_v23 }
 0x130   :  { %321 = vrsqrt.f32 %v57_v24 }
 0x136   :  { %v320_v25 = vpop.eup %319 }
 0x137   :  { %v60_v26 = vmul.f32 %v320_v25, %v44_v8 }
 0x139   :  { %v68_v30 = vmul.f32 %v267_v27, %v60_v26 }
 0x13a   :  { %v322_v28 = vpop.eup %321 }
 0x13b   :  { %v61_v29 = vmul.f32 %v322_v28, %v45_v12  ;;  %v76_v33 = vadd.f32 %v268_v31, %v68_v30 }
 0x13d   :  { %v69_v32 = vmul.f32 %v267_v27, %v61_v29 }
 0x13f   :  { %v77_v34 = vadd.f32 %v268_v31, %v69_v32 }
 0x141   :  { %v78_v35 = vpack.c.bf16 %v77_v34, %v76_v33 }
 0x143   :  { %296 = vmatmul.mubr.msk.bf16.vlgmr.msra.gmra.mrb[0].mxu0 %vm33_vm0, %v78_v35 }
 0x216   :  { %v139_v41 = vpop.f32.mrb[0].mxu0 }
 0x217   :  { %v140_v42 = vadd.f32 %v269_v40, %v139_v41  ;;  %v297_v43 = vpop.f32.mrb[1].mxu0 }
 0x218   :  { %v142_v44 = vpop.f32.mrb[2].mxu0 }
 0x219   :  { %v148_v45 = vmul.f32 0.044715, %v140_v42  ;;  %v143_v46 = vadd.f32 %v269_v40, %v142_v44  ;;  %v298_v47 = vpop.f32.mrb[3].mxu0  ;;  %v146_v60 = vmul.f32 0.5, %v140_v42 }
 0x21b   :  { %v150_v48 = vmul.f32 %v148_v45, %v140_v42  ;;  %v149_v49 = vmul.f32 0.044715, %v143_v46  ;;  %v147_v61 = vmul.f32 0.5, %v143_v46 }
 0x21d   :  { %v152_v50 = vmul.f32 %v150_v48, %v140_v42  ;;  %v151_v51 = vmul.f32 %v149_v49, %v143_v46 }
 0x21f   :  { %v154_v52 = vadd.f32 %v152_v50, %v140_v42  ;;  %v153_v53 = vmul.f32 %v151_v51, %v143_v46 }
 0x221   :  { %v156_v54 = vmul.f32 0.7978846, %v154_v52  ;;  %v155_v55 = vadd.f32 %v153_v53, %v143_v46 }
 0x223   :  { %323 = vtanh.f32 %v156_v54  ;;  %v157_v56 = vmul.f32 0.7978846, %v155_v55 }
 0x225   :  { %325 = vtanh.f32 %v157_v56 }
 0x22d   :  { %v324_v57 = vpop.eup %323 }
 0x22e   :  { %v160_v58 = vadd.f32 1.0, %v324_v57 }
 0x22f   :  { %v326_v59 = vpop.eup %325 }
 0x230   :  { %v161_v62 = vadd.f32 1.0, %v326_v59  ;;  %v162_v63 = vmul.f32 %v160_v58, %v146_v60 }
 0x232   :  { %v163_v0 = vmul.f32 %v161_v62, %v147_v61 }
 0x234   :  { %v164_v1 = vpack.c.bf16 %v163_v0, %v162_v63 }
 0x236   :  { %308 = vmatmul.mubr.msk.bf16.vlgmr.msra.gmra.mrb[0].mxu1 %vm204_vm3, %v164_v1 }
 0x309   :  { %v242_v5 = vpop.f32.mrb[0].mxu1 }
 0x30a   :  { %v243_v6 = vadd.f32 %v273_v4, %v242_v5  ;;  %v309_v7 = vpop.f32.mrb[1].mxu1 }
 0x30b   :  { %v245_v8 = vpop.f32.mrb[2].mxu1 }
 0x30c   :  { %v249_v9 = vadd.f32 %v243_v6, %v375_v2  ;;  %v246_v10 = vadd.f32 %v273_v4, %v245_v8  ;;  %v310_v11 = vpop.f32.mrb[3].mxu1 }
 0x30e   :  { %v281_v12 = vpack.c.bf16 %v249_v9, %v249_v9  ;;  %v250_v13 = vadd.f32 %v246_v10, %v377_v3 }
 0x310   :  { %260 = vst.msk [vmem:[%s431_s7] sm:$0xf] %vm259_vm4, %v281_v12  ;;  %v282_v14 = vpack.c.bf16 %v250_v13, %v250_v13 }
 0x312   :  { %262 = vst.msk [vmem:[%s431_s7 + $0x4] sm:$0x1] %vm261_vm5, %v282_v14 }

// kernel: bird_classifier_forward.7
= control target key start
LH: loop header
LB: loop body
LE: loop exit
PB: predicated region body
PF: predicated region fallthrough
CT: control target
= control target key end

     0   :  { %s1256_s24 = smov 0   ;;  %s1388_s0 = inlined_call_operand.vmem [shape: bf16[2,5,32], index: 0, kind: input, shape index: {}]   ;;  %s1389_s1 = inlined_call_operand.vmem [shape: f32[1,32], index: 1, kind: input, shape index: {}]   ;;  %s1390_s2 = inlined_call_operand.vmem [shape: f32[1,32], index: 2, kind: input, shape index: {}]   ;;  %s1391_s3 = inlined_call_operand.vmem [shape: bf16[32,96], index: 3, kind: input, shape index: {}]   ;;  %s1392_s4 = inlined_call_operand.vmem [shape: f32[1,96], index: 4, kind: input, shape index: {}]   ;;  %s1393_s5 = inlined_call_operand.vmem [shape: bf16[32,32], index: 5, kind: input, shape index: {}]   ;;  %s1394_s6 = inlined_call_operand.vmem [shape: f32[1,32], index: 6, kind: input, shape index: {}]   ;;  %s1395_s7 = inlined_call_operand.vmem [shape: bf16[2,5,32], index: 7, kind: output, shape index: {}]  }
   0x1 LB: > { %s1017_s25 = sadd.s32 4294967295, %s1197_s24   ;;  %p1021_p0 = scmp.ge.s32.totalorder %s1197_s24, 1  ;;  %s1197_s24 = sphi %s1256_s24, %s17_s24  }
   0x2   : > { %p236_p1 = scmp.lt.s32.totalorder %s1197_s24, 3 }
   0x4   : > { %p237_p2 = pnand %p1021_p0, %p236_p1 }
   0x5   : > { %p266_p3 = scmp.lt.s32.totalorder (!%p237_p2), %s1017_s25, 1  ;;  %vm279_vm0 = vcmask (!%p237_p2), 258048   ;;  %v1165_v8 = vld [vmem:[%s1391_s3] sm:$0xff] (!%p237_p2)   ;;  %v1199_v9 = vmov (!%p237_p2), 0.0   ;;  %vm1200_vm1 = vmmov (!%p237_p2), 0   ;;  %v1166_v10 = vld [vmem:[%s1391_s3 + $0x8] sm:$0xff] (!%p237_p2)  }
   0x6   : > { %240 = sbr.rel (%p237_p2) target bundleno = 1835 (0x72b), region = 48  ;;  %1076 = vmatprep.subr.bf16.mxu0 (!%p237_p2), %v1199_v9  ;;  %1080 = vmatprep.mubr.msk.bf16.mxu0 (!%p237_p2), %vm1200_vm1, %v1199_v9  ;;  %v1024_v15 = vld [vmem:[%s1389_s1] ss:$0 sm:$0xff] (!%p237_p2)  ;;  %vm332_vm2 = vcmask (!%p237_p2), 261120   ;;  %vm377_vm3 = vcmask (!%p237_p2), 780288   ;;  %s1201_s17 = smov (!%p237_p2), 120  }
   0x7   : > { %1077 = vmatpush3.bf16.msra.mxu0 (!%p237_p2), %v1165_v8  ;;  %1084 = vmatprep.subr.bf16.mxu1 (!%p237_p2), %v1199_v9  ;;  %v1025_v17 = vld [vmem:[%s1390_s2] ss:$0 sm:$0xff] (!%p237_p2)  ;;  %vm378_vm4 = vsmask.f32 (!%p237_p2), 2304  ;;  %s1202_s18 = smov (!%p237_p2), 96   ;;  %s1203_s19 = smov (!%p237_p2), 88  }
   0x8   : > { %1078 = vmatprep.subr.bf16.mxu0 (!%p237_p2), %v1199_v9  ;;  %1086 = vmatprep.mubr.msk.bf16.mxu1 (!%p237_p2), %vm1200_vm1, %v1199_v9  ;;  %v1026_v21 = vld [vmem:[%s1392_s4] ss:$0 sm:$0xff] (!%p237_p2)  ;;  %vm379_vm5 = vmand (!%p237_p2), %vm377_vm3, %vm378_vm4  ;;  %s1204_s20 = smov (!%p237_p2), 80   ;;  %s1205_s21 = smov (!%p237_p2), 112   ;;  %vm389_vm6 = vcmask (!%p237_p2), 64512   ;;  %vm437_vm7 = vcmask (!%p237_p2), 36864  }
   0x9   : > { %v380_v25 = vld [vmem:[#allocation2] sm:$0x7] (!%p237_p2)  ;;  %s1206_s22 = smov (!%p237_p2), 72   ;;  %s1207_s23 = smov (!%p237_p2), 104   ;;  %vm456_vm8 = vcmask (!%p237_p2), 1041408   ;;  %vm457_vm9 = vcmask (!%p237_p2), 1042432  }
   0xa   : > { %s1208_s27 = smov (!%p237_p2), 56   ;;  %s1209_s28 = smov (!%p237_p2), 64   ;;  %vm452_vm10 = vcmask (!%p237_p2), 39936   ;;  %vm504_vm11 = vcmask (!%p237_p2), 59392   ;;  %vm631_vm13 = vcmask (!%p237_p2), 124992   ;;  %vm758_vm15 = vcmask (!%p237_p2), 190592  }
   0xb   : > { %1079 = vmatpush3.bf16.msra.mxu0 (!%p237_p2), %v1166_v10  ;;  %s1211_s30 = smov (!%p237_p2), 40   ;;  %vm505_vm12 = vmand (!%p237_p2), %vm504_vm11, %vm378_vm4  ;;  %s1213_s8 = smov (!%p237_p2), 8  }
   0xc   : > { %1090 = vmatprep.subr.bf16.mxu0 (!%p237_p2), %v1199_v9  ;;  %s1214_s13 = smov (!%p237_p2), 16   ;;  %s1215_s14 = smov (!%p237_p2), 24   ;;  %vm632_vm14 = vmand (!%p237_p2), %vm631_vm13, %vm378_vm4 }
   0xd   : > { %s1397_s25 = smov (!%p266_p3, %s1017_s25), 1 }
   0xe   : > { %s1022_s26 = sshll.u32 %s1397_s25, 2 }
   0xf   : > { %s269_s29 = scalar_lea.vmem %s1388_s0, %s1022_s26 }
  0x10   : > { %v275_v0 = vld [vmem:[%s269_s29] sm:$0x7]  ;;  %s1210_s29 = smov 48  }
  0x11   : > { %v1272_v1 = vunpack.c.l.bf16 %v275_v0 }
  0x13   : > { %v280_v2 = vsel %vm279_vm0, %v1272_v1, 0.0 }
  0x14   : > { %281 = vadd.xlane.f32.xlu0 %v280_v2 }
  0xa1   : > { %v282_v3 = vpop.xlane.xlu0 %281 }
  0xa2   : > { %v284_v4 = vmul.f32 0.03125, %v282_v3 }
  0xa4   : > { %v285_v5 = vsub.f32 %v1272_v1, %v284_v4 }
  0xa6   : > { %v286_v6 = vmul.f32 %v285_v5, %v285_v5 }
  0xa8   : > { %v287_v7 = vsel %vm279_vm0, %v286_v6, 0.0  ;;  %vm759_vm0 = vmand %vm758_vm15, %vm378_vm4 }
  0xa9   : > { %288 = vadd.xlane.f32.xlu0 %v287_v7 }
 0x136   : > { %v289_v11 = vpop.xlane.xlu0 %288 }
 0x137   : > { %v290_v12 = vmul.f32 0.03125, %v289_v11 }
 0x139   : > { %v291_v13 = vadd.f32 1e-12, %v290_v12 }
 0x13b   : > { %1173 = vrsqrt.f32 %v291_v13 }
 0x145   : > { %v1174_v14 = vpop.eup %1173 }
 0x146   : > { %v293_v16 = vmul.f32 %v1174_v14, %v285_v5 }
 0x148   : > { %v300_v18 = vmul.f32 %v1024_v15, %v293_v16 }
 0x14a   : > { %v307_v19 = vadd.f32 %v1025_v17, %v300_v18 }
 0x14c   : > { %v308_v20 = vpack.c.bf16 %v307_v19, %v307_v19 }
 0x14e   : > { %1081 = vmatmul.mubr.msk.bf16.vlgmr.msra.gmra.mrb[0].mxu0 %vm332_vm2, %v308_v20 }
 0x14f   : > { %1092 = vmatprep.mubr.msk.bf16.mxu0 %vm1200_vm1, %v1199_v9 }
 0x221   : > { %v370_v22 = vpop.f32.mrb[0].mxu0 }
 0x222   : > { %v371_v23 = vadd.f32 %v1026_v21, %v370_v22  ;;  %v1082_v24 = vpop.f32.mrb[1].mxu0 }
 0x223   : > { %v373_v26 = vpop.f32.mrb[2].mxu0 }
 0x224   : > { %v376_v27 = vpack.c.bf16 %v371_v23, %v371_v23  ;;  %v1083_v28 = vpop.f32.mrb[3].mxu0 }
 0x226   : > { %v381_v29 = vsel %vm379_vm5, %v376_v27, %v380_v25  ;;  %vm959_vm5 = vcmask 256000  }
 0x227   : > { %382 = vst [vmem:[#allocation2] sm:$0x7] %v381_v29 }
 0x22e   : > { %v1303_v30 = vld [vmem:[#allocation2] ss:$0 sps:$4 sm:$0x77]  }
 0x22f   : > { %v383_v31 = vld [vmem:[#allocation2] sm:$0x7]  ;;  %513 = vrot.lane.b32.xlu0 %v1303_v30, %s1201_s17 }
 0x230   : > { %v1306_v32 = vcombine.low %v383_v31, %v383_v31  ;;  %v1310_v33 = vld [vmem:[#allocation2] ss:$0 sps:$4 sm:$0x77]  }
 0x231   : > { %v1314_v34 = vld [vmem:[#allocation2] ss:$0 sps:$4 sm:$0x77]  }
 0x232   : > { %387 = vrot.lane.b32.xlu1 %v1306_v32, %s1202_s18 }
 0x236   : > { %515 = vrot.lane.b32.xlu1 %v1303_v30, %s1203_s19  ;;  %s273_s19 = scalar_lea.vmem %s1395_s7, %s1022_s26 }
 0x23a   : > { %642 = vrot.lane.b32.xlu1 %v1310_v33, %s1204_s20 }
 0x23e   : > { %640 = vrot.lane.b32.xlu1 %v1310_v33, %s1205_s21 }
 0x242   : > { %769 = vrot.lane.b32.xlu1 %v1314_v34, %s1206_s22 }
 0x246   : > { %767 = vrot.lane.b32.xlu1 %v1314_v34, %s1207_s23 }
 0x2a1   : > { %v514_v40 = vpop.permute.xlu0 %513 }
 0x2a4   : > { %v388_v35 = vpop.permute.xlu1 %387 }
 0x2a5   : > { %v394_v36 = vsel %vm389_vm6, %v388_v35, 0 }
 0x2a6   : > { %1085 = vmatpush3.bf16.xpose.msra.mxu1 %v394_v36 }
 0x2a7   : > { %1096 = vmatprep.subr.bf16.mxu1 %v1199_v9 }
 0x2a8   : > { %v516_v37 = vpop.permute.xlu1 %515 }
 0x2a9   : > { %v521_v38 = vsel %vm389_vm6, %v516_v37, 0 }
 0x2ac   : > { %v643_v39 = vpop.permute.xlu1 %642 }
 0x2ad   : > { %1087 = vmatmul.mubr.msk.bf16.vlgmr.msra.gmra.mrb[0].mxu1 %vm389_vm6, %v383_v31  ;;  %v648_v42 = vsel %vm389_vm6, %v643_v39, 0 }
 0x2ae   : > { %1097 = vmatpush3.bf16.xpose.msra.mxu1 %v521_v38  ;;  %1098 = vmatprep.mubr.msk.bf16.mxu1 %vm1200_vm1, %v1199_v9 }
 0x2af   : > { %1108 = vmatprep.subr.bf16.mxu1 %v1199_v9 }
 0x2b0   : > { %v641_v41 = vpop.permute.xlu1 %640 }
 0x2b4   : > { %v770_v43 = vpop.permute.xlu1 %769 }
 0x2b5   : > { %1099 = vmatmul.mubr.msk.bf16.vlgmr.msra.gmra.mrb[4].mxu1 %vm389_vm6, %v514_v40  ;;  %v775_v44 = vsel %vm389_vm6, %v770_v43, 0 }
 0x2b6   : > { %1109 = vmatpush3.bf16.xpose.msra.mxu1 %v648_v42  ;;  %1110 = vmatprep.mubr.msk.bf16.mxu1 %vm1200_vm1, %v1199_v9 }
 0x2b7   : > { %1120 = vmatprep.subr.bf16.mxu1 %v1199_v9 }
 0x2b8   : > { %v768_v45 = vpop.permute.xlu1 %767 }
 0x2bd   : > { %1111 = vmatmul.mubr.msk.bf16.vlgmr.msra.gmra.mrb[8].mxu1 %vm389_vm6, %v641_v41 }
 0x2be   : > { %1121 = vmatpush3.bf16.xpose.msra.mxu1 %v775_v44  ;;  %1122 = vmatprep.mubr.msk.bf16.mxu1 %vm1200_vm1, %v1199_v9 }
 0x2bf   : > { %1132 = vmatprep.subr.bf16.mxu1 %v1199_v9 }
 0x2c5   : > { %1123 = vmatmul.mubr.msk.bf16.vlgmr.msra.gmra.mrb[12].mxu1 %vm389_vm6, %v768_v45 }
 0x2c6   : > { %1136 = vmatprep.mubr.msk.bf16.mxu1 %vm1200_vm1, %v1199_v9 }
 0x380   : > { %v430_v46 = vpop.f32.mrb[0].mxu1 }
 0x381   : > { %v436_v47 = vmul.f32 0.35355338, %v430_v46  ;;  %v1088_v48 = vpop.f32.mrb[1].mxu1 }
 0x382   : > { %v433_v49 = vpop.f32.mrb[2].mxu1 }
 0x383   : > { %v1089_v50 = vpop.f32.mrb[3].mxu1  ;;  %v438_v51 = vsel %vm437_vm7, %v436_v47, -inf }
 0x384   : > { %439 = vmax.xlane.f32.xlu1 %v438_v51 }
 0x388   : > { %v557_v52 = vpop.f32.mrb[4].mxu1 }
 0x389   : > { %v563_v53 = vmul.f32 0.35355338, %v557_v52  ;;  %v1100_v54 = vpop.f32.mrb[5].mxu1 }
 0x38a   : > { %v560_v55 = vpop.f32.mrb[6].mxu1 }
 0x38b   : > { %v1101_v56 = vpop.f32.mrb[7].mxu1  ;;  %v564_v57 = vsel %vm437_vm7, %v563_v53, -inf }
 0x38c   : > { %565 = vmax.xlane.f32.xlu0 %v564_v57  ;;  %v506_v56 = vld [vmem:[#allocation3] sm:$0x7] }
 0x390   : > { %v684_v58 = vpop.f32.mrb[8].mxu1 }
 0x391   : > { %v690_v59 = vmul.f32 0.35355338, %v684_v58  ;;  %v1112_v60 = vpop.f32.mrb[9].mxu1 }
 0x392   : > { %v687_v61 = vpop.f32.mrb[10].mxu1 }
 0x393   : > { %v1113_v62 = vpop.f32.mrb[11].mxu1  ;;  %v691_v63 = vsel %vm437_vm7, %v690_v59, -inf }
 0x394   : > { %692 = vmax.xlane.f32.xlu1 %v691_v63 }
 0x398   : > { %v811_v0 = vpop.f32.mrb[12].mxu1 }
 0x399   : > { %v817_v2 = vmul.f32 0.35355338, %v811_v0  ;;  %v1124_v3 = vpop.f32.mrb[13].mxu1 }
 0x39a   : > { %v814_v4 = vpop.f32.mrb[14].mxu1 }
 0x39b   : > { %v1125_v5 = vpop.f32.mrb[15].mxu1  ;;  %v818_v6 = vsel %vm437_vm7, %v817_v2, -inf }
 0x39c   : > { %819 = vmax.xlane.f32.xlu0 %v818_v6  ;;  %v1171_v5 = vld [vmem:[%s1393_s5] sm:$0xff]  }
 0x39d   : > { %1133 = vmatpush3.bf16.msra.mxu1 %v1171_v5 }
 0x39e   : > { %1134 = vmatprep.subr.bf16.mxu1 %v1199_v9 }
 0x411   : > { %v440_v7 = vpop.xlane.xlu1 %439 }
 0x412   : > { %v441_v8 = vsub.f32 %v436_v47, %v440_v7 }
 0x414   : > { %v442_v10 = vmul.f32 1.442695, %v441_v8 }
 0x416   : > { %1175 = vpow2.f32 %v442_v10  ;;  %v1172_v10 = vld [vmem:[%s1393_s5 + $0x8] sm:$0xff]  }
 0x417   : > { %1135 = vmatpush3.bf16.msra.mxu1 %v1172_v10 }
 0x419   : > { %v566_v11 = vpop.xlane.xlu0 %565 }
 0x41a   : > { %v567_v12 = vsub.f32 %v563_v53, %v566_v11 }
 0x41c   : > { %v568_v13 = vmul.f32 1.442695, %v567_v12 }
 0x41e   : > { %1177 = vpow2.f32 %v568_v13 }
 0x420   : > { %v1176_v14 = vpop.eup %1175 }
 0x421   : > { %v444_v15 = vsel %vm437_vm7, %v1176_v14, 0.0  ;;  %v693_v18 = vpop.xlane.xlu1 %692 }
 0x422   : > { %445 = vadd.xlane.f32.xlu1 %v444_v15  ;;  %v694_v19 = vsub.f32 %v690_v59, %v693_v18 }
 0x424   : > { %v695_v21 = vmul.f32 1.442695, %v694_v19 }
 0x426   : > { %1179 = vpow2.f32 %v695_v21 }
 0x428   : > { %v1178_v16 = vpop.eup %1177 }
 0x429   : > { %v570_v17 = vsel %vm437_vm7, %v1178_v16, 0.0  ;;  %v820_v20 = vpop.xlane.xlu0 %819 }
 0x42a   : > { %571 = vadd.xlane.f32.xlu0 %v570_v17  ;;  %v821_v22 = vsub.f32 %v817_v2, %v820_v20 }
 0x42c   : > { %v822_v23 = vmul.f32 1.442695, %v821_v22 }
 0x42e   : > { %1181 = vpow2.f32 %v822_v23 }
 0x430   : > { %v1180_v24 = vpop.eup %1179 }
 0x431   : > { %v697_v25 = vsel %vm437_vm7, %v1180_v24, 0.0 }
 0x433   : > { %576 = vrot.lane.b32.xlu1 %v1303_v30, %s1208_s27  ;;  %v1212_v30 = vmov 65535  }
 0x434   : > { %v458_v31 = vsel %vm456_vm8, 4294967295, %v1212_v30 }
 0x435   : > { %v459_v35 = vsel %vm457_vm9, %v458_v31, 0 }
 0x438   : > { %v1182_v26 = vpop.eup %1181 }
 0x439   : > { %v824_v27 = vsel %vm437_vm7, %v1182_v26, 0.0 }
 0x440   : > { %450 = vrot.lane.b32.xlu0 %v1306_v32, %s1209_s28 }
 0x444   : > { %703 = vrot.lane.b32.xlu0 %v1310_v33, %s1210_s29 }
 0x457   : > { %698 = vadd.xlane.f32.xlu1 %v697_v25 }
 0x45b   : > { %825 = vadd.xlane.f32.xlu1 %v824_v27 }
 0x46c   : > { %830 = vrot.lane.b32.xlu1 %v1314_v34, %s1211_s30 }
 0x4af   : > { %v446_v28 = vpop.xlane.xlu1 %445 }
 0x4b0   : > { %1183 = vrcp.f32 %v446_v28 }
 0x4b3   : > { %v577_v38 = vpop.permute.xlu1 %576 }
 0x4b4   : > { %v582_v34 = vand.u32 %v577_v38, %v459_v35 }
 0x4b7   : > { %v572_v29 = vpop.xlane.xlu0 %571 }
 0x4b8   : > { %1185 = vrcp.f32 %v572_v29 }
 0x4ba   : > { %v1184_v32 = vpop.eup %1183 }
 0x4bb   : > { %v448_v33 = vmul.f32 %v1184_v32, %v1176_v14  ;;  %v451_v36 = vpop.permute.xlu0 %450 }
 0x4bc   : > { %v461_v37 = vand.u32 %v459_v35, %v451_v36 }
 0x4bd   : > { %v449_v39 = vpack.c.bf16 %v448_v33, %v448_v33  ;;  %v961_v33 = vld [vmem:[%s273_s19] sm:$0x7] }
 0x4be   : > { %1091 = vmatpush3.bf16.msra.mxu0 %v461_v37 }
 0x4bf   : > { %1102 = vmatprep.subr.bf16.mxu0 %v1199_v9  ;;  %v704_v42 = vpop.permute.xlu0 %703 }
 0x4c0   : > { %v709_v44 = vand.u32 %v704_v42, %v459_v35 }
 0x4c1   : > { %1093 = vmatmul.mubr.msk.bf16.vlgmr.msra.gmra.mrb[4].mxu0 %vm452_vm10, %v449_v39 }
 0x4c2   : > { %v1186_v40 = vpop.eup %1185  ;;  %1103 = vmatpush3.bf16.msra.mxu0 %v582_v34  ;;  %1104 = vmatprep.mubr.msk.bf16.mxu0 %vm1200_vm1, %v1199_v9 }
 0x4c3   : > { %v574_v41 = vmul.f32 %v1186_v40, %v1178_v16  ;;  %1114 = vmatprep.subr.bf16.mxu0 %v1199_v9 }
 0x4c5   : > { %v575_v43 = vpack.c.bf16 %v574_v41, %v574_v41 }
 0x4c9   : > { %1105 = vmatmul.mubr.msk.bf16.vlgmr.msra.gmra.mrb[8].mxu0 %vm452_vm10, %v575_v43 }
 0x4ca   : > { %1115 = vmatpush3.bf16.msra.mxu0 %v709_v44  ;;  %1116 = vmatprep.mubr.msk.bf16.mxu0 %vm1200_vm1, %v1199_v9 }
 0x4cb   : > { %1126 = vmatprep.subr.bf16.mxu0 %v1199_v9 }
 0x4e4   : > { %v699_v45 = vpop.xlane.xlu1 %698 }
 0x4e5   : > { %1187 = vrcp.f32 %v699_v45 }
 0x4e8   : > { %v826_v46 = vpop.xlane.xlu1 %825 }
 0x4e9   : > { %1189 = vrcp.f32 %v826_v46 }
 0x4ec   : > { %v831_v49 = vpop.permute.xlu1 %830 }
 0x4ed   : > { %v836_v52 = vand.u32 %v831_v49, %v459_v35 }
 0x4ef   : > { %v1188_v47 = vpop.eup %1187 }
 0x4f0   : > { %v701_v48 = vmul.f32 %v1188_v47, %v1180_v24 }
 0x4f2   : > { %v702_v50 = vpack.c.bf16 %v701_v48, %v701_v48 }
 0x4f3   : > { %v1190_v51 = vpop.eup %1189 }
 0x4f4   : > { %1117 = vmatmul.mubr.msk.bf16.vlgmr.msra.gmra.mrb[12].mxu0 %vm452_vm10, %v702_v50  ;;  %v828_v53 = vmul.f32 %v1190_v51, %v1182_v26  ;;  %v1045_v26 = vld [vmem:[%s1394_s6] ss:$0 sm:$0xff] }
 0x4f5   : > { %1127 = vmatpush3.bf16.msra.mxu0 %v836_v52  ;;  %1128 = vmatprep.mubr.msk.bf16.mxu0 %vm1200_vm1, %v1199_v9  ;;  %vm885_vm1 = vcmask 256192  }
 0x4f6   : > { %v829_v54 = vpack.c.bf16 %v828_v53, %v828_v53  ;;  %vm886_vm3 = vmand %vm885_vm1, %vm378_vm4 }
 0x4fc   : > { %1129 = vmatmul.mubr.msk.bf16.vlgmr.msra.gmra.mrb[16].mxu0 %vm452_vm10, %v829_v54 }
 0x594   : > { %v497_v55 = vpop.f32.mrb[4].mxu0 }
 0x595   : > { %v503_v57 = vpack.c.bf16 %v497_v55, %v497_v55  ;;  %v1094_v58 = vpop.f32.mrb[5].mxu0 }
 0x596   : > { %v500_v59 = vpop.f32.mrb[6].mxu0 }
 0x597   : > { %v507_v60 = vsel %vm505_vm12, %v503_v57, %v506_v56  ;;  %v1095_v61 = vpop.f32.mrb[7].mxu0 }
 0x598   : > { %508 = vst [vmem:[#allocation3] sm:$0x7] %v507_v60 }
 0x59c   : > { %v618_v62 = vpop.f32.mrb[8].mxu0 }
 0x59d   : > { %v1051_v63 = vpack.c.bf16 %v618_v62, %v618_v62  ;;  %v1106_v0 = vpop.f32.mrb[9].mxu0 }
 0x59e   : > { %v621_v2 = vpop.f32.mrb[10].mxu0 }
 0x59f   : > { %628 = vrot.lane.b32.xlu0 %v1051_v63, %s1213_s8  ;;  %v1107_v3 = vpop.f32.mrb[11].mxu0  ;;  %v633_v17 = vld [vmem:[#allocation3] sm:$0x7] }
 0x5c7   : > { %v745_v4 = vpop.f32.mrb[12].mxu0 }
 0x5c8   : > { %v1052_v6 = vpack.c.bf16 %v745_v4, %v745_v4  ;;  %v1118_v7 = vpop.f32.mrb[13].mxu0 }
 0x5c9   : > { %v748_v8 = vpop.f32.mrb[14].mxu0 }
 0x5ca   : > { %755 = vrot.lane.b32.xlu1 %v1052_v6, %s1214_s13  ;;  %v1119_v11 = vpop.f32.mrb[15].mxu0 }
 0x5cf   : > { %v872_v12 = vpop.f32.mrb[16].mxu0 }
 0x5d0   : > { %v1053_v13 = vpack.c.bf16 %v872_v12, %v872_v12  ;;  %v1130_v14 = vpop.f32.mrb[17].mxu0 }
 0x5d1   : > { %v875_v15 = vpop.f32.mrb[18].mxu0 }
 0x5d2   : > { %882 = vrot.lane.b32.xlu0 %v1053_v13, %s1215_s14  ;;  %v1131_v16 = vpop.f32.mrb[19].mxu0 }
 0x611   : > { %v629_v18 = vpop.permute.xlu0 %628 }
 0x612   : > { %v634_v19 = vsel %vm632_vm14, %v629_v18, %v633_v17 }
 0x613   : > { %635 = vst [vmem:[#allocation3] sm:$0x7] %v634_v19 }
 0x61a   : > { %v760_v9 = vld [vmem:[#allocation3] sm:$0x7] }
 0x63c   : > { %v756_v20 = vpop.permute.xlu1 %755 }
 0x63d   : > { %v761_v21 = vsel %vm759_vm0, %v756_v20, %v760_v9 }
 0x63e   : > { %762 = vst [vmem:[#allocation3] sm:$0x7] %v761_v21 }
 0x644   : > { %v883_v22 = vpop.permute.xlu0 %882 }
 0x645   : > { %v887_v23 = vld [vmem:[#allocation3] sm:$0x7] }
 0x646   : > { %v888_v24 = vsel %vm886_vm3, %v883_v22, %v887_v23 }
 0x647   : > { %889 = vst [vmem:[#allocation3] sm:$0x7] %v888_v24 }
 0x64e   : > { %v890_v25 = vld [vmem:[#allocation3] sm:$0x7] }
 0x64f   : > { %1137 = vmatmul.mubr.msk.bf16.vlgmr.msra.gmra.mrb[16].mxu1 %vm332_vm2, %v890_v25  ;;  %vm960_vm2 = vmand %vm959_vm5, %vm378_vm4 }
 0x722   : > { %v951_v27 = vpop.f32.mrb[16].mxu1 }
 0x723   : > { %v952_v28 = vadd.f32 %v1045_v26, %v951_v27  ;;  %v1138_v29 = vpop.f32.mrb[17].mxu1 }
 0x724   : > { %v954_v30 = vpop.f32.mrb[18].mxu1 }
 0x725   : > { %v957_v31 = vadd.f32 %v952_v28, %v1272_v1  ;;  %v1139_v32 = vpop.f32.mrb[19].mxu1 }
 0x727   : > { %v958_v35 = vpack.c.bf16 %v957_v31, %v957_v31 }
 0x729   : > { %v962_v36 = vsel %vm960_vm2, %v958_v35, %v961_v33 }
 0x72a   : > { %963 = vst [vmem:[%s273_s19] sm:$0x7] %v962_v36 }
 0x72b PF: > { %s17_s24 = sadd.s32 1, %s1197_s24  }
 0x72c   : > { %p14_p4 = scmp.ge.s32.totalorder %s17_s24, 4  }
 0x72e   :  { %16 = sbr.rel (!%p14_p4) target bundleno = 1 (0x1), region = 78 }

// kernel: bird_classifier_forward.11
= control target key start
LH: loop header
LB: loop body
LE: loop exit
PB: predicated region body
PF: predicated region fallthrough
CT: control target
= control target key end

     0   :  { %s5260_s0 = inlined_call_operand.vmem [shape: bf16[2,32], index: 0, kind: input, shape index: {}]   ;;  %s5261_s1 = inlined_call_operand.vmem [shape: f32[2,16], index: 1, kind: input, shape index: {}]   ;;  %s5262_s2 = inlined_call_operand.vmem [shape: f32[1,32], index: 2, kind: input, shape index: {}]   ;;  %s5263_s3 = inlined_call_operand.vmem [shape: f32[1,32], index: 3, kind: input, shape index: {}]   ;;  %s5264_s4 = inlined_call_operand.vmem [shape: bf16[32,1024], index: 4, kind: input, shape index: {}]   ;;  %s5265_s5 = inlined_call_operand.vmem [shape: bf16[16,1024], index: 5, kind: input, shape index: {}]   ;;  %s5266_s6 = inlined_call_operand.vmem [shape: f32[1,1024], index: 6, kind: input, shape index: {}]   ;;  %s5267_s7 = inlined_call_operand.vmem [shape: f32[1,1024], index: 7, kind: input, shape index: {}]   ;;  %s5268_s8 = inlined_call_operand.vmem [shape: f32[1,1024], index: 8, kind: input, shape index: {}]   ;;  %s5269_s9 = inlined_call_operand.hbm [shape: bf16[1024,512], index: 9, kind: input, shape index: {}]   ;;  %s5270_s10 = inlined_call_operand.vmem [shape: f32[1,512], index: 10, kind: input, shape index: {}]   ;;  %s5271_s11 = inlined_call_operand.vmem [shape: f32[1,512], index: 11, kind: input, shape index: {}]   ;;  %s5272_s12 = inlined_call_operand.vmem [shape: f32[1,512], index: 12, kind: input, shape index: {}]   ;;  %s5273_s13 = inlined_call_operand.vmem [shape: bf16[512,256], index: 13, kind: input, shape index: {}]   ;;  %s5274_s14 = inlined_call_operand.vmem [shape: f32[1,256], index: 14, kind: input, shape index: {}]   ;;  %s5275_s15 = inlined_call_operand.vmem [shape: f32[1,256], index: 15, kind: input, shape index: {}]   ;;  %s5276_s16 = inlined_call_operand.vmem [shape: f32[1,256], index: 16, kind: input, shape index: {}]   ;;  %s5277_s17 = inlined_call_operand.vmem [shape: bf16[256,128], index: 17, kind: input, shape index: {}]   ;;  %s5278_s18 = inlined_call_operand.vmem [shape: f32[1,128], index: 18, kind: input, shape index: {}]   ;;  %s5279_s19 = inlined_call_operand.hbm [shape: f32[2,128], index: 19, kind: output, shape index: {}]  }
   0x1   :  { %5280 = sst [smem:[#allocation8_spill]] %s5260_s0 }
   0x2   :  { %5281 = sst [smem:[#allocation9_spill]] %s5261_s1 }
   0x3   :  { %5282 = sst [smem:[#allocation10_spill]] %s5262_s2 }
   0x4   :  { %5283 = sst [smem:[#allocation11_spill]] %s5263_s3 }
   0x5   :  { %24 = vsyncpa [#allocation3], 0 }
   0x6   :  { %25 = vsyncpa [#allocation4], 0  ;;  %s4523_s0 = smov [#allocation2]   ;;  %s4475_s1 = scalar_lea.hbm %s5269_s9, 32768 }
   0x7   :  { %s49_s30 = sshll.u32 %s4523_s0, 4  ;;  %p4476_p0 = scmp.ne.s32.totalorder %s5269_s9, %s4475_s1  ;;  %s50_s30 = int_to_ptr.vmem [resolvable:$true] %s49_s30 }
   0x8   :  { %p4479_p1 = scmp.lt.u32.totalorder %s4475_s1, %s5269_s9 }
   0xa   :  { %p4481_p2 = pnand %p4479_p1, %p4476_p0 }
   0xc   :  { %4484 = shalt.err (!%p4481_p2)
}
   0xd   :  { %s4485_s25 = scalar_lea.vmem %s50_s30, 32768  ;;  %p4490_p4 = scmp.lt.s32.totalorder %s50_s30, %s50_s30 }
   0xe   :  { %p4486_p3 = scmp.ne.s32.totalorder %s50_s30, %s4485_s25  ;;  %p4491_p5 = scmp.lt.s32.totalorder %s4485_s25, %s4485_s25 }
  0x10   :  { %p4492_p6 = por %p4491_p5, %p4490_p4 }
  0x12   :  { %p4493_p7 = pnand %p4492_p6, %p4486_p3 }
  0x14   :  { %4496 = shalt.err (!%p4493_p7)
}
  0x15   :  { %s4524_s3 = smov 256   ;;  %s4525_s26 = smov 16  }
  0x16   :  { %55 = dma.hbm_to_vmem [thread:$0]  %s5269_s9, 32768, %s50_s30, [#allocation3], %s4524_s3, %s4524_s3, %s4525_s26  }
  0x17   :  { %4519 = dma.done.wait [#allocation3], 32768  }
  0x18   :  { %4520 = vsyncadd [#allocation3], 4294934528  ;;  %s5284_s20 = sld [smem:[#allocation8_spill]]  ;;  %vm82_vm0 = vcmask 254976   ;;  %v130_v3 = vld [vmem:[%s5265_s5] sm:$0xff]  ;;  %s5285_s23 = sld [smem:[#allocation9_spill]] }
  0x19   :  { %v134_v4 = vld [vmem:[%s5265_s5 + $0x20] sm:$0xff]  ;;  %v4526_v8 = vmov 0   ;;  %v131_v9 = vld [vmem:[%s5265_s5 + $0x8] sm:$0xff]  ;;  %vm178_vm1 = vcmask 130048   ;;  %v132_v19 = vld [vmem:[%s5265_s5 + $0x10] sm:$0xff]  ;;  %s5286_s25 = sld [smem:[#allocation10_spill]] }
  0x1a   :  { %v3522_v6 = vcombine.high %v130_v3, %v134_v4  ;;  %v3521_v7 = vcombine.low %v130_v3, %v134_v4  ;;  %214 = vmatprep.mubr.bf16.mxu0 %v4526_v8  ;;  %v135_v10 = vld [vmem:[%s5265_s5 + $0x28] sm:$0xff]  ;;  %337 = vmatprep.mubr.bf16.mxu1 %v4526_v8  ;;  %v136_v20 = vld [vmem:[%s5265_s5 + $0x30] sm:$0xff]  ;;  %v133_v23 = vld [vmem:[%s5265_s5 + $0x18] sm:$0xff]  ;;  %s5287_s26 = sld [smem:[#allocation11_spill]]  ;;  %vm426_vm2 = vcmask 261120  }
  0x1b   :  { %v3524_v11 = vcombine.high %v131_v9, %v135_v10  ;;  %v3523_v13 = vcombine.low %v131_v9, %v135_v10  ;;  %v3526_v21 = vcombine.high %v132_v19, %v136_v20  ;;  %v3525_v22 = vcombine.low %v132_v19, %v136_v20  ;;  %v137_v24 = vld [vmem:[%s5265_s5 + $0x38] sm:$0xff]  ;;  %v113_v27 = vld [vmem:[%s5264_s4] sm:$0xff]  ;;  %v114_v43 = vld [vmem:[%s5264_s4 + $0x8] sm:$0xff] }
  0x1c   :  { %182 = vmatprep.subr.bf16.mxu0 %v3522_v6  ;;  %v3528_v25 = vcombine.high %v133_v23, %v137_v24  ;;  %v3527_v26 = vcombine.low %v133_v23, %v137_v24  ;;  %v117_v28 = vld [vmem:[%s5264_s4 + $0x20] sm:$0xff]  ;;  %v116_v29 = vld [vmem:[%s5264_s4 + $0x18] sm:$0xff]  ;;  %v118_v44 = vld [vmem:[%s5264_s4 + $0x28] sm:$0xff] }
  0x1d   :  { %183 = vmatpush1.bf16.msra.mxu0 %v3521_v7  ;;  %v3534_v30 = vcombine.high %v113_v27, %v117_v28  ;;  %v120_v31 = vld [vmem:[%s5264_s4 + $0x38] sm:$0xff]  ;;  %v3533_v32 = vcombine.low %v113_v27, %v117_v28  ;;  %v121_v35 = vld [vmem:[%s5264_s4 + $0x40] sm:$0xff]  ;;  %v3536_v45 = vcombine.high %v114_v43, %v118_v44  ;;  %v3535_v46 = vcombine.low %v114_v43, %v118_v44  ;;  %v115_v6 = vld [vmem:[%s5264_s4 + $0x10] sm:$0xff] }
  0x1e   :  { %v78_v0 = vld [vmem:[%s5284_s20] sm:$0x1]  ;;  %223 = vmatprep.subr.bf16.mxu0 %v3524_v11  ;;  %305 = vmatprep.subr.bf16.mxu1 %v3528_v25  ;;  %v3539_v33 = vcombine.low %v116_v29, %v120_v31  ;;  %v3540_v34 = vcombine.high %v116_v29, %v120_v31  ;;  %v124_v37 = vld [vmem:[%s5264_s4 + $0x58] sm:$0xff]  ;;  %v3951_v47 = vld [vmem:[#allocation2 + $0x4] ss:$16 sps:$4 sm:$0xff]  }
  0x1f   :  { %v79_v1 = vunpack.c.l.bf16 %v78_v0  ;;  %v111_v5 = vld [vmem:[%s5285_s23] sm:$0x3]  ;;  %306 = vmatpush1.bf16.msra.mxu1 %v3527_v26  ;;  %v128_v40 = vld [vmem:[%s5264_s4 + $0x78] sm:$0xff]  ;;  %v122_v0 = vld [vmem:[%s5264_s4 + $0x48] sm:$0xff] }
  0x20   :  { %v129_v12 = vpack.c.bf16 %v111_v5, %v111_v5  ;;  %553 = vmatprep.subr.bf16.mxu1 %v3540_v34  ;;  %v125_v36 = vld [vmem:[%s5264_s4 + $0x60] sm:$0xff]  ;;  %v3547_v41 = vcombine.low %v124_v37, %v128_v40  ;;  %v3548_v42 = vcombine.high %v124_v37, %v128_v40  ;;  %v119_v7 = vld [vmem:[%s5264_s4 + $0x30] sm:$0xff] }
  0x21   :  { %v83_v2 = vsel %vm82_vm0, %v79_v1, 0.0  ;;  %v3541_v38 = vcombine.low %v121_v35, %v125_v36  ;;  %v3542_v39 = vcombine.high %v121_v35, %v125_v36  ;;  %v3519_v60 = vld [vmem:[%s5286_s25] ss:$0 sm:$0xff]  ;;  %v3954_v9 = vld [vmem:[#allocation2 + $0x24] ss:$16 sps:$4 sm:$0xff]   ;;  %v3538_v11 = vcombine.high %v115_v6, %v119_v7 }
  0x22   :  { %84 = vadd.xlane.f32.xlu0 %v83_v2  ;;  %3529 = vmatmul.mubr.msk.bf16.vlgmr.msra.gmra.mrb[0].mxu0 %vm178_vm1, %v129_v12  ;;  %v3520_v62 = vld [vmem:[%s5287_s26] ss:$0 sm:$0xff]  ;;  %v3963_v19 = vld [vmem:[#allocation2 + $0x64] ss:$16 sps:$4 sm:$0xff]  }
  0x23   :  { %224 = vmatpush1.bf16.msra.mxu0 %v3523_v13  ;;  %255 = vmatprep.mubr.bf16.mxu0 %v4526_v8  ;;  %v3949_v5 = vld [vmem:[#allocation2] ss:$16 sps:$4 sm:$0xff]   ;;  %v3969_v23 = vld [vmem:[#allocation2 + $0x84] ss:$16 sps:$4 sm:$0xff]  }
  0x24   :  { %264 = vmatprep.subr.bf16.mxu0 %v3526_v21  ;;  %3532 = vmatmul.mubr.msk.bf16.vlgmr.msra.gmra.mrb[0].mxu1 %vm178_vm1, %v129_v12  ;;  %v123_v13 = vld [vmem:[%s5264_s4 + $0x50] sm:$0xff] }
  0x25   :  { %554 = vmatpush1.bf16.msra.mxu1 %v3539_v33  ;;  %585 = vmatprep.mubr.bf16.mxu1 %v4526_v8  ;;  %v3960_v21 = vld [vmem:[#allocation2 + $0x204] ss:$16 sps:$4 sm:$0xff]   ;;  %v3958_v24 = vld [vmem:[#allocation2 + $0x200] ss:$16 sps:$4 sm:$0xff]  }
  0x26   :  { %555 = vmatprep.subr.bf16.mxu1 %v3548_v42  ;;  %v3966_v25 = vld [vmem:[#allocation2 + $0x224] ss:$16 sps:$4 sm:$0xff]   ;;  %v3967_v26 = vld [vmem:[#allocation2 + $0x80] ss:$16 sps:$4 sm:$0xff]  }
  0x27   :  { %v3975_v27 = vld [vmem:[#allocation2 + $0xa4] ss:$16 sps:$4 sm:$0xff]   ;;  %v3964_v28 = vld [vmem:[#allocation2 + $0x220] ss:$16 sps:$4 sm:$0xff]  }
  0x28   :  { %v3973_v29 = vld [vmem:[#allocation2 + $0xa0] ss:$16 sps:$4 sm:$0xff]   ;;  %v3984_v35 = vld [vmem:[#allocation2 + $0x284] ss:$16 sps:$4 sm:$0xff]  }
  0x29   :  { %556 = vmatpush1.bf16.msra.mxu1 %v3547_v41  ;;  %v3970_v31 = vld [vmem:[#allocation2 + $0x240] ss:$16 sps:$4 sm:$0xff]  }
  0x2a   :  { %3530 = vmatmul.mubr.msk.bf16.vlgmr.msra.gmra.mrb[4].mxu0 %vm178_vm1, %v129_v12  ;;  %2382 = vmatprep.subr.bf16.mxu1 %v3951_v47  ;;  %v3979_v33 = vld [vmem:[#allocation2 + $0xc0] ss:$16 sps:$4 sm:$0xff]  }
  0x2b   :  { %296 = vmatprep.mubr.bf16.mxu0 %v4526_v8  ;;  %265 = vmatpush1.bf16.msra.mxu0 %v3525_v22  ;;  %v3961_v22 = vld [vmem:[#allocation2 + $0x60] ss:$16 sps:$4 sm:$0xff]  }
  0x2c   :  { %430 = vmatprep.subr.bf16.mxu0 %v3534_v30  ;;  %v3981_v30 = vld [vmem:[#allocation2 + $0xc4] ss:$16 sps:$4 sm:$0xff]   ;;  %v3976_v34 = vld [vmem:[#allocation2 + $0x260] ss:$16 sps:$4 sm:$0xff]  }
  0x2d   :  { %v3982_v36 = vld [vmem:[#allocation2 + $0x280] ss:$16 sps:$4 sm:$0xff]  }
  0x32   :  { %3531 = vmatmul.mubr.msk.bf16.vlgmr.msra.gmra.mrb[8].mxu0 %vm178_vm1, %v129_v12  ;;  %v3952_v12 = vld [vmem:[#allocation2 + $0x20] ss:$16 sps:$4 sm:$0xff]  }
  0x33   :  { %462 = vmatprep.mubr.bf16.mxu0 %v4526_v8  ;;  %431 = vmatpush1.bf16.msra.mxu0 %v3533_v32  ;;  %v3978_v32 = vld [vmem:[#allocation2 + $0x264] ss:$16 sps:$4 sm:$0xff]  }
  0x34   :  { %432 = vmatprep.subr.bf16.mxu0 %v3542_v39 }
  0x37   :  { %433 = vmatpush1.bf16.msra.mxu0 %v3541_v38 }
  0x38   :  { %471 = vmatprep.subr.bf16.mxu0 %v3536_v45  ;;  %v596_v45 = vlaneseq }
  0xaf   :  { %v85_v14 = vpop.xlane.xlu0 %84 }
  0xb0   :  { %v87_v15 = vmul.f32 0.03125, %v85_v14  ;;  %v127_v14 = vld [vmem:[%s5264_s4 + $0x70] sm:$0xff] }
  0xb1   :  { %v3545_v20 = vcombine.low %v123_v13, %v127_v14 }
  0xb2   :  { %v4665_v16 = vsub.f32 %v79_v1, %v87_v15  ;;  %v126_v1 = vld [vmem:[%s5264_s4 + $0x68] sm:$0xff]  ;;  %v3957_v15 = vld [vmem:[#allocation2 + $0x44] ss:$16 sps:$4 sm:$0xff]  }
  0xb3   :  { %v3544_v4 = vcombine.high %v122_v0, %v126_v1  ;;  %v3543_v10 = vcombine.low %v122_v0, %v126_v1  ;;  %v4790_v0 = vld [vmem:[%s5268_s8] sm:$0xff] }
  0xb4   :  { %v89_v17 = vmul.f32 %v4665_v16, %v4665_v16 }
  0xb6   :  { %v90_v18 = vsel %vm82_vm0, %v89_v17, 0.0  ;;  %v3546_v17 = vcombine.high %v123_v13, %v127_v14  ;;  %v4003_v13 = vld [vmem:[#allocation2 + $0x140] ss:$16 sps:$4 sm:$0xff]  }
  0xb7   :  { %91 = vadd.xlane.f32.xlu0 %v90_v18  ;;  %v3955_v18 = vld [vmem:[#allocation2 + $0x40] ss:$16 sps:$4 sm:$0xff]  }
  0xb8   :  { %v4006_v14 = vld [vmem:[#allocation2 + $0x300] ss:$16 sps:$4 sm:$0xff]  }
  0xf5   :  { %v4716_v48 = vpop.f32.mrb[0].mxu0 }
  0xf6   :  { %v4718_v49 = vpop.f32.mrb[1].mxu0 }
  0xf7   :  { %v220_v50 = vpop.f32.mrb[2].mxu0  ;;  %v4759_v41 = vpop.f32.mrb[0].mxu1 }
  0xf8   :  { %v221_v51 = vpop.f32.mrb[3].mxu0  ;;  %v4761_v42 = vpop.f32.mrb[1].mxu1  ;;  %v3987_v50 = vld [vmem:[#allocation2 + $0xe4] ss:$16 sps:$4 sm:$0xff]  }
  0xf9   :  { %v343_v43 = vpop.f32.mrb[2].mxu1  ;;  %v3990_v51 = vld [vmem:[#allocation2 + $0x2a4] ss:$16 sps:$4 sm:$0xff]  }
  0xfa   :  { %v344_v44 = vpop.f32.mrb[3].mxu1  ;;  %v4044_v43 = vld [vmem:[#allocation2 + $0xc] ss:$16 sps:$4 sm:$0xff]  }
  0xfb   :  { %v4039_v44 = vld [vmem:[#allocation2 + $0x3c0] ss:$16 sps:$4 sm:$0xff]  }
  0xfd   :  { %v4720_v52 = vpop.f32.mrb[4].mxu0 }
  0xfe   :  { %v4722_v53 = vpop.f32.mrb[5].mxu0 }
  0xff   :  { %v261_v54 = vpop.f32.mrb[6].mxu0 }
 0x100   :  { %v262_v55 = vpop.f32.mrb[7].mxu0  ;;  %v4771_v54 = vld [vmem:[%s5266_s6] sm:$0xff] }
 0x105   :  { %v4755_v37 = vpop.f32.mrb[8].mxu0 }
 0x106   :  { %v4757_v38 = vpop.f32.mrb[9].mxu0 }
 0x107   :  { %v302_v39 = vpop.f32.mrb[10].mxu0 }
 0x108   :  { %v303_v40 = vpop.f32.mrb[11].mxu0  ;;  %v4036_v39 = vld [vmem:[#allocation2 + $0x3a0] ss:$16 sps:$4 sm:$0xff]  }
 0x109   :  { %v4041_v40 = vld [vmem:[#allocation2 + $0x3c4] ss:$16 sps:$4 sm:$0xff]  }
 0x144   :  { %v92_v56 = vpop.xlane.xlu0 %91 }
 0x145   :  { %v93_v57 = vmul.f32 0.03125, %v92_v56  ;;  %v3985_v56 = vld [vmem:[#allocation2 + $0xe0] ss:$16 sps:$4 sm:$0xff]  }
 0x147   :  { %v94_v58 = vadd.f32 1e-12, %v93_v57 }
 0x149   :  { %4445 = vrsqrt.f32 %v94_v58  ;;  %v3988_v58 = vld [vmem:[#allocation2 + $0x2a0] ss:$16 sps:$4 sm:$0xff]  }
 0x153   :  { %v4446_v59 = vpop.eup %4445 }
 0x154   :  { %v96_v61 = vmul.f32 %v4446_v59, %v4665_v16  ;;  %v3537_v16 = vcombine.low %v115_v6, %v119_v7  ;;  %v4781_v59 = vld [vmem:[%s5267_s7] sm:$0xff] }
 0x155   :  { %v3999_v6 = vld [vmem:[#allocation2 + $0x124] ss:$16 sps:$4 sm:$0xff]  }
 0x156   :  { %v103_v63 = vmul.f32 %v3519_v60, %v96_v61  ;;  %v4002_v7 = vld [vmem:[#allocation2 + $0x2e4] ss:$16 sps:$4 sm:$0xff]  }
 0x158   :  { %v110_v2 = vadd.f32 %v3520_v62, %v103_v63  ;;  %v3993_v62 = vld [vmem:[#allocation2 + $0x104] ss:$16 sps:$4 sm:$0xff]  }
 0x159   :  { %v3996_v63 = vld [vmem:[#allocation2 + $0x2c4] ss:$16 sps:$4 sm:$0xff]  }
 0x15a   :  { %v112_v3 = vpack.c.bf16 %v110_v2, %v110_v2  ;;  %v3991_v2 = vld [vmem:[#allocation2 + $0x100] ss:$16 sps:$4 sm:$0xff]  }
 0x15c   :  { %3549 = vmatmul.mubr.msk.bf16.vlgmr.msra.gmra.mrb[12].mxu0 %vm426_vm2, %v112_v3  ;;  %3552 = vmatmul.mubr.msk.bf16.vlgmr.msra.gmra.mrb[4].mxu1 %vm426_vm2, %v112_v3 }
 0x15d   :  { %472 = vmatpush1.bf16.msra.mxu0 %v3535_v46  ;;  %503 = vmatprep.mubr.bf16.mxu0 %v4526_v8  ;;  %v4763_v46 = vshrl.u32 %v596_v45, 7  ;;  %v4045_v45 = vld [vmem:[#allocation2 + $0x3e0] ss:$16 sps:$4 sm:$0xff]  }
 0x15e   :  { %473 = vmatprep.subr.bf16.mxu0 %v3544_v4  ;;  %2383 = vmatpush1.bf16.msra.mxu1 %v3949_v5 }
 0x15f   :  { %2384 = vmatprep.subr.bf16.mxu1 %v3954_v9  ;;  %v4766_v47 = vsub.s32 6, %v4763_v46  ;;  %v4774_v55 = vsub.s32 7, %v4763_v46  ;;  %v3997_v9 = vld [vmem:[#allocation2 + $0x120] ss:$16 sps:$4 sm:$0xff]  }
 0x161   :  { %474 = vmatpush1.bf16.msra.mxu0 %v3543_v10  ;;  %v623_v57 = vrot.slane %v4771_v54, %v4766_v47  ;;  %v627_v60 = vrot.slane %v4771_v54, %v4774_v55  ;;  %v673_v61 = vrot.slane %v4781_v59, %v4766_v47  ;;  %v677_v1 = vrot.slane %v4781_v59, %v4774_v55  ;;  %v4000_v10 = vld [vmem:[#allocation2 + $0x2e0] ss:$16 sps:$4 sm:$0xff]  }
 0x162   :  { %512 = vmatprep.subr.bf16.mxu0 %v3538_v11  ;;  %2385 = vmatpush1.bf16.msra.mxu1 %v3952_v12  ;;  %v723_v4 = vrot.slane %v4790_v0, %v4766_v47  ;;  %v727_v5 = vrot.slane %v4790_v0, %v4774_v55  ;;  %v4005_v11 = vld [vmem:[#allocation2 + $0x144] ss:$16 sps:$4 sm:$0xff]  }
 0x163   :  { %2386 = vmatprep.subr.bf16.mxu1 %v3957_v15  ;;  %v4008_v12 = vld [vmem:[#allocation2 + $0x304] ss:$16 sps:$4 sm:$0xff]   ;;  %v4799_v15 = vsub.s32 4, %v4763_v46 }
 0x164   :  { %3550 = vmatmul.mubr.msk.bf16.vlgmr.msra.gmra.mrb[16].mxu0 %vm426_vm2, %v112_v3 }
 0x165   :  { %513 = vmatpush1.bf16.msra.mxu0 %v3537_v16  ;;  %544 = vmatprep.mubr.bf16.mxu0 %v4526_v8  ;;  %v3972_v8 = vld [vmem:[#allocation2 + $0x244] ss:$16 sps:$4 sm:$0xff]  }
 0x166   :  { %514 = vmatprep.subr.bf16.mxu0 %v3546_v17  ;;  %2387 = vmatpush1.bf16.msra.mxu1 %v3955_v18  ;;  %v4011_v16 = vld [vmem:[#allocation2 + $0x164] ss:$16 sps:$4 sm:$0xff]   ;;  %v4009_v18 = vld [vmem:[#allocation2 + $0x160] ss:$16 sps:$4 sm:$0xff]  }
 0x167   :  { %2388 = vmatprep.subr.bf16.mxu1 %v3963_v19  ;;  %v4014_v17 = vld [vmem:[#allocation2 + $0x324] ss:$16 sps:$4 sm:$0xff]   ;;  %v4012_v19 = vld [vmem:[#allocation2 + $0x320] ss:$16 sps:$4 sm:$0xff]  }
 0x169   :  { %515 = vmatpush1.bf16.msra.mxu0 %v3545_v20  ;;  %v615_v20 = vrot.slane %v4771_v54, %v4799_v15 }
 0x16a   :  { %2423 = vmatprep.subr.bf16.mxu0 %v3960_v21  ;;  %2389 = vmatpush1.bf16.msra.mxu1 %v3961_v22  ;;  %v665_v21 = vrot.slane %v4781_v59, %v4799_v15  ;;  %v4017_v22 = vld [vmem:[#allocation2 + $0x184] ss:$16 sps:$4 sm:$0xff]  }
 0x16b   :  { %2390 = vmatprep.subr.bf16.mxu1 %v3969_v23  ;;  %v4020_v23 = vld [vmem:[#allocation2 + $0x344] ss:$16 sps:$4 sm:$0xff]  }
 0x16c   :  { %3551 = vmatmul.mubr.msk.bf16.vlgmr.msra.gmra.mrb[20].mxu0 %vm426_vm2, %v112_v3  ;;  %v3994_v3 = vld [vmem:[#allocation2 + $0x2c0] ss:$16 sps:$4 sm:$0xff]  }
 0x16d   :  { %2424 = vmatpush1.bf16.msra.mxu0 %v3958_v24  ;;  %v4015_v24 = vld [vmem:[#allocation2 + $0x180] ss:$16 sps:$4 sm:$0xff]  }
 0x16e   :  { %2425 = vmatprep.subr.bf16.mxu0 %v3966_v25  ;;  %2391 = vmatpush1.bf16.msra.mxu1 %v3967_v26  ;;  %v4018_v25 = vld [vmem:[#allocation2 + $0x340] ss:$16 sps:$4 sm:$0xff]   ;;  %v715_v26 = vrot.slane %v4790_v0, %v4799_v15 }
 0x16f   :  { %2392 = vmatprep.subr.bf16.mxu1 %v3975_v27  ;;  %v4023_v27 = vld [vmem:[#allocation2 + $0x1a4] ss:$16 sps:$4 sm:$0xff]  }
 0x171   :  { %2426 = vmatpush1.bf16.msra.mxu0 %v3964_v28  ;;  %v4026_v28 = vld [vmem:[#allocation2 + $0x364] ss:$16 sps:$4 sm:$0xff]  }
 0x172   :  { %2427 = vmatprep.subr.bf16.mxu0 %v3972_v8  ;;  %2393 = vmatpush1.bf16.msra.mxu1 %v3973_v29  ;;  %v4021_v8 = vld [vmem:[#allocation2 + $0x1a0] ss:$16 sps:$4 sm:$0xff]  }
 0x173   :  { %2394 = vmatprep.subr.bf16.mxu1 %v3981_v30  ;;  %v4024_v29 = vld [vmem:[#allocation2 + $0x360] ss:$16 sps:$4 sm:$0xff]   ;;  %v4029_v30 = vld [vmem:[#allocation2 + $0x1c4] ss:$16 sps:$4 sm:$0xff]  }
 0x175   :  { %2428 = vmatpush1.bf16.msra.mxu0 %v3970_v31  ;;  %v4027_v31 = vld [vmem:[#allocation2 + $0x1c0] ss:$16 sps:$4 sm:$0xff]  }
 0x176   :  { %2429 = vmatprep.subr.bf16.mxu0 %v3978_v32  ;;  %2395 = vmatpush1.bf16.msra.mxu1 %v3979_v33  ;;  %v4032_v32 = vld [vmem:[#allocation2 + $0x384] ss:$16 sps:$4 sm:$0xff]   ;;  %v4030_v33 = vld [vmem:[#allocation2 + $0x380] ss:$16 sps:$4 sm:$0xff]  }
 0x177   :  { %2396 = vmatprep.subr.bf16.mxu1 %v3987_v50  ;;  %v4047_v50 = vld [vmem:[#allocation2 + $0x3e4] ss:$16 sps:$4 sm:$0xff]  }
 0x179   :  { %2430 = vmatpush1.bf16.msra.mxu0 %v3976_v34  ;;  %v4035_v34 = vld [vmem:[#allocation2 + $0x1e4] ss:$16 sps:$4 sm:$0xff]  }
 0x17a   :  { %2431 = vmatprep.subr.bf16.mxu0 %v3984_v35  ;;  %2397 = vmatpush1.bf16.msra.mxu1 %v3985_v56  ;;  %v4038_v35 = vld [vmem:[#allocation2 + $0x3a4] ss:$16 sps:$4 sm:$0xff]   ;;  %v4808_v56 = vsub.s32 0, %v4763_v46 }
 0x17b   :  { %2398 = vmatprep.subr.bf16.mxu1 %v3993_v62 }
 0x17c   :  { %v599_v62 = vrot.slane %v4771_v54, %v4808_v56 }
 0x17d   :  { %2432 = vmatpush1.bf16.msra.mxu0 %v3982_v36  ;;  %v4033_v36 = vld [vmem:[#allocation2 + $0x1e0] ss:$16 sps:$4 sm:$0xff]  }
 0x17e   :  { %2433 = vmatprep.subr.bf16.mxu0 %v3990_v51  ;;  %2399 = vmatpush1.bf16.msra.mxu1 %v3991_v2  ;;  %v4053_v51 = vld [vmem:[#allocation2 + $0x404] ss:$16 sps:$4 sm:$0xff]  }
 0x17f   :  { %2400 = vmatprep.subr.bf16.mxu1 %v3999_v6 }
 0x181   :  { %2434 = vmatpush1.bf16.msra.mxu0 %v3988_v58  ;;  %v4811_v58 = vsub.s32 1, %v4763_v46 }
 0x182   :  { %2435 = vmatprep.subr.bf16.mxu0 %v3996_v63  ;;  %2401 = vmatpush1.bf16.msra.mxu1 %v3997_v9 }
 0x183   :  { %2402 = vmatprep.subr.bf16.mxu1 %v4005_v11 }
 0x185   :  { %2436 = vmatpush1.bf16.msra.mxu0 %v3994_v3  ;;  %v603_v3 = vrot.slane %v4771_v54, %v4811_v58 }
 0x186   :  { %2437 = vmatprep.subr.bf16.mxu0 %v4002_v7  ;;  %2403 = vmatpush1.bf16.msra.mxu1 %v4003_v13  ;;  %v649_v7 = vrot.slane %v4781_v59, %v4808_v56  ;;  %v653_v13 = vrot.slane %v4781_v59, %v4811_v58 }
 0x187   :  { %2404 = vmatprep.subr.bf16.mxu1 %v4011_v16 }
 0x189   :  { %2438 = vmatpush1.bf16.msra.mxu0 %v4000_v10 }
 0x18a   :  { %2439 = vmatprep.subr.bf16.mxu0 %v4008_v12  ;;  %2405 = vmatpush1.bf16.msra.mxu1 %v4009_v18 }
 0x18b   :  { %2406 = vmatprep.subr.bf16.mxu1 %v4017_v22 }
 0x18d   :  { %2440 = vmatpush1.bf16.msra.mxu0 %v4006_v14 }
 0x18e   :  { %2441 = vmatprep.subr.bf16.mxu0 %v4014_v17  ;;  %2407 = vmatpush1.bf16.msra.mxu1 %v4015_v24  ;;  %v703_v24 = vrot.slane %v4790_v0, %v4811_v58 }
 0x18f   :  { %2408 = vmatprep.subr.bf16.mxu1 %v4023_v27 }
 0x191   :  { %2442 = vmatpush1.bf16.msra.mxu0 %v4012_v19 }
 0x192   :  { %2443 = vmatprep.subr.bf16.mxu0 %v4020_v23  ;;  %2409 = vmatpush1.bf16.msra.mxu1 %v4021_v8  ;;  %v4831_v23 = vsub.s32 2, %v4763_v46 }
 0x193   :  { %2410 = vmatprep.subr.bf16.mxu1 %v4029_v30 }
 0x195   :  { %2444 = vmatpush1.bf16.msra.mxu0 %v4018_v25  ;;  %v4839_v25 = vsub.s32 3, %v4763_v46 }
 0x196   :  { %2445 = vmatprep.subr.bf16.mxu0 %v4026_v28  ;;  %2411 = vmatpush1.bf16.msra.mxu1 %v4027_v31 }
 0x197   :  { %2412 = vmatprep.subr.bf16.mxu1 %v4035_v34 }
 0x199   :  { %2446 = vmatpush1.bf16.msra.mxu0 %v4024_v29 }
 0x19a   :  { %2447 = vmatprep.subr.bf16.mxu0 %v4032_v32  ;;  %2413 = vmatpush1.bf16.msra.mxu1 %v4033_v36  ;;  %v661_v36 = vrot.slane %v4781_v59, %v4839_v25 }
 0x19b   :  { %2546 = vmatprep.subr.bf16.mxu1 %v4044_v43 }
 0x19d   :  { %2448 = vmatpush1.bf16.msra.mxu0 %v4030_v33 }
 0x19e   :  { %2449 = vmatprep.subr.bf16.mxu0 %v4038_v35 }
 0x1a1   :  { %2450 = vmatpush1.bf16.msra.mxu0 %v4036_v39 }
 0x1a2   :  { %2451 = vmatprep.subr.bf16.mxu0 %v4041_v40  ;;  %v707_v40 = vrot.slane %v4790_v0, %v4831_v23 }
 0x1a5   :  { %2452 = vmatpush1.bf16.msra.mxu0 %v4039_v44 }
 0x1a6   :  { %2453 = vmatprep.subr.bf16.mxu0 %v4047_v50  ;;  %v618_v50 = vsub.s32 5, %v4763_v46 }
 0x1a9   :  { %2454 = vmatpush1.bf16.msra.mxu0 %v4045_v45  ;;  %v711_v45 = vrot.slane %v4790_v0, %v4839_v25 }
 0x1aa   :  { %2464 = vmatprep.subr.bf16.mxu0 %v4053_v51 }
 0x22f   :  { %v464_v63 = vpop.f32.mrb[12].mxu0  ;;  %v587_v2 = vpop.f32.mrb[4].mxu1 }
 0x230   :  { %v465_v6 = vadd.f32 %v464_v63, %v4716_v48  ;;  %v588_v9 = vadd.f32 %v587_v2, %v4759_v41  ;;  %v466_v10 = vpop.f32.mrb[13].mxu0  ;;  %v589_v11 = vpop.f32.mrb[5].mxu1  ;;  %v699_v48 = vrot.slane %v4790_v0, %v4808_v56 }
 0x231   :  { %v467_v12 = vadd.f32 %v466_v10, %v4718_v49  ;;  %v590_v14 = vadd.f32 %v589_v11, %v4761_v42  ;;  %v468_v16 = vpop.f32.mrb[14].mxu0  ;;  %v591_v17 = vpop.f32.mrb[6].mxu1  ;;  %v619_v10 = vrot.slane %v4771_v54, %v618_v50 }
 0x232   :  { %v636_v18 = vadd.f32 %v599_v62, %v465_v6  ;;  %v642_v19 = vadd.f32 %v623_v57, %v588_v9  ;;  %v469_v41 = vpop.f32.mrb[15].mxu0  ;;  %v592_v22 = vpop.f32.mrb[7].mxu1  ;;  %v669_v17 = vrot.slane %v4781_v59, %v618_v50 }
 0x233   :  { %v637_v49 = vadd.f32 %v603_v3, %v467_v12  ;;  %v643_v42 = vadd.f32 %v627_v60, %v590_v14  ;;  %v607_v60 = vrot.slane %v4771_v54, %v4831_v23 }
 0x234   :  { %v686_v27 = vmul.f32 %v649_v7, %v636_v18  ;;  %v692_v57 = vmul.f32 %v673_v61, %v642_v19 }
 0x235   :  { %v687_v28 = vmul.f32 %v653_v13, %v637_v49  ;;  %v693_v8 = vmul.f32 %v677_v1, %v643_v42  ;;  %v611_v1 = vrot.slane %v4771_v54, %v4839_v25  ;;  %v719_v42 = vrot.slane %v4790_v0, %v618_v50 }
 0x236   :  { %v4847_v29 = vadd.f32 %v699_v48, %v686_v27  ;;  %v4852_v30 = vadd.f32 %v723_v4, %v692_v57  ;;  %v657_v4 = vrot.slane %v4781_v59, %v4831_v23 }
 0x237   :  { %v4856_v31 = vadd.f32 %v703_v24, %v687_v28  ;;  %v4861_v61 = vadd.f32 %v727_v5, %v693_v8  ;;  %v505_v32 = vpop.f32.mrb[16].mxu0 }
 0x238   :  { %v752_v33 = vmul.f32 0.044715, %v4847_v29  ;;  %v506_v47 = vadd.f32 %v505_v32, %v4720_v52  ;;  %v507_v34 = vpop.f32.mrb[17].mxu0 }
 0x239   :  { %v508_v35 = vadd.f32 %v507_v34, %v4722_v53  ;;  %v509_v55 = vpop.f32.mrb[18].mxu0  ;;  %v753_v5 = vmul.f32 0.044715, %v4856_v31 }
 0x23a   :  { %v638_v39 = vadd.f32 %v607_v60, %v506_v47  ;;  %v510_v43 = vpop.f32.mrb[19].mxu0  ;;  %v760_v44 = vmul.f32 %v752_v33, %v4847_v29 }
 0x23b   :  { %v639_v52 = vadd.f32 %v611_v1, %v508_v35  ;;  %v761_v53 = vmul.f32 %v753_v5, %v4856_v31 }
 0x23c   :  { %v688_v51 = vmul.f32 %v657_v4, %v638_v39  ;;  %v768_v62 = vmul.f32 %v760_v44, %v4847_v29  ;;  %v4050_v44 = vld [vmem:[#allocation2 + $0x2c] ss:$16 sps:$4 sm:$0xff]  }
 0x23d   :  { %v689_v63 = vmul.f32 %v661_v36, %v639_v52  ;;  %v769_v2 = vmul.f32 %v761_v53, %v4856_v31  ;;  %v745_v36 = vmul.f32 0.5, %v4856_v31 }
 0x23e   :  { %v738_v3 = vadd.f32 %v707_v40, %v688_v51  ;;  %v776_v6 = vadd.f32 %v768_v62, %v4847_v29  ;;  %v4042_v40 = vld [vmem:[#allocation2 + $0x8] ss:$16 sps:$4 sm:$0xff]   ;;  %v4056_v62 = vld [vmem:[#allocation2 + $0x4c] ss:$16 sps:$4 sm:$0xff]  }
 0x23f   :  { %v739_v7 = vadd.f32 %v711_v45, %v689_v63  ;;  %v546_v9 = vpop.f32.mrb[20].mxu0  ;;  %v777_v11 = vadd.f32 %v769_v2, %v4856_v31  ;;  %v4048_v31 = vld [vmem:[#allocation2 + $0x28] ss:$16 sps:$4 sm:$0xff]  }
 0x240   :  { %v754_v12 = vmul.f32 0.044715, %v738_v3  ;;  %v547_v46 = vadd.f32 %v546_v9, %v4755_v37  ;;  %v548_v13 = vpop.f32.mrb[21].mxu0  ;;  %v784_v14 = vmul.f32 0.7978846, %v776_v6 }
 0x241   :  { %v549_v16 = vadd.f32 %v548_v13, %v4757_v38  ;;  %v550_v18 = vpop.f32.mrb[22].mxu0  ;;  %v785_v48 = vmul.f32 0.7978846, %v777_v11  ;;  %v755_v19 = vmul.f32 0.044715, %v739_v7  ;;  %v747_v53 = vmul.f32 0.5, %v739_v7 }
 0x242   :  { %v640_v41 = vadd.f32 %v615_v20, %v547_v46  ;;  %v551_v22 = vpop.f32.mrb[23].mxu0  ;;  %4447 = vtanh.f32 %v784_v14  ;;  %v762_v49 = vmul.f32 %v754_v12, %v738_v3  ;;  %v4051_v9 = vld [vmem:[#allocation2 + $0x400] ss:$16 sps:$4 sm:$0xff]   ;;  %v4059_v12 = vld [vmem:[#allocation2 + $0x424] ss:$16 sps:$4 sm:$0xff]  }
 0x243   :  { %v641_v24 = vadd.f32 %v619_v10, %v549_v16  ;;  %4449 = vtanh.f32 %v785_v48  ;;  %v763_v37 = vmul.f32 %v755_v19, %v739_v7  ;;  %v4054_v10 = vld [vmem:[#allocation2 + $0x48] ss:$16 sps:$4 sm:$0xff]   ;;  %v4068_v18 = vld [vmem:[#allocation2 + $0x8c] ss:$16 sps:$4 sm:$0xff]   ;;  %v4063_v19 = vld [vmem:[#allocation2 + $0x440] ss:$16 sps:$4 sm:$0xff]  }
 0x244   :  { %v690_v38 = vmul.f32 %v665_v21, %v640_v41  ;;  %v770_v27 = vmul.f32 %v762_v49, %v738_v3  ;;  %v744_v21 = vmul.f32 0.5, %v4847_v29  ;;  %v746_v29 = vmul.f32 0.5, %v738_v3  ;;  %v4060_v13 = vld [vmem:[#allocation2 + $0x68] ss:$16 sps:$4 sm:$0xff]   ;;  %v4071_v49 = vld [vmem:[#allocation2 + $0x464] ss:$16 sps:$4 sm:$0xff]  }
 0x245   :  { %v691_v57 = vmul.f32 %v669_v17, %v641_v24  ;;  %v771_v28 = vmul.f32 %v763_v37, %v739_v7  ;;  %v4065_v17 = vld [vmem:[#allocation2 + $0x444] ss:$16 sps:$4 sm:$0xff]   ;;  %v4066_v22 = vld [vmem:[#allocation2 + $0x88] ss:$16 sps:$4 sm:$0xff]   ;;  %v4074_v24 = vld [vmem:[#allocation2 + $0xac] ss:$16 sps:$4 sm:$0xff]  }
 0x246   :  { %v4898_v54 = vadd.f32 %v715_v26, %v690_v38  ;;  %v778_v20 = vadd.f32 %v770_v27, %v738_v3  ;;  %v4062_v3 = vld [vmem:[#allocation2 + $0x6c] ss:$16 sps:$4 sm:$0xff]   ;;  %v4072_v37 = vld [vmem:[#allocation2 + $0xa8] ss:$16 sps:$4 sm:$0xff]   ;;  %v4077_v38 = vld [vmem:[#allocation2 + $0x484] ss:$16 sps:$4 sm:$0xff]  }
 0x247   :  { %v741_v8 = vadd.f32 %v719_v42, %v691_v57  ;;  %v779_v60 = vadd.f32 %v771_v28, %v739_v7  ;;  %v4057_v7 = vld [vmem:[#allocation2 + $0x420] ss:$16 sps:$4 sm:$0xff]   ;;  %v4080_v27 = vld [vmem:[#allocation2 + $0xcc] ss:$16 sps:$4 sm:$0xff]   ;;  %v4078_v28 = vld [vmem:[#allocation2 + $0xc8] ss:$16 sps:$4 sm:$0xff]  }
 0x248   :  { %v786_v32 = vmul.f32 0.7978846, %v778_v20  ;;  %v4069_v42 = vld [vmem:[#allocation2 + $0x460] ss:$16 sps:$4 sm:$0xff]   ;;  %v4083_v20 = vld [vmem:[#allocation2 + $0x4a4] ss:$16 sps:$4 sm:$0xff]  }
 0x249   :  { %v787_v1 = vmul.f32 0.7978846, %v779_v60  ;;  %v757_v33 = vmul.f32 0.044715, %v741_v8  ;;  %v749_v14 = vmul.f32 0.5, %v741_v8 }
 0x24a   :  { %4451 = vtanh.f32 %v786_v32  ;;  %v4075_v57 = vld [vmem:[#allocation2 + $0x480] ss:$16 sps:$4 sm:$0xff]   ;;  %v4084_v32 = vld [vmem:[#allocation2 + $0xe8] ss:$16 sps:$4 sm:$0xff]  }
 0x24b   :  { %4453 = vtanh.f32 %v787_v1  ;;  %v765_v47 = vmul.f32 %v757_v33, %v741_v8  ;;  %v4081_v60 = vld [vmem:[#allocation2 + $0x4a0] ss:$16 sps:$4 sm:$0xff]   ;;  %v4089_v1 = vld [vmem:[#allocation2 + $0x4c4] ss:$16 sps:$4 sm:$0xff]   ;;  %v4092_v33 = vld [vmem:[#allocation2 + $0x10c] ss:$16 sps:$4 sm:$0xff]  }
 0x24c   :  { %v4448_v4 = vpop.eup %4447 }
 0x24d   :  { %v4450_v59 = vpop.eup %4449  ;;  %v800_v34 = vadd.f32 1.0, %v4448_v4  ;;  %v773_v35 = vmul.f32 %v765_v47, %v741_v8  ;;  %v756_v47 = vmul.f32 0.044715, %v4898_v54  ;;  %v4087_v4 = vld [vmem:[#allocation2 + $0x4c0] ss:$16 sps:$4 sm:$0xff]  }
 0x24e   :  { %v801_v0 = vadd.f32 1.0, %v4450_v59  ;;  %v4090_v59 = vld [vmem:[#allocation2 + $0x108] ss:$16 sps:$4 sm:$0xff]  }
 0x24f   :  { %v808_v15 = vmul.f32 %v800_v34, %v744_v21  ;;  %v781_v26 = vadd.f32 %v773_v35, %v741_v8  ;;  %v4086_v8 = vld [vmem:[#allocation2 + $0xec] ss:$16 sps:$4 sm:$0xff]   ;;  %v4095_v21 = vld [vmem:[#allocation2 + $0x4e4] ss:$16 sps:$4 sm:$0xff]   ;;  %v759_v35 = vmul.f32 0.044715, %v4861_v61 }
 0x250   :  { %v809_v55 = vmul.f32 %v801_v0, %v745_v36  ;;  %v4098_v34 = vld [vmem:[#allocation2 + $0x12c] ss:$16 sps:$4 sm:$0xff]   ;;  %v4093_v36 = vld [vmem:[#allocation2 + $0x4e0] ss:$16 sps:$4 sm:$0xff]   ;;  %v4096_v0 = vld [vmem:[#allocation2 + $0x128] ss:$16 sps:$4 sm:$0xff]  }
 0x251   :  { %v789_v5 = vmul.f32 0.7978846, %v781_v26  ;;  %v4902_v43 = vpack.c.bf16 %v808_v15, %v808_v15  ;;  %v764_v15 = vmul.f32 %v756_v47, %v4898_v54  ;;  %v4101_v26 = vld [vmem:[#allocation2 + $0x504] ss:$16 sps:$4 sm:$0xff]   ;;  %v751_v47 = vmul.f32 0.5, %v4861_v61 }
 0x252   :  { %v817_v39 = vpack.c.bf16 %v809_v55, %v809_v55  ;;  %v4104_v55 = vld [vmem:[#allocation2 + $0x14c] ss:$16 sps:$4 sm:$0xff]  }
 0x253   :  { %4455 = vtanh.f32 %v789_v5  ;;  %v767_v5 = vmul.f32 %v759_v35, %v4861_v61  ;;  %v4147_v35 = vld [vmem:[#allocation2 + $0x600] ss:$16 sps:$4 sm:$0xff]  }
 0x254   :  { %v4452_v52 = vpop.eup %4451  ;;  %2414 = vmatprep.mubr.bf16.mxu1 %v817_v39 }
 0x255   :  { %v4454_v45 = vpop.eup %4453  ;;  %2415 = vmatmul.mubr.bf16.vlgmr.msra.gmra.mrb[8].mxu1 %v4902_v43  ;;  %v802_v50 = vadd.f32 1.0, %v4452_v52  ;;  %v4107_v52 = vld [vmem:[#allocation2 + $0x524] ss:$16 sps:$4 sm:$0xff]  }
 0x256   :  { %2547 = vmatpush1.bf16.msra.mxu1 %v4042_v40  ;;  %2578 = vmatprep.mubr.bf16.mxu1 %v817_v39  ;;  %v803_v51 = vadd.f32 1.0, %v4454_v45  ;;  %v4099_v39 = vld [vmem:[#allocation2 + $0x500] ss:$16 sps:$4 sm:$0xff]   ;;  %v4102_v40 = vld [vmem:[#allocation2 + $0x148] ss:$16 sps:$4 sm:$0xff]  }
 0x257   :  { %2548 = vmatprep.subr.bf16.mxu1 %v4050_v44  ;;  %v810_v63 = vmul.f32 %v802_v50, %v746_v29  ;;  %v772_v44 = vmul.f32 %v764_v15, %v4898_v54  ;;  %v4110_v45 = vld [vmem:[#allocation2 + $0x16c] ss:$16 sps:$4 sm:$0xff]   ;;  %v775_v29 = vmul.f32 %v767_v5, %v4861_v61  ;;  %v4105_v50 = vld [vmem:[#allocation2 + $0x520] ss:$16 sps:$4 sm:$0xff]   ;;  %v4156_v15 = vld [vmem:[#allocation2 + $0x268] ss:$16 sps:$4 sm:$0xff]  }
 0x258   :  { %v811_v2 = vmul.f32 %v803_v51, %v747_v53  ;;  %v4113_v51 = vld [vmem:[#allocation2 + $0x544] ss:$16 sps:$4 sm:$0xff]   ;;  %v4159_v5 = vld [vmem:[#allocation2 + $0x640] ss:$16 sps:$4 sm:$0xff]  }
 0x259   :  { %v4907_v11 = vpack.c.bf16 %v810_v63, %v810_v63  ;;  %v780_v53 = vadd.f32 %v772_v44, %v4898_v54  ;;  %v783_v63 = vadd.f32 %v775_v29, %v4861_v61  ;;  %v4158_v61 = vld [vmem:[#allocation2 + $0x26c] ss:$16 sps:$4 sm:$0xff]   ;;  %v4173_v29 = vld [vmem:[#allocation2 + $0x684] ss:$16 sps:$4 sm:$0xff]  }
 0x25a   :  { %2549 = vmatpush1.bf16.msra.mxu1 %v4048_v31  ;;  %v4905_v6 = vpack.c.bf16 %v811_v2, %v811_v2  ;;  %v4108_v31 = vld [vmem:[#allocation2 + $0x168] ss:$16 sps:$4 sm:$0xff]   ;;  %v4111_v2 = vld [vmem:[#allocation2 + $0x540] ss:$16 sps:$4 sm:$0xff]   ;;  %v4170_v44 = vld [vmem:[#allocation2 + $0x2ac] ss:$16 sps:$4 sm:$0xff]  }
 0x25b   :  { %2550 = vmatprep.subr.bf16.mxu1 %v4056_v62  ;;  %v4116_v62 = vld [vmem:[#allocation2 + $0x18c] ss:$16 sps:$4 sm:$0xff]  }
 0x25c   :  { %2455 = vmatprep.mubr.bf16.mxu0 %v4905_v6 }
 0x25d   :  { %v4456_v46 = vpop.eup %4455  ;;  %2456 = vmatmul.mubr.bf16.vlgmr.msra.gmra.mrb[24].mxu0 %v4907_v11 }
 0x25e   :  { %2465 = vmatpush1.bf16.msra.mxu0 %v4051_v9  ;;  %2551 = vmatpush1.bf16.msra.mxu1 %v4054_v10  ;;  %v805_v16 = vadd.f32 1.0, %v4456_v46  ;;  %v4114_v9 = vld [vmem:[#allocation2 + $0x188] ss:$16 sps:$4 sm:$0xff]   ;;  %v788_v10 = vmul.f32 0.7978846, %v780_v53 }
 0x25f   :  { %2466 = vmatprep.subr.bf16.mxu0 %v4059_v12  ;;  %2552 = vmatprep.subr.bf16.mxu1 %v4062_v3  ;;  %v4119_v12 = vld [vmem:[#allocation2 + $0x564] ss:$16 sps:$4 sm:$0xff]   ;;  %v4122_v3 = vld [vmem:[#allocation2 + $0x1ac] ss:$16 sps:$4 sm:$0xff]   ;;  %v791_v46 = vmul.f32 0.7978846, %v783_v63 }
 0x260   :  { %v813_v48 = vmul.f32 %v805_v16, %v749_v14  ;;  %4457 = vtanh.f32 %v788_v10  ;;  %v4125_v14 = vld [vmem:[#allocation2 + $0x584] ss:$16 sps:$4 sm:$0xff]   ;;  %v4128_v16 = vld [vmem:[#allocation2 + $0x1cc] ss:$16 sps:$4 sm:$0xff]   ;;  %v4174_v53 = vld [vmem:[#allocation2 + $0x2c8] ss:$16 sps:$4 sm:$0xff]  }
 0x261   :  { %4459 = vtanh.f32 %v791_v46  ;;  %v4177_v63 = vld [vmem:[#allocation2 + $0x6a0] ss:$16 sps:$4 sm:$0xff]   ;;  %v4188_v10 = vld [vmem:[#allocation2 + $0x30c] ss:$16 sps:$4 sm:$0xff]   ;;  %v4186_v46 = vld [vmem:[#allocation2 + $0x308] ss:$16 sps:$4 sm:$0xff]  }
 0x262   :  { %2467 = vmatpush1.bf16.msra.mxu0 %v4057_v7  ;;  %2553 = vmatpush1.bf16.msra.mxu1 %v4060_v13  ;;  %v4911_v41 = vpack.c.bf16 %v813_v48, %v813_v48  ;;  %v4117_v7 = vld [vmem:[#allocation2 + $0x560] ss:$16 sps:$4 sm:$0xff]   ;;  %v4120_v13 = vld [vmem:[#allocation2 + $0x1a8] ss:$16 sps:$4 sm:$0xff]   ;;  %v4131_v48 = vld [vmem:[#allocation2 + $0x5a4] ss:$16 sps:$4 sm:$0xff]  }
 0x263   :  { %2468 = vmatprep.subr.bf16.mxu0 %v4065_v17  ;;  %2554 = vmatprep.subr.bf16.mxu1 %v4068_v18  ;;  %v4123_v17 = vld [vmem:[#allocation2 + $0x580] ss:$16 sps:$4 sm:$0xff]   ;;  %v4126_v18 = vld [vmem:[#allocation2 + $0x1c8] ss:$16 sps:$4 sm:$0xff]  }
 0x264   :  { %2496 = vmatprep.mubr.bf16.mxu0 %v4911_v41 }
 0x266   :  { %2469 = vmatpush1.bf16.msra.mxu0 %v4063_v19  ;;  %2555 = vmatpush1.bf16.msra.mxu1 %v4066_v22  ;;  %v4134_v19 = vld [vmem:[#allocation2 + $0x1ec] ss:$16 sps:$4 sm:$0xff]   ;;  %v4129_v22 = vld [vmem:[#allocation2 + $0x5a0] ss:$16 sps:$4 sm:$0xff]  }
 0x267   :  { %2470 = vmatprep.subr.bf16.mxu0 %v4071_v49  ;;  %2556 = vmatprep.subr.bf16.mxu1 %v4074_v24  ;;  %v4132_v49 = vld [vmem:[#allocation2 + $0x1e8] ss:$16 sps:$4 sm:$0xff]   ;;  %v4137_v24 = vld [vmem:[#allocation2 + $0x5c4] ss:$16 sps:$4 sm:$0xff]  }
 0x26a   :  { %2471 = vmatpush1.bf16.msra.mxu0 %v4069_v42  ;;  %2557 = vmatpush1.bf16.msra.mxu1 %v4072_v37  ;;  %v4140_v42 = vld [vmem:[#allocation2 + $0x20c] ss:$16 sps:$4 sm:$0xff]   ;;  %v4458_v37 = vpop.eup %4457 }
 0x26b   :  { %2472 = vmatprep.subr.bf16.mxu0 %v4077_v38  ;;  %2558 = vmatprep.subr.bf16.mxu1 %v4080_v27  ;;  %v4460_v38 = vpop.eup %4459  ;;  %v4135_v27 = vld [vmem:[#allocation2 + $0x5c0] ss:$16 sps:$4 sm:$0xff]  }
 0x26e   :  { %2473 = vmatpush1.bf16.msra.mxu0 %v4075_v57  ;;  %2559 = vmatpush1.bf16.msra.mxu1 %v4078_v28  ;;  %v4138_v57 = vld [vmem:[#allocation2 + $0x208] ss:$16 sps:$4 sm:$0xff]   ;;  %v4143_v28 = vld [vmem:[#allocation2 + $0x5e4] ss:$16 sps:$4 sm:$0xff]  }
 0x26f   :  { %2474 = vmatprep.subr.bf16.mxu0 %v4083_v20  ;;  %2560 = vmatprep.subr.bf16.mxu1 %v4086_v8  ;;  %v804_v20 = vadd.f32 1.0, %v4458_v37  ;;  %v4146_v8 = vld [vmem:[#allocation2 + $0x22c] ss:$16 sps:$4 sm:$0xff]   ;;  %v4201_v37 = vld [vmem:[#allocation2 + $0x720] ss:$16 sps:$4 sm:$0xff]  }
 0x272   :  { %2475 = vmatpush1.bf16.msra.mxu0 %v4081_v60  ;;  %2561 = vmatpush1.bf16.msra.mxu1 %v4084_v32  ;;  %v807_v60 = vadd.f32 1.0, %v4460_v38  ;;  %v748_v32 = vmul.f32 0.5, %v4898_v54  ;;  %v4150_v54 = vld [vmem:[#allocation2 + $0x248] ss:$16 sps:$4 sm:$0xff]  }
 0x273   :  { %2476 = vmatprep.subr.bf16.mxu0 %v4089_v1  ;;  %2562 = vmatprep.subr.bf16.mxu1 %v4092_v33  ;;  %v4141_v1 = vld [vmem:[#allocation2 + $0x5e0] ss:$16 sps:$4 sm:$0xff]   ;;  %v4144_v33 = vld [vmem:[#allocation2 + $0x228] ss:$16 sps:$4 sm:$0xff]  }
 0x276   :  { %2477 = vmatpush1.bf16.msra.mxu0 %v4087_v4  ;;  %2563 = vmatpush1.bf16.msra.mxu1 %v4090_v59  ;;  %v812_v4 = vmul.f32 %v804_v20, %v748_v32  ;;  %v4149_v59 = vld [vmem:[#allocation2 + $0x604] ss:$16 sps:$4 sm:$0xff]   ;;  %v4207_v20 = vld [vmem:[#allocation2 + $0x740] ss:$16 sps:$4 sm:$0xff]  }
 0x277   :  { %2478 = vmatprep.subr.bf16.mxu0 %v4095_v21  ;;  %2564 = vmatprep.subr.bf16.mxu1 %v4098_v34  ;;  %v4152_v21 = vld [vmem:[#allocation2 + $0x24c] ss:$16 sps:$4 sm:$0xff]   ;;  %v815_v34 = vmul.f32 %v807_v60, %v751_v47  ;;  %v4210_v60 = vld [vmem:[#allocation2 + $0x388] ss:$16 sps:$4 sm:$0xff]   ;;  %v4215_v32 = vld [vmem:[#allocation2 + $0x764] ss:$16 sps:$4 sm:$0xff]  }
 0x278   :  { %v4216_v47 = vld [vmem:[#allocation2 + $0x3a8] ss:$16 sps:$4 sm:$0xff]  }
 0x27a   :  { %2479 = vmatpush1.bf16.msra.mxu0 %v4093_v36  ;;  %2565 = vmatpush1.bf16.msra.mxu1 %v4096_v0  ;;  %v4155_v36 = vld [vmem:[#allocation2 + $0x624] ss:$16 sps:$4 sm:$0xff]   ;;  %v4928_v0 = vpack.c.bf16 %v815_v34, %v815_v34  ;;  %v4222_v34 = vld [vmem:[#allocation2 + $0x3c8] ss:$16 sps:$4 sm:$0xff]  }
 0x27b   :  { %2480 = vmatprep.subr.bf16.mxu0 %v4101_v26  ;;  %2566 = vmatprep.subr.bf16.mxu1 %v4104_v55  ;;  %v4161_v26 = vld [vmem:[#allocation2 + $0x644] ss:$16 sps:$4 sm:$0xff]   ;;  %v4164_v55 = vld [vmem:[#allocation2 + $0x28c] ss:$16 sps:$4 sm:$0xff]  }
 0x27e   :  { %2481 = vmatpush1.bf16.msra.mxu0 %v4099_v39  ;;  %2567 = vmatpush1.bf16.msra.mxu1 %v4102_v40  ;;  %v4162_v39 = vld [vmem:[#allocation2 + $0x288] ss:$16 sps:$4 sm:$0xff]   ;;  %v4167_v40 = vld [vmem:[#allocation2 + $0x664] ss:$16 sps:$4 sm:$0xff]  }
 0x27f   :  { %2482 = vmatprep.subr.bf16.mxu0 %v4107_v52  ;;  %2568 = vmatprep.subr.bf16.mxu1 %v4110_v45  ;;  %v4165_v52 = vld [vmem:[#allocation2 + $0x660] ss:$16 sps:$4 sm:$0xff]   ;;  %v4168_v45 = vld [vmem:[#allocation2 + $0x2a8] ss:$16 sps:$4 sm:$0xff]  }
 0x282   :  { %2483 = vmatpush1.bf16.msra.mxu0 %v4105_v50  ;;  %2569 = vmatpush1.bf16.msra.mxu1 %v4108_v31  ;;  %v4176_v50 = vld [vmem:[#allocation2 + $0x2cc] ss:$16 sps:$4 sm:$0xff]   ;;  %v4171_v31 = vld [vmem:[#allocation2 + $0x680] ss:$16 sps:$4 sm:$0xff]  }
 0x283   :  { %2484 = vmatprep.subr.bf16.mxu0 %v4113_v51  ;;  %2570 = vmatprep.subr.bf16.mxu1 %v4116_v62  ;;  %v4179_v51 = vld [vmem:[#allocation2 + $0x6a4] ss:$16 sps:$4 sm:$0xff]   ;;  %v4182_v62 = vld [vmem:[#allocation2 + $0x2ec] ss:$16 sps:$4 sm:$0xff]  }
 0x286   :  { %2485 = vmatpush1.bf16.msra.mxu0 %v4111_v2  ;;  %2571 = vmatpush1.bf16.msra.mxu1 %v4114_v9  ;;  %v4180_v2 = vld [vmem:[#allocation2 + $0x2e8] ss:$16 sps:$4 sm:$0xff]   ;;  %v4185_v9 = vld [vmem:[#allocation2 + $0x6c4] ss:$16 sps:$4 sm:$0xff]  }
 0x287   :  { %2486 = vmatprep.subr.bf16.mxu0 %v4119_v12  ;;  %2572 = vmatprep.subr.bf16.mxu1 %v4122_v3  ;;  %v758_v12 = vmul.f32 0.044715, %v4852_v30  ;;  %v4183_v3 = vld [vmem:[#allocation2 + $0x6c0] ss:$16 sps:$4 sm:$0xff]  }
 0x28a   :  { %2487 = vmatpush1.bf16.msra.mxu0 %v4117_v7  ;;  %2573 = vmatpush1.bf16.msra.mxu1 %v4120_v13  ;;  %v4191_v7 = vld [vmem:[#allocation2 + $0x6e4] ss:$16 sps:$4 sm:$0xff]   ;;  %v4194_v13 = vld [vmem:[#allocation2 + $0x32c] ss:$16 sps:$4 sm:$0xff]  }
 0x28b   :  { %2488 = vmatprep.subr.bf16.mxu0 %v4125_v14  ;;  %2574 = vmatprep.subr.bf16.mxu1 %v4128_v16  ;;  %v4189_v14 = vld [vmem:[#allocation2 + $0x6e0] ss:$16 sps:$4 sm:$0xff]   ;;  %v766_v16 = vmul.f32 %v758_v12, %v4852_v30 }
 0x28c   :  { %v4339_v12 = vld [vmem:[%s5273_s13 + $0x20] ss:$8 sps:$4 sm:$0xff]  }
 0x28e   :  { %2489 = vmatpush1.bf16.msra.mxu0 %v4123_v17  ;;  %2575 = vmatpush1.bf16.msra.mxu1 %v4126_v18  ;;  %v4192_v17 = vld [vmem:[#allocation2 + $0x328] ss:$16 sps:$4 sm:$0xff]   ;;  %v4197_v18 = vld [vmem:[#allocation2 + $0x704] ss:$16 sps:$4 sm:$0xff]  }
 0x28f   :  { %2490 = vmatprep.subr.bf16.mxu0 %v4131_v48  ;;  %2576 = vmatprep.subr.bf16.mxu1 %v4134_v19  ;;  %v4200_v48 = vld [vmem:[#allocation2 + $0x34c] ss:$16 sps:$4 sm:$0xff]   ;;  %v4195_v19 = vld [vmem:[#allocation2 + $0x700] ss:$16 sps:$4 sm:$0xff]  }
 0x292   :  { %2491 = vmatpush1.bf16.msra.mxu0 %v4129_v22  ;;  %2577 = vmatpush1.bf16.msra.mxu1 %v4132_v49  ;;  %v774_v22 = vmul.f32 %v766_v16, %v4852_v30  ;;  %v4198_v49 = vld [vmem:[#allocation2 + $0x348] ss:$16 sps:$4 sm:$0xff]   ;;  %v4347_v16 = vld [vmem:[%s5273_s13 + $0x44] ss:$8 sps:$4 sm:$0xff]  }
 0x293   :  { %2492 = vmatprep.subr.bf16.mxu0 %v4137_v24  ;;  %2587 = vmatprep.subr.bf16.mxu1 %v4140_v42  ;;  %v4203_v24 = vld [vmem:[#allocation2 + $0x724] ss:$16 sps:$4 sm:$0xff]   ;;  %v4206_v42 = vld [vmem:[#allocation2 + $0x36c] ss:$16 sps:$4 sm:$0xff]  }
 0x294   :  { %v782_v38 = vadd.f32 %v774_v22, %v4852_v30  ;;  %v4260_v22 = vld [vmem:[#allocation2 + $0x4ec] ss:$16 sps:$4 sm:$0xff]  }
 0x295   :  { %2579 = vmatmul.mubr.bf16.vlgmr.msra.gmra.mrb[12].mxu1 %v4902_v43  ;;  %v4926_v43 = vpack.c.bf16 %v812_v4, %v812_v4  ;;  %v4221_v4 = vld [vmem:[#allocation2 + $0x784] ss:$16 sps:$4 sm:$0xff]  }
 0x296   :  { %2493 = vmatpush1.bf16.msra.mxu0 %v4135_v27  ;;  %2588 = vmatpush1.bf16.msra.mxu1 %v4138_v57  ;;  %v4204_v27 = vld [vmem:[#allocation2 + $0x368] ss:$16 sps:$4 sm:$0xff]   ;;  %v4209_v57 = vld [vmem:[#allocation2 + $0x744] ss:$16 sps:$4 sm:$0xff]  }
 0x297   :  { %2619 = vmatprep.mubr.bf16.mxu1 %v4905_v6  ;;  %2494 = vmatprep.subr.bf16.mxu0 %v4143_v28  ;;  %v4153_v6 = vld [vmem:[#allocation2 + $0x620] ss:$16 sps:$4 sm:$0xff]   ;;  %v4212_v28 = vld [vmem:[#allocation2 + $0x38c] ss:$16 sps:$4 sm:$0xff]  }
 0x298   :  { %2589 = vmatprep.subr.bf16.mxu1 %v4146_v8  ;;  %v790_v8 = vmul.f32 0.7978846, %v782_v38  ;;  %v4351_v38 = vld [vmem:[%s5273_s13 + $0x60] ss:$8 sps:$4 sm:$0xff]  }
 0x29a   :  { %2495 = vmatpush1.bf16.msra.mxu0 %v4141_v1  ;;  %2590 = vmatpush1.bf16.msra.mxu1 %v4144_v33  ;;  %v4218_v1 = vld [vmem:[#allocation2 + $0x3ac] ss:$16 sps:$4 sm:$0xff]   ;;  %v4213_v33 = vld [vmem:[#allocation2 + $0x760] ss:$16 sps:$4 sm:$0xff]   ;;  %4461 = vtanh.f32 %v790_v8  ;;  %v4267_v8 = vld [vmem:[#allocation2 + $0x548] ss:$16 sps:$4 sm:$0xff]  }
 0x29b   :  { %2505 = vmatprep.subr.bf16.mxu0 %v4149_v59  ;;  %2591 = vmatprep.subr.bf16.mxu1 %v4152_v21  ;;  %v4224_v59 = vld [vmem:[#allocation2 + $0x3cc] ss:$16 sps:$4 sm:$0xff]   ;;  %v4219_v21 = vld [vmem:[#allocation2 + $0x780] ss:$16 sps:$4 sm:$0xff]  }
 0x29d   :  { %2497 = vmatmul.mubr.bf16.vlgmr.msra.gmra.mrb[24].mxu0 %v4926_v43 }
 0x29e   :  { %2506 = vmatpush1.bf16.msra.mxu0 %v4147_v35  ;;  %2537 = vmatprep.mubr.bf16.mxu0 %v4928_v0  ;;  %v4227_v35 = vld [vmem:[#allocation2 + $0x7a4] ss:$16 sps:$4 sm:$0xff]  }
 0x29f   :  { %2592 = vmatpush1.bf16.msra.mxu1 %v4150_v54  ;;  %2507 = vmatprep.subr.bf16.mxu0 %v4155_v36  ;;  %v4230_v54 = vld [vmem:[#allocation2 + $0x3ec] ss:$16 sps:$4 sm:$0xff]   ;;  %v4225_v36 = vld [vmem:[#allocation2 + $0x7a0] ss:$16 sps:$4 sm:$0xff]  }
 0x2a0   :  { %2593 = vmatprep.subr.bf16.mxu1 %v4158_v61  ;;  %v4228_v61 = vld [vmem:[#allocation2 + $0x3e8] ss:$16 sps:$4 sm:$0xff]  }
 0x2a2   :  { %2508 = vmatpush1.bf16.msra.mxu0 %v4153_v6  ;;  %v4233_v6 = vld [vmem:[#allocation2 + $0x7c4] ss:$16 sps:$4 sm:$0xff]  }
 0x2a3   :  { %2594 = vmatpush1.bf16.msra.mxu1 %v4156_v15  ;;  %2509 = vmatprep.subr.bf16.mxu0 %v4161_v26  ;;  %v4236_v26 = vld [vmem:[#allocation2 + $0x40c] ss:$16 sps:$4 sm:$0xff]  }
 0x2a4   :  { %2595 = vmatprep.subr.bf16.mxu1 %v4164_v55  ;;  %v4462_v15 = vpop.eup %4461  ;;  %v4231_v55 = vld [vmem:[#allocation2 + $0x7c0] ss:$16 sps:$4 sm:$0xff]  }
 0x2a6   :  { %2510 = vmatpush1.bf16.msra.mxu0 %v4159_v5  ;;  %v4234_v5 = vld [vmem:[#allocation2 + $0x408] ss:$16 sps:$4 sm:$0xff]  }
 0x2a7   :  { %2596 = vmatpush1.bf16.msra.mxu1 %v4162_v39  ;;  %2511 = vmatprep.subr.bf16.mxu0 %v4167_v40  ;;  %v806_v39 = vadd.f32 1.0, %v4462_v15  ;;  %v4239_v40 = vld [vmem:[#allocation2 + $0x7e4] ss:$16 sps:$4 sm:$0xff]   ;;  %v4293_v15 = vld [vmem:[#allocation2 + $0x64c] ss:$16 sps:$4 sm:$0xff]  }
 0x2a8   :  { %2597 = vmatprep.subr.bf16.mxu1 %v4170_v44  ;;  %v4242_v44 = vld [vmem:[#allocation2 + $0x42c] ss:$16 sps:$4 sm:$0xff]  }
 0x2aa   :  { %2512 = vmatpush1.bf16.msra.mxu0 %v4165_v52  ;;  %v750_v52 = vmul.f32 0.5, %v4852_v30  ;;  %v4333_v30 = vld [vmem:[%s5273_s13] ss:$8 sps:$4 sm:$0xff]  }
 0x2ab   :  { %2598 = vmatpush1.bf16.msra.mxu1 %v4168_v45  ;;  %2513 = vmatprep.subr.bf16.mxu0 %v4173_v29  ;;  %v4237_v45 = vld [vmem:[#allocation2 + $0x7e0] ss:$16 sps:$4 sm:$0xff]   ;;  %v4240_v29 = vld [vmem:[#allocation2 + $0x428] ss:$16 sps:$4 sm:$0xff]  }
 0x2ac   :  { %2599 = vmatprep.subr.bf16.mxu1 %v4176_v50  ;;  %v814_v50 = vmul.f32 %v806_v39, %v750_v52  ;;  %v4299_v39 = vld [vmem:[#allocation2 + $0x68c] ss:$16 sps:$4 sm:$0xff]  }
 0x2ae   :  { %2514 = vmatpush1.bf16.msra.mxu0 %v4171_v31  ;;  %v4335_v31 = vld [vmem:[%s5273_s13 + $0x4] ss:$8 sps:$4 sm:$0xff]  }
 0x2af   :  { %2600 = vmatpush1.bf16.msra.mxu1 %v4174_v53  ;;  %2515 = vmatprep.subr.bf16.mxu0 %v4179_v51  ;;  %v4245_v53 = vld [vmem:[#allocation2 + $0x44c] ss:$16 sps:$4 sm:$0xff]   ;;  %v4243_v51 = vld [vmem:[#allocation2 + $0x448] ss:$16 sps:$4 sm:$0xff]  }
 0x2b0   :  { %2601 = vmatprep.subr.bf16.mxu1 %v4182_v62  ;;  %v4248_v62 = vld [vmem:[#allocation2 + $0x46c] ss:$16 sps:$4 sm:$0xff]  }
 0x2b2   :  { %2516 = vmatpush1.bf16.msra.mxu0 %v4177_v63  ;;  %v4336_v63 = vld [vmem:[%s5273_s13 + $0x10] ss:$8 sps:$4 sm:$0xff]  }
 0x2b3   :  { %2602 = vmatpush1.bf16.msra.mxu1 %v4180_v2  ;;  %2517 = vmatprep.subr.bf16.mxu0 %v4185_v9  ;;  %v4246_v2 = vld [vmem:[#allocation2 + $0x468] ss:$16 sps:$4 sm:$0xff]   ;;  %v4341_v9 = vld [vmem:[%s5273_s13 + $0x24] ss:$8 sps:$4 sm:$0xff]  }
 0x2b4   :  { %2603 = vmatprep.subr.bf16.mxu1 %v4188_v10  ;;  %v4251_v10 = vld [vmem:[#allocation2 + $0x48c] ss:$16 sps:$4 sm:$0xff]  }
 0x2b6   :  { %2518 = vmatpush1.bf16.msra.mxu0 %v4183_v3  ;;  %v4249_v3 = vld [vmem:[#allocation2 + $0x488] ss:$16 sps:$4 sm:$0xff]  }
 0x2b7   :  { %2604 = vmatpush1.bf16.msra.mxu1 %v4186_v46  ;;  %2519 = vmatprep.subr.bf16.mxu0 %v4191_v7  ;;  %v4344_v46 = vld [vmem:[%s5273_s13 + $0x34] ss:$8 sps:$4 sm:$0xff]  }
 0x2b8   :  { %2605 = vmatprep.subr.bf16.mxu1 %v4194_v13  ;;  %v4254_v7 = vld [vmem:[#allocation2 + $0x4ac] ss:$16 sps:$4 sm:$0xff]   ;;  %v4342_v13 = vld [vmem:[%s5273_s13 + $0x30] ss:$8 sps:$4 sm:$0xff]  }
 0x2ba   :  { %2520 = vmatpush1.bf16.msra.mxu0 %v4189_v14  ;;  %v4252_v14 = vld [vmem:[#allocation2 + $0x4a8] ss:$16 sps:$4 sm:$0xff]  }
 0x2bb   :  { %2606 = vmatpush1.bf16.msra.mxu1 %v4192_v17  ;;  %2521 = vmatprep.subr.bf16.mxu0 %v4197_v18  ;;  %v4257_v17 = vld [vmem:[#allocation2 + $0x4cc] ss:$16 sps:$4 sm:$0xff]   ;;  %v4345_v18 = vld [vmem:[%s5273_s13 + $0x40] ss:$8 sps:$4 sm:$0xff]  }
 0x2bc   :  { %2607 = vmatprep.subr.bf16.mxu1 %v4200_v48  ;;  %v4255_v48 = vld [vmem:[#allocation2 + $0x4c8] ss:$16 sps:$4 sm:$0xff]  }
 0x2be   :  { %2522 = vmatpush1.bf16.msra.mxu0 %v4195_v19  ;;  %v4350_v19 = vld [vmem:[%s5273_s13 + $0x54] ss:$8 sps:$4 sm:$0xff]  }
 0x2bf   :  { %2608 = vmatpush1.bf16.msra.mxu1 %v4198_v49  ;;  %2523 = vmatprep.subr.bf16.mxu0 %v4203_v24  ;;  %v4348_v49 = vld [vmem:[%s5273_s13 + $0x50] ss:$8 sps:$4 sm:$0xff]  }
 0x2c0   :  { %2609 = vmatprep.subr.bf16.mxu1 %v4206_v42  ;;  %v4258_v24 = vld [vmem:[#allocation2 + $0x4e8] ss:$16 sps:$4 sm:$0xff]   ;;  %v4353_v42 = vld [vmem:[%s5273_s13 + $0x64] ss:$8 sps:$4 sm:$0xff]  }
 0x2c2   :  { %2524 = vmatpush1.bf16.msra.mxu0 %v4201_v37  ;;  %v4263_v37 = vld [vmem:[#allocation2 + $0x50c] ss:$16 sps:$4 sm:$0xff]  }
 0x2c3   :  { %2610 = vmatpush1.bf16.msra.mxu1 %v4204_v27  ;;  %2525 = vmatprep.subr.bf16.mxu0 %v4209_v57  ;;  %v4261_v27 = vld [vmem:[#allocation2 + $0x508] ss:$16 sps:$4 sm:$0xff]   ;;  %v4266_v57 = vld [vmem:[#allocation2 + $0x52c] ss:$16 sps:$4 sm:$0xff]  }
 0x2c4   :  { %2611 = vmatprep.subr.bf16.mxu1 %v4212_v28  ;;  %v4264_v28 = vld [vmem:[#allocation2 + $0x528] ss:$16 sps:$4 sm:$0xff]  }
 0x2c6   :  { %2526 = vmatpush1.bf16.msra.mxu0 %v4207_v20  ;;  %v4269_v20 = vld [vmem:[#allocation2 + $0x54c] ss:$16 sps:$4 sm:$0xff]  }
 0x2c7   :  { %2612 = vmatpush1.bf16.msra.mxu1 %v4210_v60  ;;  %2527 = vmatprep.subr.bf16.mxu0 %v4215_v32  ;;  %v4272_v60 = vld [vmem:[#allocation2 + $0x56c] ss:$16 sps:$4 sm:$0xff]   ;;  %v4270_v32 = vld [vmem:[#allocation2 + $0x568] ss:$16 sps:$4 sm:$0xff]  }
 0x2c8   :  { %2613 = vmatprep.subr.bf16.mxu1 %v4218_v1  ;;  %v4275_v1 = vld [vmem:[#allocation2 + $0x58c] ss:$16 sps:$4 sm:$0xff]  }
 0x2ca   :  { %2528 = vmatpush1.bf16.msra.mxu0 %v4213_v33  ;;  %v4273_v33 = vld [vmem:[#allocation2 + $0x588] ss:$16 sps:$4 sm:$0xff]  }
 0x2cb   :  { %2614 = vmatpush1.bf16.msra.mxu1 %v4216_v47  ;;  %2529 = vmatprep.subr.bf16.mxu0 %v4221_v4  ;;  %v4278_v47 = vld [vmem:[#allocation2 + $0x5ac] ss:$16 sps:$4 sm:$0xff]   ;;  %v4276_v4 = vld [vmem:[#allocation2 + $0x5a8] ss:$16 sps:$4 sm:$0xff]  }
 0x2cc   :  { %2615 = vmatprep.subr.bf16.mxu1 %v4224_v59  ;;  %v4281_v59 = vld [vmem:[#allocation2 + $0x5cc] ss:$16 sps:$4 sm:$0xff]  }
 0x2ce   :  { %2530 = vmatpush1.bf16.msra.mxu0 %v4219_v21  ;;  %v4279_v21 = vld [vmem:[#allocation2 + $0x5c8] ss:$16 sps:$4 sm:$0xff]  }
 0x2cf   :  { %2616 = vmatpush1.bf16.msra.mxu1 %v4222_v34  ;;  %2531 = vmatprep.subr.bf16.mxu0 %v4227_v35  ;;  %v4284_v34 = vld [vmem:[#allocation2 + $0x5ec] ss:$16 sps:$4 sm:$0xff]   ;;  %v4282_v35 = vld [vmem:[#allocation2 + $0x5e8] ss:$16 sps:$4 sm:$0xff]  }
 0x2d0   :  { %2617 = vmatprep.subr.bf16.mxu1 %v4230_v54  ;;  %v4287_v54 = vld [vmem:[#allocation2 + $0x60c] ss:$16 sps:$4 sm:$0xff]  }
 0x2d2   :  { %2532 = vmatpush1.bf16.msra.mxu0 %v4225_v36  ;;  %v4285_v36 = vld [vmem:[#allocation2 + $0x608] ss:$16 sps:$4 sm:$0xff]  }
 0x2d3   :  { %2618 = vmatpush1.bf16.msra.mxu1 %v4228_v61  ;;  %2533 = vmatprep.subr.bf16.mxu0 %v4233_v6  ;;  %v4290_v61 = vld [vmem:[#allocation2 + $0x62c] ss:$16 sps:$4 sm:$0xff]   ;;  %v4288_v6 = vld [vmem:[#allocation2 + $0x628] ss:$16 sps:$4 sm:$0xff]  }
 0x2d4   :  { %2628 = vmatprep.subr.bf16.mxu1 %v4236_v26  ;;  %v4291_v26 = vld [vmem:[#allocation2 + $0x648] ss:$16 sps:$4 sm:$0xff]  }
 0x2d6   :  { %2620 = vmatmul.mubr.bf16.vlgmr.msra.gmra.mrb[12].mxu1 %v4907_v11  ;;  %2534 = vmatpush1.bf16.msra.mxu0 %v4231_v55  ;;  %v4945_v11 = vpack.c.bf16 %v814_v50, %v814_v50  ;;  %v4296_v55 = vld [vmem:[#allocation2 + $0x66c] ss:$16 sps:$4 sm:$0xff]  }
 0x2d7   :  { %2629 = vmatpush1.bf16.msra.mxu1 %v4234_v5  ;;  %2660 = vmatprep.mubr.bf16.mxu1 %v4911_v41  ;;  %v4338_v41 = vld [vmem:[%s5273_s13 + $0x14] ss:$8 sps:$4 sm:$0xff]   ;;  %v4294_v5 = vld [vmem:[#allocation2 + $0x668] ss:$16 sps:$4 sm:$0xff]  }
 0x2d8   :  { %2535 = vmatprep.subr.bf16.mxu0 %v4239_v40  ;;  %2630 = vmatprep.subr.bf16.mxu1 %v4242_v44  ;;  %v4297_v40 = vld [vmem:[#allocation2 + $0x688] ss:$16 sps:$4 sm:$0xff]   ;;  %v4302_v44 = vld [vmem:[#allocation2 + $0x6ac] ss:$16 sps:$4 sm:$0xff]  }
 0x2da   :  { %2536 = vmatpush1.bf16.msra.mxu0 %v4237_v45 }
 0x2db   :  { %2631 = vmatpush1.bf16.msra.mxu1 %v4240_v29  ;;  %3198 = vmatprep.subr.bf16.mxu0 %v4335_v31  ;;  %v4303_v31 = vld [vmem:[#allocation2 + $0x6c8] ss:$16 sps:$4 sm:$0xff]  }
 0x2dc   :  { %2632 = vmatprep.subr.bf16.mxu1 %v4245_v53  ;;  %v4308_v53 = vld [vmem:[#allocation2 + $0x6ec] ss:$16 sps:$4 sm:$0xff]  }
 0x2dd   :  { %2538 = vmatmul.mubr.bf16.vlgmr.msra.gmra.mrb[24].mxu0 %v4945_v11 }
 0x2de   :  { %3199 = vmatpush1.bf16.msra.mxu0 %v4333_v30  ;;  %v4306_v30 = vld [vmem:[#allocation2 + $0x6e8] ss:$16 sps:$4 sm:$0xff]  }
 0x2df   :  { %2633 = vmatpush1.bf16.msra.mxu1 %v4243_v51  ;;  %3200 = vmatprep.subr.bf16.mxu0 %v4338_v41  ;;  %v4311_v51 = vld [vmem:[#allocation2 + $0x70c] ss:$16 sps:$4 sm:$0xff]  }
 0x2e0   :  { %2634 = vmatprep.subr.bf16.mxu1 %v4248_v62  ;;  %v4356_v41 = vld [vmem:[%s5273_s13 + $0x74] ss:$8 sps:$4 sm:$0xff]   ;;  %v4309_v62 = vld [vmem:[#allocation2 + $0x708] ss:$16 sps:$4 sm:$0xff]  }
 0x2e2   :  { %3201 = vmatpush1.bf16.msra.mxu0 %v4336_v63  ;;  %v4354_v63 = vld [vmem:[%s5273_s13 + $0x70] ss:$8 sps:$4 sm:$0xff]  }
 0x2e3   :  { %2635 = vmatpush1.bf16.msra.mxu1 %v4246_v2  ;;  %3202 = vmatprep.subr.bf16.mxu0 %v4341_v9  ;;  %v4314_v2 = vld [vmem:[#allocation2 + $0x72c] ss:$16 sps:$4 sm:$0xff]  }
 0x2e4   :  { %2636 = vmatprep.subr.bf16.mxu1 %v4251_v10  ;;  %v4359_v9 = vld [vmem:[%s5273_s13 + $0x84] ss:$8 sps:$4 sm:$0xff]   ;;  %v4312_v10 = vld [vmem:[#allocation2 + $0x728] ss:$16 sps:$4 sm:$0xff]  }
 0x2e6   :  { %3203 = vmatpush1.bf16.msra.mxu0 %v4339_v12  ;;  %v4357_v12 = vld [vmem:[%s5273_s13 + $0x80] ss:$8 sps:$4 sm:$0xff]  }
 0x2e7   :  { %2637 = vmatpush1.bf16.msra.mxu1 %v4249_v3  ;;  %3204 = vmatprep.subr.bf16.mxu0 %v4344_v46  ;;  %v4317_v3 = vld [vmem:[#allocation2 + $0x74c] ss:$16 sps:$4 sm:$0xff]   ;;  %v4360_v46 = vld [vmem:[%s5273_s13 + $0x90] ss:$8 sps:$4 sm:$0xff]  }
 0x2e8   :  { %2638 = vmatprep.subr.bf16.mxu1 %v4254_v7  ;;  %v4362_v7 = vld [vmem:[%s5273_s13 + $0x94] ss:$8 sps:$4 sm:$0xff]  }
 0x2ea   :  { %3205 = vmatpush1.bf16.msra.mxu0 %v4342_v13  ;;  %v4365_v13 = vld [vmem:[%s5273_s13 + $0xa4] ss:$8 sps:$4 sm:$0xff]  }
 0x2eb   :  { %2639 = vmatpush1.bf16.msra.mxu1 %v4252_v14  ;;  %3206 = vmatprep.subr.bf16.mxu0 %v4347_v16  ;;  %v4315_v14 = vld [vmem:[#allocation2 + $0x748] ss:$16 sps:$4 sm:$0xff]   ;;  %v4320_v16 = vld [vmem:[#allocation2 + $0x76c] ss:$16 sps:$4 sm:$0xff]  }
 0x2ec   :  { %2640 = vmatprep.subr.bf16.mxu1 %v4257_v17  ;;  %v4363_v17 = vld [vmem:[%s5273_s13 + $0xa0] ss:$8 sps:$4 sm:$0xff]  }
 0x2ee   :  { %3207 = vmatpush1.bf16.msra.mxu0 %v4345_v18  ;;  %v4368_v18 = vld [vmem:[%s5273_s13 + $0xb4] ss:$8 sps:$4 sm:$0xff]  }
 0x2ef   :  { %2641 = vmatpush1.bf16.msra.mxu1 %v4255_v48  ;;  %3208 = vmatprep.subr.bf16.mxu0 %v4350_v19  ;;  %v4318_v48 = vld [vmem:[#allocation2 + $0x768] ss:$16 sps:$4 sm:$0xff]   ;;  %v4323_v19 = vld [vmem:[#allocation2 + $0x78c] ss:$16 sps:$4 sm:$0xff]  }
 0x2f0   :  { %2642 = vmatprep.subr.bf16.mxu1 %v4260_v22  ;;  %v4366_v22 = vld [vmem:[%s5273_s13 + $0xb0] ss:$8 sps:$4 sm:$0xff]  }
 0x2f2   :  { %3209 = vmatpush1.bf16.msra.mxu0 %v4348_v49  ;;  %v4371_v49 = vld [vmem:[%s5273_s13 + $0xc4] ss:$8 sps:$4 sm:$0xff]  }
 0x2f3   :  { %2643 = vmatpush1.bf16.msra.mxu1 %v4258_v24  ;;  %3210 = vmatprep.subr.bf16.mxu0 %v4353_v42  ;;  %v4321_v24 = vld [vmem:[#allocation2 + $0x788] ss:$16 sps:$4 sm:$0xff]   ;;  %v4326_v42 = vld [vmem:[#allocation2 + $0x7ac] ss:$16 sps:$4 sm:$0xff]  }
 0x2f4   :  { %2644 = vmatprep.subr.bf16.mxu1 %v4263_v37  ;;  %v4369_v37 = vld [vmem:[%s5273_s13 + $0xc0] ss:$8 sps:$4 sm:$0xff]  }
 0x2f6   :  { %3211 = vmatpush1.bf16.msra.mxu0 %v4351_v38  ;;  %v4374_v38 = vld [vmem:[%s5273_s13 + $0xd4] ss:$8 sps:$4 sm:$0xff]  }
 0x2f7   :  { %2645 = vmatpush1.bf16.msra.mxu1 %v4261_v27  ;;  %3212 = vmatprep.subr.bf16.mxu0 %v4356_v41  ;;  %v4324_v27 = vld [vmem:[#allocation2 + $0x7a8] ss:$16 sps:$4 sm:$0xff]  }
 0x2f8   :  { %2646 = vmatprep.subr.bf16.mxu1 %v4266_v57  ;;  %v4329_v57 = vld [vmem:[#allocation2 + $0x7cc] ss:$16 sps:$4 sm:$0xff]  }
 0x2fa   :  { %3213 = vmatpush1.bf16.msra.mxu0 %v4354_v63 }
 0x2fb   :  { %2647 = vmatpush1.bf16.msra.mxu1 %v4264_v28  ;;  %3214 = vmatprep.subr.bf16.mxu0 %v4359_v9  ;;  %v4372_v28 = vld [vmem:[%s5273_s13 + $0xd0] ss:$8 sps:$4 sm:$0xff]  }
 0x2fc   :  { %2648 = vmatprep.subr.bf16.mxu1 %v4269_v20  ;;  %v4377_v20 = vld [vmem:[%s5273_s13 + $0xe4] ss:$8 sps:$4 sm:$0xff]  }
 0x2fe   :  { %3215 = vmatpush1.bf16.msra.mxu0 %v4357_v12 }
 0x2ff   :  { %2649 = vmatpush1.bf16.msra.mxu1 %v4267_v8  ;;  %3216 = vmatprep.subr.bf16.mxu0 %v4362_v7  ;;  %v4327_v8 = vld [vmem:[#allocation2 + $0x7c8] ss:$16 sps:$4 sm:$0xff]  }
 0x300   :  { %2650 = vmatprep.subr.bf16.mxu1 %v4272_v60  ;;  %v4332_v60 = vld [vmem:[#allocation2 + $0x7ec] ss:$16 sps:$4 sm:$0xff]  }
 0x302   :  { %3217 = vmatpush1.bf16.msra.mxu0 %v4360_v46 }
 0x303   :  { %2651 = vmatpush1.bf16.msra.mxu1 %v4270_v32  ;;  %3218 = vmatprep.subr.bf16.mxu0 %v4365_v13  ;;  %v4375_v32 = vld [vmem:[%s5273_s13 + $0xe0] ss:$8 sps:$4 sm:$0xff]  }
 0x304   :  { %2652 = vmatprep.subr.bf16.mxu1 %v4275_v1  ;;  %v4380_v1 = vld [vmem:[%s5273_s13 + $0xf4] ss:$8 sps:$4 sm:$0xff]  }
 0x306   :  { %3219 = vmatpush1.bf16.msra.mxu0 %v4363_v17 }
 0x307   :  { %2653 = vmatpush1.bf16.msra.mxu1 %v4273_v33  ;;  %3220 = vmatprep.subr.bf16.mxu0 %v4368_v18  ;;  %v4330_v33 = vld [vmem:[#allocation2 + $0x7e8] ss:$16 sps:$4 sm:$0xff]  }
 0x308   :  { %2654 = vmatprep.subr.bf16.mxu1 %v4278_v47  ;;  %v4378_v47 = vld [vmem:[%s5273_s13 + $0xf0] ss:$8 sps:$4 sm:$0xff]   ;;  %v4381_v18 = vld [vmem:[%s5273_s13 + $0x100] ss:$8 sps:$4 sm:$0xff]  }
 0x30a   :  { %3221 = vmatpush1.bf16.msra.mxu0 %v4366_v22  ;;  %v4384_v22 = vld [vmem:[%s5273_s13 + $0x110] ss:$8 sps:$4 sm:$0xff]  }
 0x30b   :  { %2655 = vmatpush1.bf16.msra.mxu1 %v4276_v4  ;;  %3222 = vmatprep.subr.bf16.mxu0 %v4371_v49  ;;  %v4383_v4 = vld [vmem:[%s5273_s13 + $0x104] ss:$8 sps:$4 sm:$0xff]  }
 0x30c   :  { %2656 = vmatprep.subr.bf16.mxu1 %v4281_v59  ;;  %v5051_v59 = vld [vmem:[%s5270_s10] sm:$0xf]  ;;  %v4389_v49 = vld [vmem:[%s5273_s13 + $0x124] ss:$8 sps:$4 sm:$0xff]  }
 0x30e   :  { %3223 = vmatpush1.bf16.msra.mxu0 %v4369_v37  ;;  %v4390_v37 = vld [vmem:[%s5273_s13 + $0x130] ss:$8 sps:$4 sm:$0xff]  }
 0x30f   :  { %2657 = vmatpush1.bf16.msra.mxu1 %v4279_v21  ;;  %3224 = vmatprep.subr.bf16.mxu0 %v4374_v38  ;;  %v1085_v21 = vrot.slane %v5051_v59, %v4808_v56  ;;  %v4395_v38 = vld [vmem:[%s5273_s13 + $0x144] ss:$8 sps:$4 sm:$0xff]  }
 0x310   :  { %2658 = vmatprep.subr.bf16.mxu1 %v4284_v34  ;;  %v1089_v34 = vrot.slane %v5051_v59, %v4811_v58 }
 0x312   :  { %3225 = vmatpush1.bf16.msra.mxu0 %v4372_v28  ;;  %v4396_v28 = vld [vmem:[%s5273_s13 + $0x150] ss:$8 sps:$4 sm:$0xff]  }
 0x313   :  { %2659 = vmatpush1.bf16.msra.mxu1 %v4282_v35  ;;  %3226 = vmatprep.subr.bf16.mxu0 %v4377_v20  ;;  %v5060_v35 = vld [vmem:[%s5271_s11] sm:$0xf]  ;;  %v4401_v20 = vld [vmem:[%s5273_s13 + $0x164] ss:$8 sps:$4 sm:$0xff]  }
 0x314   :  { %2669 = vmatprep.subr.bf16.mxu1 %v4287_v54 }
 0x316   :  { %2661 = vmatmul.mubr.bf16.vlgmr.msra.gmra.mrb[12].mxu1 %v4926_v43  ;;  %v4300_v43 = vld [vmem:[#allocation2 + $0x6a8] ss:$16 sps:$4 sm:$0xff]   ;;  %3227 = vmatpush1.bf16.msra.mxu0 %v4375_v32 }
 0x317   :  { %2670 = vmatpush1.bf16.msra.mxu1 %v4285_v36  ;;  %2701 = vmatprep.mubr.bf16.mxu1 %v4928_v0  ;;  %v4305_v0 = vld [vmem:[#allocation2 + $0x6cc] ss:$16 sps:$4 sm:$0xff]   ;;  %v2715_v36 = vrot.slane %v5060_v35, %v4808_v56  ;;  %v4402_v32 = vld [vmem:[%s5273_s13 + $0x170] ss:$8 sps:$4 sm:$0xff]  }
 0x318   :  { %2671 = vmatprep.subr.bf16.mxu1 %v4290_v61  ;;  %3228 = vmatprep.subr.bf16.mxu0 %v4380_v1  ;;  %v4407_v1 = vld [vmem:[%s5273_s13 + $0x184] ss:$8 sps:$4 sm:$0xff]  }
 0x31a   :  { %3229 = vmatpush1.bf16.msra.mxu0 %v4378_v47  ;;  %v4410_v47 = vld [vmem:[%s5273_s13 + $0x194] ss:$8 sps:$4 sm:$0xff]  }
 0x31b   :  { %2672 = vmatpush1.bf16.msra.mxu1 %v4288_v6  ;;  %3239 = vmatprep.subr.bf16.mxu0 %v4383_v4  ;;  %v4408_v4 = vld [vmem:[%s5273_s13 + $0x190] ss:$8 sps:$4 sm:$0xff]  }
 0x31c   :  { %2673 = vmatprep.subr.bf16.mxu1 %v4293_v15  ;;  %v2719_v15 = vrot.slane %v5060_v35, %v4811_v58 }
 0x31f   :  { %2674 = vmatpush1.bf16.msra.mxu1 %v4291_v26 }
 0x320   :  { %2675 = vmatprep.subr.bf16.mxu1 %v4296_v55 }
 0x323   :  { %2676 = vmatpush1.bf16.msra.mxu1 %v4294_v5 }
 0x324   :  { %2677 = vmatprep.subr.bf16.mxu1 %v4299_v39 }
 0x327   :  { %2678 = vmatpush1.bf16.msra.mxu1 %v4297_v40 }
 0x328   :  { %v4986_v52 = vpop.f32.mrb[8].mxu1  ;;  %2679 = vmatprep.subr.bf16.mxu1 %v4302_v44 }
 0x329   :  { %v4988_v45 = vpop.f32.mrb[9].mxu1  ;;  %v2417_v54 = vadd.f32 %v4986_v52, %v1085_v21  ;;  %v4413_v21 = vld [vmem:[%s5273_s13 + $0x1a4] ss:$8 sps:$4 sm:$0xff]  }
 0x32a   :  { %v2420_v29 = vpop.f32.mrb[10].mxu1  ;;  %v2419_v61 = vadd.f32 %v4988_v45, %v1089_v34  ;;  %v4411_v34 = vld [vmem:[%s5273_s13 + $0x1a0] ss:$8 sps:$4 sm:$0xff]  }
 0x32b   :  { %2680 = vmatpush1.bf16.msra.mxu1 %v4300_v43  ;;  %v2421_v50 = vpop.f32.mrb[11].mxu1 }
 0x32c   :  { %2681 = vmatprep.subr.bf16.mxu1 %v4305_v0 }
 0x32f   :  { %2682 = vmatpush1.bf16.msra.mxu1 %v4303_v31 }
 0x330   :  { %2683 = vmatprep.subr.bf16.mxu1 %v4308_v53 }
 0x333   :  { %2684 = vmatpush1.bf16.msra.mxu1 %v4306_v30 }
 0x334   :  { %2685 = vmatprep.subr.bf16.mxu1 %v4311_v51 }
 0x337   :  { %2686 = vmatpush1.bf16.msra.mxu1 %v4309_v62 }
 0x338   :  { %2687 = vmatprep.subr.bf16.mxu1 %v4314_v2 }
 0x33b   :  { %2688 = vmatpush1.bf16.msra.mxu1 %v4312_v10 }
 0x33c   :  { %2689 = vmatprep.subr.bf16.mxu1 %v4317_v3 }
 0x33f   :  { %2690 = vmatpush1.bf16.msra.mxu1 %v4315_v14 }
 0x340   :  { %2691 = vmatprep.subr.bf16.mxu1 %v4320_v16 }
 0x343   :  { %2692 = vmatpush1.bf16.msra.mxu1 %v4318_v48 }
 0x344   :  { %2693 = vmatprep.subr.bf16.mxu1 %v4323_v19  ;;  %v4386_v19 = vld [vmem:[%s5273_s13 + $0x114] ss:$8 sps:$4 sm:$0xff]  }
 0x347   :  { %2694 = vmatpush1.bf16.msra.mxu1 %v4321_v24  ;;  %v4387_v24 = vld [vmem:[%s5273_s13 + $0x120] ss:$8 sps:$4 sm:$0xff]  }
 0x348   :  { %2695 = vmatprep.subr.bf16.mxu1 %v4326_v42  ;;  %v4392_v42 = vld [vmem:[%s5273_s13 + $0x134] ss:$8 sps:$4 sm:$0xff]  }
 0x34b   :  { %2696 = vmatpush1.bf16.msra.mxu1 %v4324_v27  ;;  %v4393_v27 = vld [vmem:[%s5273_s13 + $0x140] ss:$8 sps:$4 sm:$0xff]  }
 0x34c   :  { %2697 = vmatprep.subr.bf16.mxu1 %v4329_v57  ;;  %v4398_v57 = vld [vmem:[%s5273_s13 + $0x154] ss:$8 sps:$4 sm:$0xff]  }
 0x34f   :  { %2698 = vmatpush1.bf16.msra.mxu1 %v4327_v8  ;;  %v4399_v8 = vld [vmem:[%s5273_s13 + $0x160] ss:$8 sps:$4 sm:$0xff]  }
 0x350   :  { %2699 = vmatprep.subr.bf16.mxu1 %v4332_v60  ;;  %v4404_v60 = vld [vmem:[%s5273_s13 + $0x174] ss:$8 sps:$4 sm:$0xff]  }
 0x353   :  { %2700 = vmatpush1.bf16.msra.mxu1 %v4330_v33  ;;  %v4405_v33 = vld [vmem:[%s5273_s13 + $0x180] ss:$8 sps:$4 sm:$0xff]  }
 0x356   :  { %2702 = vmatmul.mubr.bf16.vlgmr.msra.gmra.mrb[12].mxu1 %v4945_v11  ;;  %v5065_v11 = vld [vmem:[%s5272_s12] sm:$0xf] }
 0x357   :  { %v2741_v55 = vrot.slane %v5065_v11, %v4808_v56  ;;  %v2745_v40 = vrot.slane %v5065_v11, %v4811_v58 }
 0x3b0   :  { %v2539_v6 = vpop.f32.mrb[24].mxu0 }
 0x3b1   :  { %v3913_v26 = vadd.f32 %v2539_v6, %v2417_v54  ;;  %v2541_v5 = vpop.f32.mrb[25].mxu0  ;;  %v4416_v54 = vld [vmem:[%s5273_s13 + $0x1b4] ss:$8 sps:$4 sm:$0xff]   ;;  %v4417_v6 = vld [vmem:[%s5273_s13 + $0x1c0] ss:$8 sps:$4 sm:$0xff]  }
 0x3b2   :  { %v3915_v39 = vadd.f32 %v2541_v5, %v2419_v61  ;;  %v2543_v44 = vpop.f32.mrb[26].mxu0  ;;  %v4419_v61 = vld [vmem:[%s5273_s13 + $0x1c4] ss:$8 sps:$4 sm:$0xff]   ;;  %v4423_v5 = vld [vmem:[%s5273_s13 + $0x1e0] ss:$8 sps:$4 sm:$0xff]  }
 0x3b3   :  { %v2732_v43 = vmul.f32 %v3913_v26, %v2715_v36  ;;  %v2544_v52 = vpop.f32.mrb[27].mxu0  ;;  %v4414_v36 = vld [vmem:[%s5273_s13 + $0x1b0] ss:$8 sps:$4 sm:$0xff]   ;;  %v1093_v44 = vrot.slane %v5051_v59, %v4831_v23 }
 0x3b4   :  { %v2733_v0 = vmul.f32 %v3915_v39, %v2719_v15  ;;  %v4422_v15 = vld [vmem:[%s5273_s13 + $0x1d4] ss:$8 sps:$4 sm:$0xff]   ;;  %v4420_v26 = vld [vmem:[%s5273_s13 + $0x1d0] ss:$8 sps:$4 sm:$0xff]   ;;  %v2723_v52 = vrot.slane %v5060_v35, %v4831_v23 }
 0x3b5   :  { %v2758_v29 = vadd.f32 %v2741_v55, %v2732_v43  ;;  %v4425_v55 = vld [vmem:[%s5273_s13 + $0x1e4] ss:$8 sps:$4 sm:$0xff]   ;;  %v4428_v39 = vld [vmem:[%s5273_s13 + $0x1f4] ss:$8 sps:$4 sm:$0xff]   ;;  %v1097_v43 = vrot.slane %v5051_v59, %v4839_v25 }
 0x3b6   :  { %v2759_v50 = vadd.f32 %v2745_v40, %v2733_v0  ;;  %v4426_v40 = vld [vmem:[%s5273_s13 + $0x1f0] ss:$8 sps:$4 sm:$0xff]  }
 0x3b7   :  { %v2766_v45 = vmul.f32 0.044715, %v2758_v29  ;;  %v2762_v3 = vmul.f32 0.5, %v2758_v29 }
 0x3b8   :  { %v2767_v31 = vmul.f32 0.044715, %v2759_v50  ;;  %v2763_v7 = vmul.f32 0.5, %v2759_v50 }
 0x3b9   :  { %v2770_v53 = vmul.f32 %v2766_v45, %v2758_v29  ;;  %v2749_v45 = vrot.slane %v5065_v11, %v4831_v23 }
 0x3ba   :  { %v2771_v30 = vmul.f32 %v2767_v31, %v2759_v50 }
 0x3bb   :  { %v2774_v51 = vmul.f32 %v2770_v53, %v2758_v29 }
 0x3bc   :  { %v2775_v41 = vmul.f32 %v2771_v30, %v2759_v50  ;;  %v2753_v30 = vrot.slane %v5065_v11, %v4839_v25 }
 0x3bd   :  { %v2778_v62 = vadd.f32 %v2774_v51, %v2758_v29  ;;  %v2727_v29 = vrot.slane %v5060_v35, %v4839_v25 }
 0x3be   :  { %v2779_v63 = vadd.f32 %v2775_v41, %v2759_v50 }
 0x3bf   :  { %v2782_v2 = vmul.f32 0.7978846, %v2778_v62 }
 0x3c0   :  { %v2783_v9 = vmul.f32 0.7978846, %v2779_v63 }
 0x3c1   :  { %4463 = vtanh.f32 %v2782_v2 }
 0x3c2   :  { %4465 = vtanh.f32 %v2783_v9 }
 0x3cb   :  { %v4464_v10 = vpop.eup %4463 }
 0x3cc   :  { %v4466_v12 = vpop.eup %4465  ;;  %v2790_v46 = vadd.f32 1.0, %v4464_v10 }
 0x3cd   :  { %v2791_v13 = vadd.f32 1.0, %v4466_v12 }
 0x3ce   :  { %v2794_v14 = vmul.f32 %v2790_v46, %v2762_v3 }
 0x3cf   :  { %v2795_v16 = vmul.f32 %v2791_v13, %v2763_v7 }
 0x3d0   :  { %v2798_v48 = vpack.c.bf16 %v2794_v14, %v2794_v14 }
 0x3d1   :  { %v2799_v17 = vpack.c.bf16 %v2795_v16, %v2795_v16 }
 0x3d3   :  { %3230 = vmatprep.mubr.bf16.mxu0 %v2799_v17 }
 0x3d4   :  { %3231 = vmatmul.mubr.bf16.vlgmr.msra.gmra.mrb[28].mxu0 %v2798_v48 }
 0x3d5   :  { %3240 = vmatpush1.bf16.msra.mxu0 %v4381_v18 }
 0x3d6   :  { %3241 = vmatprep.subr.bf16.mxu0 %v4386_v19 }
 0x3d9   :  { %3242 = vmatpush1.bf16.msra.mxu0 %v4384_v22 }
 0x3da   :  { %3243 = vmatprep.subr.bf16.mxu0 %v4389_v49 }
 0x3dd   :  { %3244 = vmatpush1.bf16.msra.mxu0 %v4387_v24 }
 0x3de   :  { %3245 = vmatprep.subr.bf16.mxu0 %v4392_v42  ;;  %v4429_v42 = vld [vmem:[%s5277_s17 + $0x40] sm:$0xff]  }
 0x3df   :  { %3890 = vmatprep.subr.bf16.mxu1 %v4429_v42 }
 0x3e1   :  { %3246 = vmatpush1.bf16.msra.mxu0 %v4390_v37  ;;  %v4430_v37 = vld [vmem:[%s5277_s17] sm:$0xff]  }
 0x3e2   :  { %3247 = vmatprep.subr.bf16.mxu0 %v4395_v38  ;;  %3891 = vmatpush3.bf16.msra.mxu1 %v4430_v37  ;;  %v4431_v38 = vld [vmem:[%s5277_s17 + $0x48] sm:$0xff]  }
 0x3e3   :  { %3892 = vmatprep.subr.bf16.mxu1 %v4431_v38 }
 0x3e5   :  { %3248 = vmatpush1.bf16.msra.mxu0 %v4393_v27  ;;  %v4432_v27 = vld [vmem:[%s5277_s17 + $0x8] sm:$0xff]  }
 0x3e6   :  { %3249 = vmatprep.subr.bf16.mxu0 %v4398_v57  ;;  %v4433_v57 = vld [vmem:[%s5277_s17 + $0x50] sm:$0xff]   ;;  %3893 = vmatpush3.bf16.msra.mxu1 %v4432_v27 }
 0x3e7   :  { %3894 = vmatprep.subr.bf16.mxu1 %v4433_v57 }
 0x3e9   :  { %3250 = vmatpush1.bf16.msra.mxu0 %v4396_v28  ;;  %v4434_v28 = vld [vmem:[%s5277_s17 + $0x10] sm:$0xff]  }
 0x3ea   :  { %3251 = vmatprep.subr.bf16.mxu0 %v4401_v20  ;;  %v4435_v20 = vld [vmem:[%s5277_s17 + $0x58] sm:$0xff]   ;;  %3895 = vmatpush3.bf16.msra.mxu1 %v4434_v28 }
 0x3eb   :  { %3896 = vmatprep.subr.bf16.mxu1 %v4435_v20 }
 0x3ed   :  { %3252 = vmatpush1.bf16.msra.mxu0 %v4399_v8  ;;  %v4436_v8 = vld [vmem:[%s5277_s17 + $0x18] sm:$0xff]  }
 0x3ee   :  { %3253 = vmatprep.subr.bf16.mxu0 %v4404_v60  ;;  %v4437_v60 = vld [vmem:[%s5277_s17 + $0x60] sm:$0xff]   ;;  %3897 = vmatpush3.bf16.msra.mxu1 %v4436_v8 }
 0x3ef   :  { %3898 = vmatprep.subr.bf16.mxu1 %v4437_v60 }
 0x3f1   :  { %3254 = vmatpush1.bf16.msra.mxu0 %v4402_v32  ;;  %v4438_v32 = vld [vmem:[%s5277_s17 + $0x20] sm:$0xff]  }
 0x3f2   :  { %3255 = vmatprep.subr.bf16.mxu0 %v4407_v1  ;;  %v4439_v1 = vld [vmem:[%s5277_s17 + $0x68] sm:$0xff]   ;;  %3899 = vmatpush3.bf16.msra.mxu1 %v4438_v32 }
 0x3f3   :  { %3900 = vmatprep.subr.bf16.mxu1 %v4439_v1 }
 0x3f5   :  { %3256 = vmatpush1.bf16.msra.mxu0 %v4405_v33  ;;  %v4440_v33 = vld [vmem:[%s5277_s17 + $0x28] sm:$0xff]  }
 0x3f6   :  { %3257 = vmatprep.subr.bf16.mxu0 %v4410_v47  ;;  %v4441_v47 = vld [vmem:[%s5277_s17 + $0x70] sm:$0xff]   ;;  %3901 = vmatpush3.bf16.msra.mxu1 %v4440_v33 }
 0x3f7   :  { %3902 = vmatprep.subr.bf16.mxu1 %v4441_v47 }
 0x3f9   :  { %3258 = vmatpush1.bf16.msra.mxu0 %v4408_v4  ;;  %v4442_v4 = vld [vmem:[%s5277_s17 + $0x30] sm:$0xff]  }
 0x3fa   :  { %3259 = vmatprep.subr.bf16.mxu0 %v4413_v21  ;;  %v4443_v21 = vld [vmem:[%s5277_s17 + $0x78] sm:$0xff]   ;;  %3903 = vmatpush3.bf16.msra.mxu1 %v4442_v4 }
 0x3fb   :  { %3904 = vmatprep.subr.bf16.mxu1 %v4443_v21 }
 0x3fd   :  { %3260 = vmatpush1.bf16.msra.mxu0 %v4411_v34  ;;  %v4444_v34 = vld [vmem:[%s5277_s17 + $0x38] sm:$0xff]  }
 0x3fe   :  { %3261 = vmatprep.subr.bf16.mxu0 %v4416_v54  ;;  %3905 = vmatpush3.bf16.msra.mxu1 %v4444_v34  ;;  %v2866_v54 = vld [vmem:[%s5274_s14] sm:$0x3] }
 0x401   :  { %3262 = vmatpush1.bf16.msra.mxu0 %v4414_v36  ;;  %v3280_v36 = vld [vmem:[%s5275_s15] sm:$0x3] }
 0x402   :  { %3263 = vmatprep.subr.bf16.mxu0 %v4419_v61  ;;  %v2871_v61 = vrot.slane %v2866_v54, %v4808_v56 }
 0x405   :  { %3264 = vmatpush1.bf16.msra.mxu0 %v4417_v6  ;;  %v3294_v6 = vld [vmem:[%s5276_s16] sm:$0x3]  ;;  %s4527_s16 = smov [#allocation5]  }
 0x406   :  { %3265 = vmatprep.subr.bf16.mxu0 %v4422_v15  ;;  %v2875_v15 = vrot.slane %v2866_v54, %v4811_v58  ;;  %s3510_s17 = sshll.u32 %s4527_s16, 4  ;;  %s3511_s17 = int_to_ptr.vmem [resolvable:$true] %s3510_s17 }
 0x407   :  { %s4497_s12 = scalar_lea.vmem %s3511_s17, 32  ;;  %p4502_p9 = scmp.lt.s32.totalorder %s3511_s17, %s3511_s17 }
 0x408   :  { %p4498_p8 = scmp.ne.s32.totalorder %s3511_s17, %s4497_s12  ;;  %p4503_p10 = scmp.lt.s32.totalorder %s4497_s12, %s4497_s12 }
 0x409   :  { %3266 = vmatpush1.bf16.msra.mxu0 %v4420_v26  ;;  %v3285_v26 = vrot.slane %v3280_v36, %v4808_v56 }
 0x40a   :  { %3267 = vmatprep.subr.bf16.mxu0 %v4425_v55  ;;  %p4504_p11 = por %p4503_p10, %p4502_p9 }
 0x40c   :  { %p4505_p12 = pnand %p4504_p11, %p4498_p8 }
 0x40d   :  { %3268 = vmatpush1.bf16.msra.mxu0 %v4423_v5  ;;  %v3289_v5 = vrot.slane %v3280_v36, %v4811_v58 }
 0x40e   :  { %3269 = vmatprep.subr.bf16.mxu0 %v4428_v39 }
 0x411   :  { %3270 = vmatpush1.bf16.msra.mxu0 %v4426_v40  ;;  %v3299_v40 = vrot.slane %v3294_v6, %v4808_v56 }
 0x429   :  { %v2703_v0 = vpop.f32.mrb[12].mxu1 }
 0x42a   :  { %v3916_v50 = vadd.f32 %v2703_v0, %v1093_v44  ;;  %v2705_v31 = vpop.f32.mrb[13].mxu1 }
 0x42b   :  { %v3917_v53 = vadd.f32 %v2705_v31, %v1097_v43  ;;  %v2707_v51 = vpop.f32.mrb[14].mxu1 }
 0x42c   :  { %v2734_v41 = vmul.f32 %v3916_v50, %v2723_v52  ;;  %v2708_v62 = vpop.f32.mrb[15].mxu1  ;;  %v3303_v52 = vrot.slane %v3294_v6, %v4811_v58 }
 0x42d   :  { %v2735_v59 = vmul.f32 %v3917_v53, %v2727_v29 }
 0x42e   :  { %v2760_v63 = vadd.f32 %v2749_v45, %v2734_v41 }
 0x42f   :  { %v2761_v2 = vadd.f32 %v2753_v30, %v2735_v59 }
 0x430   :  { %v2768_v9 = vmul.f32 0.044715, %v2760_v63  ;;  %v2764_v11 = vmul.f32 0.5, %v2760_v63 }
 0x431   :  { %v2769_v10 = vmul.f32 0.044715, %v2761_v2  ;;  %v2765_v18 = vmul.f32 0.5, %v2761_v2 }
 0x432   :  { %v2772_v12 = vmul.f32 %v2768_v9, %v2760_v63 }
 0x433   :  { %v2773_v3 = vmul.f32 %v2769_v10, %v2761_v2 }
 0x434   :  { %v2776_v35 = vmul.f32 %v2772_v12, %v2760_v63 }
 0x435   :  { %v2777_v46 = vmul.f32 %v2773_v3, %v2761_v2 }
 0x436   :  { %v2780_v7 = vadd.f32 %v2776_v35, %v2760_v63 }
 0x437   :  { %v2781_v13 = vadd.f32 %v2777_v46, %v2761_v2 }
 0x438   :  { %v2784_v23 = vmul.f32 0.7978846, %v2780_v7 }
 0x439   :  { %v2785_v14 = vmul.f32 0.7978846, %v2781_v13 }
 0x43a   :  { %4467 = vtanh.f32 %v2784_v23 }
 0x43b   :  { %4469 = vtanh.f32 %v2785_v14 }
 0x444   :  { %v4468_v16 = vpop.eup %4467 }
 0x445   :  { %v4470_v25 = vpop.eup %4469  ;;  %v2792_v17 = vadd.f32 1.0, %v4468_v16 }
 0x446   :  { %v2793_v48 = vadd.f32 1.0, %v4470_v25 }
 0x447   :  { %v2796_v19 = vmul.f32 %v2792_v17, %v2764_v11  ;;  %v3873_v11 = vld [vmem:[%s5278_s18] ss:$0 sm:$0xff] }
 0x448   :  { %v2797_v22 = vmul.f32 %v2793_v48, %v2765_v18 }
 0x449   :  { %v2800_v24 = vpack.c.bf16 %v2796_v19, %v2796_v19 }
 0x44a   :  { %v2801_v49 = vpack.c.bf16 %v2797_v22, %v2797_v22 }
 0x44c   :  { %3271 = vmatprep.mubr.bf16.mxu0 %v2801_v49 }
 0x44d   :  { %3272 = vmatmul.mubr.bf16.vlgmr.msra.gmra.mrb[28].mxu0 %v2800_v24 }
 0x520   :  { %v3273_v55 = vpop.f32.mrb[28].mxu0 }
 0x521   :  { %v3918_v39 = vadd.f32 %v3273_v55, %v2871_v61  ;;  %v3275_v44 = vpop.f32.mrb[29].mxu0 }
 0x522   :  { %v3919_v43 = vadd.f32 %v3275_v44, %v2875_v15  ;;  %v3277_v0 = vpop.f32.mrb[30].mxu0 }
 0x523   :  { %v3292_v29 = vmul.f32 %v3918_v39, %v3285_v26  ;;  %v3278_v50 = vpop.f32.mrb[31].mxu0 }
 0x524   :  { %v3293_v45 = vmul.f32 %v3919_v43, %v3289_v5 }
 0x525   :  { %v3306_v31 = vadd.f32 %v3299_v40, %v3292_v29 }
 0x526   :  { %v3307_v53 = vadd.f32 %v3303_v52, %v3293_v45 }
 0x527   :  { %v3310_v30 = vmul.f32 0.044715, %v3306_v31  ;;  %v3308_v3 = vmul.f32 0.5, %v3306_v31 }
 0x528   :  { %v3311_v51 = vmul.f32 0.044715, %v3307_v53  ;;  %v3309_v46 = vmul.f32 0.5, %v3307_v53 }
 0x529   :  { %v3312_v41 = vmul.f32 %v3310_v30, %v3306_v31 }
 0x52a   :  { %v3313_v62 = vmul.f32 %v3311_v51, %v3307_v53 }
 0x52b   :  { %v3314_v59 = vmul.f32 %v3312_v41, %v3306_v31 }
 0x52c   :  { %v3315_v63 = vmul.f32 %v3313_v62, %v3307_v53 }
 0x52d   :  { %v3316_v2 = vadd.f32 %v3314_v59, %v3306_v31 }
 0x52e   :  { %v3317_v9 = vadd.f32 %v3315_v63, %v3307_v53 }
 0x52f   :  { %v3318_v10 = vmul.f32 0.7978846, %v3316_v2 }
 0x530   :  { %v3319_v56 = vmul.f32 0.7978846, %v3317_v9 }
 0x531   :  { %4471 = vtanh.f32 %v3318_v10 }
 0x532   :  { %4473 = vtanh.f32 %v3319_v56 }
 0x53b   :  { %v4472_v12 = vpop.eup %4471 }
 0x53c   :  { %v4474_v58 = vpop.eup %4473  ;;  %v3322_v35 = vadd.f32 1.0, %v4472_v12 }
 0x53d   :  { %v3323_v7 = vadd.f32 1.0, %v4474_v58 }
 0x53e   :  { %v3324_v13 = vmul.f32 %v3322_v35, %v3308_v3 }
 0x53f   :  { %v3325_v23 = vmul.f32 %v3323_v7, %v3309_v46 }
 0x540   :  { %v3326_v16 = vpack.c.bf16 %v3324_v13, %v3324_v13 }
 0x541   :  { %v3327_v14 = vpack.c.bf16 %v3325_v23, %v3325_v23 }
 0x543   :  { %3495 = vmatprep.mubr.bf16.mxu1 %v3327_v14 }
 0x544   :  { %3496 = vmatmul.mubr.bf16.vlgmr.msra.gmra.mrb[16].mxu1 %v3326_v16 }
 0x617   :  { %v3906_v25 = vpop.f32.mrb[16].mxu1 }
 0x618   :  { %v3907_v17 = vpop.f32.mrb[17].mxu1 }
 0x619   :  { %v3908_v18 = vadd.f32 %v3907_v17, %v3906_v25  ;;  %v3909_v48 = vpop.f32.mrb[18].mxu1 }
 0x61a   :  { %v3910_v19 = vpop.f32.mrb[19].mxu1 }
 0x61b   :  { %v3498_v22 = vadd.f32 %v3908_v18, %v3873_v11 }
 0x61d   :  { %3503 = vst [vmem:[#allocation5] sm:$0x3] %v3498_v22 }
 0x61e   :  { %4508 = shalt.err (!%p4505_p12)
}
 0x61f   :  { %s4509_s18 = scalar_lea.hbm %s5279_s19, 32 }
 0x620   :  { %p4510_p13 = scmp.ne.s32.totalorder %s5279_s19, %s4509_s18  ;;  %p4513_p0 = scmp.lt.u32.totalorder %s4509_s18, %s5279_s19 }
 0x622   :  { %p4515_p1 = pnand %p4513_p0, %p4510_p13 }
 0x624   :  { %4518 = shalt.err (!%p4515_p1)
}
 0x625   :  { %3513 = dma.vmem_to_hbm [thread:$0]  %s3511_s17, 32, %s5279_s19, [#allocation4]  }
 0x626   :  { %4521 = dma.done.wait [#allocation4], 32  }
 0x627   :  { %4522 = vsyncadd [#allocation4], 4294967264 }
 0x628   :  { %3517 = vsyncpa [#allocation3], 1 }
 0x629   :  { %3518 = vsyncpa [#allocation4], 1 }

</bundles_post_ra>
